<compile_context>
chip_gen: v7x
topology: tpu7x:2x2x1
jax: 0.10.0
libtpu: 0.0.40
codegen_flags: <defaults>
</compile_context>

<pallas_src>
import math
import functools

import numpy as np
import jax
import jax.numpy as jnp
from jax import lax
from jax.experimental import pallas as pl
from jax.experimental.pallas import tpu as pltpu


# ----------------------------- fused Pallas kernel ---------------------------

def _depth_conv_proj(xp_ref, wd_ref, bd_ref, wp_ref, bp_ref):
    """Depth_conv: depthwise 3x3 (zero padding pre-applied) + pointwise 1x1.

    xp_ref: (H+2, W+2, C) padded NHWC input tile
    wd_ref: (3, 3, C)     depthwise per-channel taps
    bd_ref: (1, C)        depthwise bias
    wp_ref: (C, C_out)    pointwise weight
    bp_ref: (1, C_out)    pointwise bias
    Returns an (H*W, C_out) f32 array kept in VMEM/registers.
    """
    Hp, Wp, C = xp_ref.shape
    H, W = Hp - 2, Wp - 2
    acc = jnp.zeros((H, W, C), jnp.float32)
    for dy in range(3):
        for dx in range(3):
            acc = acc + wd_ref[dy, dx:dx + 1, :] * xp_ref[dy:dy + H, dx:dx + W, :]
    dw = acc.reshape(H * W, C) + bd_ref[...]
    # Default MXU precision (bf16 inputs, f32 accumulation) per perf review.
    return jnp.dot(dw, wp_ref[...], preferred_element_type=jnp.float32) + bp_ref[...]


def fused_cross_attention_kernel(
        xh_ref, xc_ref,
        wdq_ref, bdq_ref, wpq_ref, bpq_ref,
        wdk_ref, bdk_ref, wpk_ref, bpk_ref,
        wdv_ref, bdv_ref, wpv_ref, bpv_ref,
        o_ref, *, scale):
    """Per-batch fused Depth_conv(q/k/v) + per-row channel attention.

    o_ref: (C, H*W) lane-dense output block; it is exactly the final NCHW
    result for this batch, flattened over (H, W).
    """
    Hp, Wp, _ = xh_ref.shape
    H, W = Hp - 2, Wp - 2

    q = _depth_conv_proj(xh_ref, wdq_ref, bdq_ref, wpq_ref, bpq_ref)   # (H*W, C)
    k = _depth_conv_proj(xc_ref, wdk_ref, bdk_ref, wpk_ref, bpk_ref)   # (H*W, C)
    v = _depth_conv_proj(xc_ref, wdv_ref, bdv_ref, wpv_ref, bpv_ref)   # (H*W, C)

    # transpose_for_scores (permute(0,2,1,3)) == attention over channels done
    # independently per (batch, image row).  For each row h:
    #   scores = Q_h @ K_h^T (contract over W), softmax over key channels,
    #   ctx_h  = P @ V_h -> (C, W), stored at lanes [h*W, (h+1)*W).
    for h in range(H):
        qh = q[h * W:(h + 1) * W, :]                   # (W, C)
        kh = k[h * W:(h + 1) * W, :]
        vh = v[h * W:(h + 1) * W, :]
        s = lax.dot_general(qh, kh, (((0,), (0,)), ((), ())),
                            preferred_element_type=jnp.float32) * scale   # (C, C)
        s = s - jnp.max(s, axis=-1, keepdims=True)
        e = jnp.exp(s)
        p = e * pl.reciprocal(jnp.sum(e, axis=-1, keepdims=True), approx=False)
        # TODO(synk): nn.Dropout(p=0.0) is an identity in this module; not applied.
        ctx_h = lax.dot_general(p, vh, (((1,), (1,)), ((), ())),
                                preferred_element_type=jnp.float32)       # (C, W)
        o_ref[:, h * W:(h + 1) * W] = ctx_h


# ----------------------------- wrapper ---------------------------------------

def _prep_depth_conv_params(params):
    """PyTorch-layout Depth_conv params -> kernel layouts."""
    w_dw, b_dw, w_pw, b_pw = params
    c_in = w_dw.shape[0]
    c_out = w_pw.shape[0]
    wd = jnp.transpose(w_dw[:, 0], (1, 2, 0))            # (3, 3, C_in)
    bd = b_dw.reshape(1, c_in)
    wp = jnp.transpose(w_pw[:, :, 0, 0], (1, 0))         # (C_in, C_out)
    bp = b_pw.reshape(1, c_out)
    return wd, bd, wp, bp


def cross_attention_forward(hidden_states, ctx, params, *, num_heads):
    """cross_attention.forward.  hidden_states, ctx: (B, C, H, W) -> (B, C, H, W)."""
    B, C, H, W = hidden_states.shape
    if C % num_heads != 0:
        raise ValueError("dim must be divisible by num_heads")
    head_size = C // num_heads
    scale = 1.0 / math.sqrt(head_size)

    def to_padded_nhwc(x):
        x = jnp.transpose(x, (0, 2, 3, 1))                    # NHWC
        return jnp.pad(x, ((0, 0), (1, 1), (1, 1), (0, 0)))   # zero pad = 1

    xh = to_padded_nhwc(hidden_states)
    xc = to_padded_nhwc(ctx)

    wq = _prep_depth_conv_params(params["query"])
    wk = _prep_depth_conv_params(params["key"])
    wv = _prep_depth_conv_params(params["value"])

    x_spec = pl.BlockSpec((None, H + 2, W + 2, C), lambda b: (b, 0, 0, 0))
    proj_specs = [
        pl.BlockSpec((3, 3, C), lambda b: (0, 0, 0)),   # depthwise weight
        pl.BlockSpec((1, C), lambda b: (0, 0)),         # depthwise bias
        pl.BlockSpec((C, C), lambda b: (0, 0)),         # pointwise weight
        pl.BlockSpec((1, C), lambda b: (0, 0)),         # pointwise bias
    ]

    out = pl.pallas_call(
        functools.partial(fused_cross_attention_kernel, scale=scale),
        out_shape=jax.ShapeDtypeStruct((B, C, H * W), jnp.float32),
        grid=(B,),
        in_specs=[x_spec, x_spec] + proj_specs * 3,
        out_specs=pl.BlockSpec((None, C, H * W), lambda b: (b, 0, 0)),
        compiler_params=pltpu.CompilerParams(
            dimension_semantics=("parallel",)),
    )(xh, xc, *wq, *wk, *wv)

    # (B, C, H*W) already equals the final permute(0, 2, 1, 3) result in NCHW.
    return out.reshape(B, C, H, W)


# ----------------------------- parameters ------------------------------------

def init_depth_conv_params(key, in_ch, out_ch):
    k1, k2, k3, k4 = jax.random.split(key, 4)
    w_dw = jax.random.normal(k1, (in_ch, 1, 3, 3), jnp.float32) * 0.1
    b_dw = jax.random.normal(k2, (in_ch,), jnp.float32) * 0.1
    w_pw = jax.random.normal(k3, (out_ch, in_ch, 1, 1), jnp.float32) * 0.1
    b_pw = jax.random.normal(k4, (out_ch,), jnp.float32) * 0.1
    return (w_dw, b_dw, w_pw, b_pw)


# ----------------------------- pure-JAX reference ----------------------------

def depth_conv_ref(x, params):
    w_dw, b_dw, w_pw, b_pw = params
    B, C, H, W = x.shape
    xp = jnp.pad(x, ((0, 0), (0, 0), (1, 1), (1, 1)))
    acc = jnp.zeros_like(x)
    for dy in range(3):
        for dx in range(3):
            tap = w_dw[:, 0, dy, dx][None, :, None, None]
            acc = acc + tap * xp[:, :, dy:dy + H, dx:dx + W]
    acc = acc + b_dw[None, :, None, None]
    out = jnp.einsum("bchw,oc->bohw", acc, w_pw[:, :, 0, 0],
                     precision=lax.Precision.HIGHEST)
    return out + b_pw[None, :, None, None]


def cross_attention_ref(hidden_states, ctx, params, num_heads):
    C = hidden_states.shape[1]
    head_size = C // num_heads
    q = depth_conv_ref(hidden_states, params["query"])
    k = depth_conv_ref(ctx, params["key"])
    v = depth_conv_ref(ctx, params["value"])
    qt = jnp.transpose(q, (0, 2, 1, 3))
    kt = jnp.transpose(k, (0, 2, 1, 3))
    vt = jnp.transpose(v, (0, 2, 1, 3))
    s = jnp.einsum("bhcw,bhkw->bhck", qt, kt,
                   precision=lax.Precision.HIGHEST) / math.sqrt(head_size)
    p = jax.nn.softmax(s, axis=-1)
    o = jnp.einsum("bhck,bhkw->bhcw", p, vt, precision=lax.Precision.HIGHEST)
    return jnp.transpose(o, (0, 2, 1, 3))


# ----------------------------- main -------------------------------------------

if __name__ == "__main__":
    DIM = 32          # module-level `dim` in the reference script
    NUM_HEADS = 4     # only affects the softmax scale (head split is disabled
                      # in the reference transpose_for_scores)
    B, H, W = 2, 8, 16   # H*W = 128 -> lane-dense (C, H*W) output blocks

    root = jax.random.PRNGKey(0)
    kx, kc, kq, kk, kv = jax.random.split(root, 5)
    hidden_states = jax.random.normal(kx, (B, DIM, H, W), jnp.float32)
    ctx = jax.random.normal(kc, (B, DIM, H, W), jnp.float32)
    params = {
        "query": init_depth_conv_params(kq, DIM, DIM),
        "key": init_depth_conv_params(kk, DIM, DIM),
        "value": init_depth_conv_params(kv, DIM, DIM),
    }

    fwd = jax.jit(functools.partial(cross_attention_forward, num_heads=NUM_HEADS))
    out = jax.block_until_ready(fwd(hidden_states, ctx, params))

    ref = jax.block_until_ready(
        cross_attention_ref(hidden_states, ctx, params, NUM_HEADS))

    assert out.shape == (B, DIM, H, W), out.shape
    # Kernel matmuls run at default (bf16-input, f32-accumulate) MXU precision
    # per the perf review; compare against the HIGHEST-precision reference with
    # a correspondingly relaxed tolerance.
    np.testing.assert_allclose(np.asarray(out), np.asarray(ref),
                               atol=1e-2, rtol=1e-2)
    print("KERNEL_OK")
</pallas_src>

<mosaic_0001>
module attributes {stable_mosaic.version = 11 : i64} {
  func.func @fused_cross_attention_kernel(%arg0: i32, %arg1: memref<1x10x18x32xf32, #tpu.memory_space<vmem>>, %arg2: memref<1x10x18x32xf32, #tpu.memory_space<vmem>>, %arg3: memref<3x3x32xf32, #tpu.memory_space<vmem>>, %arg4: memref<1x32xf32, #tpu.memory_space<vmem>>, %arg5: memref<32x32xf32, #tpu.memory_space<vmem>>, %arg6: memref<1x32xf32, #tpu.memory_space<vmem>>, %arg7: memref<3x3x32xf32, #tpu.memory_space<vmem>>, %arg8: memref<1x32xf32, #tpu.memory_space<vmem>>, %arg9: memref<32x32xf32, #tpu.memory_space<vmem>>, %arg10: memref<1x32xf32, #tpu.memory_space<vmem>>, %arg11: memref<3x3x32xf32, #tpu.memory_space<vmem>>, %arg12: memref<1x32xf32, #tpu.memory_space<vmem>>, %arg13: memref<32x32xf32, #tpu.memory_space<vmem>>, %arg14: memref<1x32xf32, #tpu.memory_space<vmem>>, %arg15: memref<1x32x128xf32, #tpu.memory_space<vmem>>) attributes {dimension_semantics = [#tpu.dimension_semantics<parallel>], iteration_bounds = array<i64: 2>, scalar_prefetch = 0 : i64, scratch_operands = 0 : i64, tpu.core_type = #tpu.core_type<tc>, window_params = [{transform_indices = @transform_0, window_bounds = array<i64: 1, 10, 18, 32>}, {transform_indices = @transform_1, window_bounds = array<i64: 1, 10, 18, 32>}, {pipeline_mode = #tpu.pipeline_mode<synchronous>, transform_indices = @transform_2, window_bounds = array<i64: 3, 3, 32>}, {pipeline_mode = #tpu.pipeline_mode<synchronous>, transform_indices = @transform_3, window_bounds = array<i64: 1, 32>}, {pipeline_mode = #tpu.pipeline_mode<synchronous>, transform_indices = @transform_4, window_bounds = array<i64: 32, 32>}, {pipeline_mode = #tpu.pipeline_mode<synchronous>, transform_indices = @transform_5, window_bounds = array<i64: 1, 32>}, {pipeline_mode = #tpu.pipeline_mode<synchronous>, transform_indices = @transform_6, window_bounds = array<i64: 3, 3, 32>}, {pipeline_mode = #tpu.pipeline_mode<synchronous>, transform_indices = @transform_7, window_bounds = array<i64: 1, 32>}, {pipeline_mode = #tpu.pipeline_mode<synchronous>, transform_indices = @transform_8, window_bounds = array<i64: 32, 32>}, {pipeline_mode = #tpu.pipeline_mode<synchronous>, transform_indices = @transform_9, window_bounds = array<i64: 1, 32>}, {pipeline_mode = #tpu.pipeline_mode<synchronous>, transform_indices = @transform_10, window_bounds = array<i64: 3, 3, 32>}, {pipeline_mode = #tpu.pipeline_mode<synchronous>, transform_indices = @transform_11, window_bounds = array<i64: 1, 32>}, {pipeline_mode = #tpu.pipeline_mode<synchronous>, transform_indices = @transform_12, window_bounds = array<i64: 32, 32>}, {pipeline_mode = #tpu.pipeline_mode<synchronous>, transform_indices = @transform_13, window_bounds = array<i64: 1, 32>}, {transform_indices = @transform_14, window_bounds = array<i64: 1, 32, 128>}]} {
    %cst = arith.constant 0.000000e+00 : f32
    %0 = vector.broadcast %cst : f32 to vector<8x16x32xf32>
    %c0 = arith.constant 0 : index
    %c0_0 = arith.constant 0 : index
    %c0_1 = arith.constant 0 : index
    %1 = vector.load %arg3[%c0, %c0_0, %c0_1] : memref<3x3x32xf32, #tpu.memory_space<vmem>>, vector<1x1x32xf32>
    %2 = vector.shape_cast %1 : vector<1x1x32xf32> to vector<1x32xf32>
    %c0_2 = arith.constant 0 : index
    %c0_3 = arith.constant 0 : index
    %c0_4 = arith.constant 0 : index
    %c0_5 = arith.constant 0 : index
    %3 = vector.load %arg1[%c0_2, %c0_3, %c0_4, %c0_5] : memref<1x10x18x32xf32, #tpu.memory_space<vmem>>, vector<1x8x16x32xf32>
    %4 = vector.shape_cast %3 : vector<1x8x16x32xf32> to vector<8x16x32xf32>
    %5 = vector.shape_cast %2 : vector<1x32xf32> to vector<1x1x32xf32>
    %6 = vector.broadcast %5 : vector<1x1x32xf32> to vector<8x16x32xf32>
    %7 = arith.mulf %6, %4 : vector<8x16x32xf32>
    %8 = arith.addf %0, %7 : vector<8x16x32xf32>
    %c0_6 = arith.constant 0 : index
    %c1 = arith.constant 1 : index
    %c0_7 = arith.constant 0 : index
    %9 = vector.load %arg3[%c0_6, %c1, %c0_7] : memref<3x3x32xf32, #tpu.memory_space<vmem>>, vector<1x1x32xf32>
    %10 = vector.shape_cast %9 : vector<1x1x32xf32> to vector<1x32xf32>
    %c0_8 = arith.constant 0 : index
    %c0_9 = arith.constant 0 : index
    %c1_10 = arith.constant 1 : index
    %c0_11 = arith.constant 0 : index
    %11 = vector.load %arg1[%c0_8, %c0_9, %c1_10, %c0_11] : memref<1x10x18x32xf32, #tpu.memory_space<vmem>>, vector<1x8x16x32xf32>
    %12 = vector.shape_cast %11 : vector<1x8x16x32xf32> to vector<8x16x32xf32>
    %13 = vector.shape_cast %10 : vector<1x32xf32> to vector<1x1x32xf32>
    %14 = vector.broadcast %13 : vector<1x1x32xf32> to vector<8x16x32xf32>
    %15 = arith.mulf %14, %12 : vector<8x16x32xf32>
    %16 = arith.addf %8, %15 : vector<8x16x32xf32>
    %c0_12 = arith.constant 0 : index
    %c2 = arith.constant 2 : index
    %c0_13 = arith.constant 0 : index
    %17 = vector.load %arg3[%c0_12, %c2, %c0_13] : memref<3x3x32xf32, #tpu.memory_space<vmem>>, vector<1x1x32xf32>
    %18 = vector.shape_cast %17 : vector<1x1x32xf32> to vector<1x32xf32>
    %c0_14 = arith.constant 0 : index
    %c0_15 = arith.constant 0 : index
    %c2_16 = arith.constant 2 : index
    %c0_17 = arith.constant 0 : index
    %19 = vector.load %arg1[%c0_14, %c0_15, %c2_16, %c0_17] : memref<1x10x18x32xf32, #tpu.memory_space<vmem>>, vector<1x8x16x32xf32>
    %20 = vector.shape_cast %19 : vector<1x8x16x32xf32> to vector<8x16x32xf32>
    %21 = vector.shape_cast %18 : vector<1x32xf32> to vector<1x1x32xf32>
    %22 = vector.broadcast %21 : vector<1x1x32xf32> to vector<8x16x32xf32>
    %23 = arith.mulf %22, %20 : vector<8x16x32xf32>
    %24 = arith.addf %16, %23 : vector<8x16x32xf32>
    %c1_18 = arith.constant 1 : index
    %c0_19 = arith.constant 0 : index
    %c0_20 = arith.constant 0 : index
    %25 = vector.load %arg3[%c1_18, %c0_19, %c0_20] : memref<3x3x32xf32, #tpu.memory_space<vmem>>, vector<1x1x32xf32>
    %26 = vector.shape_cast %25 : vector<1x1x32xf32> to vector<1x32xf32>
    %c0_21 = arith.constant 0 : index
    %c1_22 = arith.constant 1 : index
    %c0_23 = arith.constant 0 : index
    %c0_24 = arith.constant 0 : index
    %27 = vector.load %arg1[%c0_21, %c1_22, %c0_23, %c0_24] : memref<1x10x18x32xf32, #tpu.memory_space<vmem>>, vector<1x8x16x32xf32>
    %28 = vector.shape_cast %27 : vector<1x8x16x32xf32> to vector<8x16x32xf32>
    %29 = vector.shape_cast %26 : vector<1x32xf32> to vector<1x1x32xf32>
    %30 = vector.broadcast %29 : vector<1x1x32xf32> to vector<8x16x32xf32>
    %31 = arith.mulf %30, %28 : vector<8x16x32xf32>
    %32 = arith.addf %24, %31 : vector<8x16x32xf32>
    %c1_25 = arith.constant 1 : index
    %c1_26 = arith.constant 1 : index
    %c0_27 = arith.constant 0 : index
    %33 = vector.load %arg3[%c1_25, %c1_26, %c0_27] : memref<3x3x32xf32, #tpu.memory_space<vmem>>, vector<1x1x32xf32>
    %34 = vector.shape_cast %33 : vector<1x1x32xf32> to vector<1x32xf32>
    %c0_28 = arith.constant 0 : index
    %c1_29 = arith.constant 1 : index
    %c1_30 = arith.constant 1 : index
    %c0_31 = arith.constant 0 : index
    %35 = vector.load %arg1[%c0_28, %c1_29, %c1_30, %c0_31] : memref<1x10x18x32xf32, #tpu.memory_space<vmem>>, vector<1x8x16x32xf32>
    %36 = vector.shape_cast %35 : vector<1x8x16x32xf32> to vector<8x16x32xf32>
    %37 = vector.shape_cast %34 : vector<1x32xf32> to vector<1x1x32xf32>
    %38 = vector.broadcast %37 : vector<1x1x32xf32> to vector<8x16x32xf32>
    %39 = arith.mulf %38, %36 : vector<8x16x32xf32>
    %40 = arith.addf %32, %39 : vector<8x16x32xf32>
    %c1_32 = arith.constant 1 : index
    %c2_33 = arith.constant 2 : index
    %c0_34 = arith.constant 0 : index
    %41 = vector.load %arg3[%c1_32, %c2_33, %c0_34] : memref<3x3x32xf32, #tpu.memory_space<vmem>>, vector<1x1x32xf32>
    %42 = vector.shape_cast %41 : vector<1x1x32xf32> to vector<1x32xf32>
    %c0_35 = arith.constant 0 : index
    %c1_36 = arith.constant 1 : index
    %c2_37 = arith.constant 2 : index
    %c0_38 = arith.constant 0 : index
    %43 = vector.load %arg1[%c0_35, %c1_36, %c2_37, %c0_38] : memref<1x10x18x32xf32, #tpu.memory_space<vmem>>, vector<1x8x16x32xf32>
    %44 = vector.shape_cast %43 : vector<1x8x16x32xf32> to vector<8x16x32xf32>
    %45 = vector.shape_cast %42 : vector<1x32xf32> to vector<1x1x32xf32>
    %46 = vector.broadcast %45 : vector<1x1x32xf32> to vector<8x16x32xf32>
    %47 = arith.mulf %46, %44 : vector<8x16x32xf32>
    %48 = arith.addf %40, %47 : vector<8x16x32xf32>
    %c2_39 = arith.constant 2 : index
    %c0_40 = arith.constant 0 : index
    %c0_41 = arith.constant 0 : index
    %49 = vector.load %arg3[%c2_39, %c0_40, %c0_41] : memref<3x3x32xf32, #tpu.memory_space<vmem>>, vector<1x1x32xf32>
    %50 = vector.shape_cast %49 : vector<1x1x32xf32> to vector<1x32xf32>
    %c0_42 = arith.constant 0 : index
    %c2_43 = arith.constant 2 : index
    %c0_44 = arith.constant 0 : index
    %c0_45 = arith.constant 0 : index
    %51 = vector.load %arg1[%c0_42, %c2_43, %c0_44, %c0_45] : memref<1x10x18x32xf32, #tpu.memory_space<vmem>>, vector<1x8x16x32xf32>
    %52 = vector.shape_cast %51 : vector<1x8x16x32xf32> to vector<8x16x32xf32>
    %53 = vector.shape_cast %50 : vector<1x32xf32> to vector<1x1x32xf32>
    %54 = vector.broadcast %53 : vector<1x1x32xf32> to vector<8x16x32xf32>
    %55 = arith.mulf %54, %52 : vector<8x16x32xf32>
    %56 = arith.addf %48, %55 : vector<8x16x32xf32>
    %c2_46 = arith.constant 2 : index
    %c1_47 = arith.constant 1 : index
    %c0_48 = arith.constant 0 : index
    %57 = vector.load %arg3[%c2_46, %c1_47, %c0_48] : memref<3x3x32xf32, #tpu.memory_space<vmem>>, vector<1x1x32xf32>
    %58 = vector.shape_cast %57 : vector<1x1x32xf32> to vector<1x32xf32>
    %c0_49 = arith.constant 0 : index
    %c2_50 = arith.constant 2 : index
    %c1_51 = arith.constant 1 : index
    %c0_52 = arith.constant 0 : index
    %59 = vector.load %arg1[%c0_49, %c2_50, %c1_51, %c0_52] : memref<1x10x18x32xf32, #tpu.memory_space<vmem>>, vector<1x8x16x32xf32>
    %60 = vector.shape_cast %59 : vector<1x8x16x32xf32> to vector<8x16x32xf32>
    %61 = vector.shape_cast %58 : vector<1x32xf32> to vector<1x1x32xf32>
    %62 = vector.broadcast %61 : vector<1x1x32xf32> to vector<8x16x32xf32>
    %63 = arith.mulf %62, %60 : vector<8x16x32xf32>
    %64 = arith.addf %56, %63 : vector<8x16x32xf32>
    %c2_53 = arith.constant 2 : index
    %c2_54 = arith.constant 2 : index
    %c0_55 = arith.constant 0 : index
    %65 = vector.load %arg3[%c2_53, %c2_54, %c0_55] : memref<3x3x32xf32, #tpu.memory_space<vmem>>, vector<1x1x32xf32>
    %66 = vector.shape_cast %65 : vector<1x1x32xf32> to vector<1x32xf32>
    %c0_56 = arith.constant 0 : index
    %c2_57 = arith.constant 2 : index
    %c2_58 = arith.constant 2 : index
    %c0_59 = arith.constant 0 : index
    %67 = vector.load %arg1[%c0_56, %c2_57, %c2_58, %c0_59] : memref<1x10x18x32xf32, #tpu.memory_space<vmem>>, vector<1x8x16x32xf32>
    %68 = vector.shape_cast %67 : vector<1x8x16x32xf32> to vector<8x16x32xf32>
    %69 = vector.shape_cast %66 : vector<1x32xf32> to vector<1x1x32xf32>
    %70 = vector.broadcast %69 : vector<1x1x32xf32> to vector<8x16x32xf32>
    %71 = arith.mulf %70, %68 : vector<8x16x32xf32>
    %72 = arith.addf %64, %71 : vector<8x16x32xf32>
    %73 = vector.shape_cast %72 : vector<8x16x32xf32> to vector<128x32xf32>
    %c0_60 = arith.constant 0 : index
    %c0_61 = arith.constant 0 : index
    %74 = vector.load %arg4[%c0_60, %c0_61] : memref<1x32xf32, #tpu.memory_space<vmem>>, vector<1x32xf32>
    %75 = vector.broadcast %74 : vector<1x32xf32> to vector<128x32xf32>
    %76 = arith.addf %73, %75 : vector<128x32xf32>
    %c0_62 = arith.constant 0 : index
    %c0_63 = arith.constant 0 : index
    %77 = vector.load %arg5[%c0_62, %c0_63] : memref<32x32xf32, #tpu.memory_space<vmem>>, vector<32x32xf32>
    %cst_64 = arith.constant dense<0.000000e+00> : vector<128x32xf32>
    %78 = tpu.matmul %76, %77, %cst_64 {dimension_numbers = #tpu.dot_dimension_numbers<[1], [0], [0], [1], [0, 0, 1, 1], [], []>} : vector<128x32xf32>, vector<32x32xf32>, vector<128x32xf32> -> vector<128x32xf32>
    %c0_65 = arith.constant 0 : index
    %c0_66 = arith.constant 0 : index
    %79 = vector.load %arg6[%c0_65, %c0_66] : memref<1x32xf32, #tpu.memory_space<vmem>>, vector<1x32xf32>
    %80 = vector.broadcast %79 : vector<1x32xf32> to vector<128x32xf32>
    %81 = arith.addf %78, %80 : vector<128x32xf32>
    %cst_67 = arith.constant 0.000000e+00 : f32
    %82 = vector.broadcast %cst_67 : f32 to vector<8x16x32xf32>
    %c0_68 = arith.constant 0 : index
    %c0_69 = arith.constant 0 : index
    %c0_70 = arith.constant 0 : index
    %83 = vector.load %arg7[%c0_68, %c0_69, %c0_70] : memref<3x3x32xf32, #tpu.memory_space<vmem>>, vector<1x1x32xf32>
    %84 = vector.shape_cast %83 : vector<1x1x32xf32> to vector<1x32xf32>
    %c0_71 = arith.constant 0 : index
    %c0_72 = arith.constant 0 : index
    %c0_73 = arith.constant 0 : index
    %c0_74 = arith.constant 0 : index
    %85 = vector.load %arg2[%c0_71, %c0_72, %c0_73, %c0_74] : memref<1x10x18x32xf32, #tpu.memory_space<vmem>>, vector<1x8x16x32xf32>
    %86 = vector.shape_cast %85 : vector<1x8x16x32xf32> to vector<8x16x32xf32>
    %87 = vector.shape_cast %84 : vector<1x32xf32> to vector<1x1x32xf32>
    %88 = vector.broadcast %87 : vector<1x1x32xf32> to vector<8x16x32xf32>
    %89 = arith.mulf %88, %86 : vector<8x16x32xf32>
    %90 = arith.addf %82, %89 : vector<8x16x32xf32>
    %c0_75 = arith.constant 0 : index
    %c1_76 = arith.constant 1 : index
    %c0_77 = arith.constant 0 : index
    %91 = vector.load %arg7[%c0_75, %c1_76, %c0_77] : memref<3x3x32xf32, #tpu.memory_space<vmem>>, vector<1x1x32xf32>
    %92 = vector.shape_cast %91 : vector<1x1x32xf32> to vector<1x32xf32>
    %c0_78 = arith.constant 0 : index
    %c0_79 = arith.constant 0 : index
    %c1_80 = arith.constant 1 : index
    %c0_81 = arith.constant 0 : index
    %93 = vector.load %arg2[%c0_78, %c0_79, %c1_80, %c0_81] : memref<1x10x18x32xf32, #tpu.memory_space<vmem>>, vector<1x8x16x32xf32>
    %94 = vector.shape_cast %93 : vector<1x8x16x32xf32> to vector<8x16x32xf32>
    %95 = vector.shape_cast %92 : vector<1x32xf32> to vector<1x1x32xf32>
    %96 = vector.broadcast %95 : vector<1x1x32xf32> to vector<8x16x32xf32>
    %97 = arith.mulf %96, %94 : vector<8x16x32xf32>
    %98 = arith.addf %90, %97 : vector<8x16x32xf32>
    %c0_82 = arith.constant 0 : index
    %c2_83 = arith.constant 2 : index
    %c0_84 = arith.constant 0 : index
    %99 = vector.load %arg7[%c0_82, %c2_83, %c0_84] : memref<3x3x32xf32, #tpu.memory_space<vmem>>, vector<1x1x32xf32>
    %100 = vector.shape_cast %99 : vector<1x1x32xf32> to vector<1x32xf32>
    %c0_85 = arith.constant 0 : index
    %c0_86 = arith.constant 0 : index
    %c2_87 = arith.constant 2 : index
    %c0_88 = arith.constant 0 : index
    %101 = vector.load %arg2[%c0_85, %c0_86, %c2_87, %c0_88] : memref<1x10x18x32xf32, #tpu.memory_space<vmem>>, vector<1x8x16x32xf32>
    %102 = vector.shape_cast %101 : vector<1x8x16x32xf32> to vector<8x16x32xf32>
    %103 = vector.shape_cast %100 : vector<1x32xf32> to vector<1x1x32xf32>
    %104 = vector.broadcast %103 : vector<1x1x32xf32> to vector<8x16x32xf32>
    %105 = arith.mulf %104, %102 : vector<8x16x32xf32>
    %106 = arith.addf %98, %105 : vector<8x16x32xf32>
    %c1_89 = arith.constant 1 : index
    %c0_90 = arith.constant 0 : index
    %c0_91 = arith.constant 0 : index
    %107 = vector.load %arg7[%c1_89, %c0_90, %c0_91] : memref<3x3x32xf32, #tpu.memory_space<vmem>>, vector<1x1x32xf32>
    %108 = vector.shape_cast %107 : vector<1x1x32xf32> to vector<1x32xf32>
    %c0_92 = arith.constant 0 : index
    %c1_93 = arith.constant 1 : index
    %c0_94 = arith.constant 0 : index
    %c0_95 = arith.constant 0 : index
    %109 = vector.load %arg2[%c0_92, %c1_93, %c0_94, %c0_95] : memref<1x10x18x32xf32, #tpu.memory_space<vmem>>, vector<1x8x16x32xf32>
    %110 = vector.shape_cast %109 : vector<1x8x16x32xf32> to vector<8x16x32xf32>
    %111 = vector.shape_cast %108 : vector<1x32xf32> to vector<1x1x32xf32>
    %112 = vector.broadcast %111 : vector<1x1x32xf32> to vector<8x16x32xf32>
    %113 = arith.mulf %112, %110 : vector<8x16x32xf32>
    %114 = arith.addf %106, %113 : vector<8x16x32xf32>
    %c1_96 = arith.constant 1 : index
    %c1_97 = arith.constant 1 : index
    %c0_98 = arith.constant 0 : index
    %115 = vector.load %arg7[%c1_96, %c1_97, %c0_98] : memref<3x3x32xf32, #tpu.memory_space<vmem>>, vector<1x1x32xf32>
    %116 = vector.shape_cast %115 : vector<1x1x32xf32> to vector<1x32xf32>
    %c0_99 = arith.constant 0 : index
    %c1_100 = arith.constant 1 : index
    %c1_101 = arith.constant 1 : index
    %c0_102 = arith.constant 0 : index
    %117 = vector.load %arg2[%c0_99, %c1_100, %c1_101, %c0_102] : memref<1x10x18x32xf32, #tpu.memory_space<vmem>>, vector<1x8x16x32xf32>
    %118 = vector.shape_cast %117 : vector<1x8x16x32xf32> to vector<8x16x32xf32>
    %119 = vector.shape_cast %116 : vector<1x32xf32> to vector<1x1x32xf32>
    %120 = vector.broadcast %119 : vector<1x1x32xf32> to vector<8x16x32xf32>
    %121 = arith.mulf %120, %118 : vector<8x16x32xf32>
    %122 = arith.addf %114, %121 : vector<8x16x32xf32>
    %c1_103 = arith.constant 1 : index
    %c2_104 = arith.constant 2 : index
    %c0_105 = arith.constant 0 : index
    %123 = vector.load %arg7[%c1_103, %c2_104, %c0_105] : memref<3x3x32xf32, #tpu.memory_space<vmem>>, vector<1x1x32xf32>
    %124 = vector.shape_cast %123 : vector<1x1x32xf32> to vector<1x32xf32>
    %c0_106 = arith.constant 0 : index
    %c1_107 = arith.constant 1 : index
    %c2_108 = arith.constant 2 : index
    %c0_109 = arith.constant 0 : index
    %125 = vector.load %arg2[%c0_106, %c1_107, %c2_108, %c0_109] : memref<1x10x18x32xf32, #tpu.memory_space<vmem>>, vector<1x8x16x32xf32>
    %126 = vector.shape_cast %125 : vector<1x8x16x32xf32> to vector<8x16x32xf32>
    %127 = vector.shape_cast %124 : vector<1x32xf32> to vector<1x1x32xf32>
    %128 = vector.broadcast %127 : vector<1x1x32xf32> to vector<8x16x32xf32>
    %129 = arith.mulf %128, %126 : vector<8x16x32xf32>
    %130 = arith.addf %122, %129 : vector<8x16x32xf32>
    %c2_110 = arith.constant 2 : index
    %c0_111 = arith.constant 0 : index
    %c0_112 = arith.constant 0 : index
    %131 = vector.load %arg7[%c2_110, %c0_111, %c0_112] : memref<3x3x32xf32, #tpu.memory_space<vmem>>, vector<1x1x32xf32>
    %132 = vector.shape_cast %131 : vector<1x1x32xf32> to vector<1x32xf32>
    %c0_113 = arith.constant 0 : index
    %c2_114 = arith.constant 2 : index
    %c0_115 = arith.constant 0 : index
    %c0_116 = arith.constant 0 : index
    %133 = vector.load %arg2[%c0_113, %c2_114, %c0_115, %c0_116] : memref<1x10x18x32xf32, #tpu.memory_space<vmem>>, vector<1x8x16x32xf32>
    %134 = vector.shape_cast %133 : vector<1x8x16x32xf32> to vector<8x16x32xf32>
    %135 = vector.shape_cast %132 : vector<1x32xf32> to vector<1x1x32xf32>
    %136 = vector.broadcast %135 : vector<1x1x32xf32> to vector<8x16x32xf32>
    %137 = arith.mulf %136, %134 : vector<8x16x32xf32>
    %138 = arith.addf %130, %137 : vector<8x16x32xf32>
    %c2_117 = arith.constant 2 : index
    %c1_118 = arith.constant 1 : index
    %c0_119 = arith.constant 0 : index
    %139 = vector.load %arg7[%c2_117, %c1_118, %c0_119] : memref<3x3x32xf32, #tpu.memory_space<vmem>>, vector<1x1x32xf32>
    %140 = vector.shape_cast %139 : vector<1x1x32xf32> to vector<1x32xf32>
    %c0_120 = arith.constant 0 : index
    %c2_121 = arith.constant 2 : index
    %c1_122 = arith.constant 1 : index
    %c0_123 = arith.constant 0 : index
    %141 = vector.load %arg2[%c0_120, %c2_121, %c1_122, %c0_123] : memref<1x10x18x32xf32, #tpu.memory_space<vmem>>, vector<1x8x16x32xf32>
    %142 = vector.shape_cast %141 : vector<1x8x16x32xf32> to vector<8x16x32xf32>
    %143 = vector.shape_cast %140 : vector<1x32xf32> to vector<1x1x32xf32>
    %144 = vector.broadcast %143 : vector<1x1x32xf32> to vector<8x16x32xf32>
    %145 = arith.mulf %144, %142 : vector<8x16x32xf32>
    %146 = arith.addf %138, %145 : vector<8x16x32xf32>
    %c2_124 = arith.constant 2 : index
    %c2_125 = arith.constant 2 : index
    %c0_126 = arith.constant 0 : index
    %147 = vector.load %arg7[%c2_124, %c2_125, %c0_126] : memref<3x3x32xf32, #tpu.memory_space<vmem>>, vector<1x1x32xf32>
    %148 = vector.shape_cast %147 : vector<1x1x32xf32> to vector<1x32xf32>
    %c0_127 = arith.constant 0 : index
    %c2_128 = arith.constant 2 : index
    %c2_129 = arith.constant 2 : index
    %c0_130 = arith.constant 0 : index
    %149 = vector.load %arg2[%c0_127, %c2_128, %c2_129, %c0_130] : memref<1x10x18x32xf32, #tpu.memory_space<vmem>>, vector<1x8x16x32xf32>
    %150 = vector.shape_cast %149 : vector<1x8x16x32xf32> to vector<8x16x32xf32>
    %151 = vector.shape_cast %148 : vector<1x32xf32> to vector<1x1x32xf32>
    %152 = vector.broadcast %151 : vector<1x1x32xf32> to vector<8x16x32xf32>
    %153 = arith.mulf %152, %150 : vector<8x16x32xf32>
    %154 = arith.addf %146, %153 : vector<8x16x32xf32>
    %155 = vector.shape_cast %154 : vector<8x16x32xf32> to vector<128x32xf32>
    %c0_131 = arith.constant 0 : index
    %c0_132 = arith.constant 0 : index
    %156 = vector.load %arg8[%c0_131, %c0_132] : memref<1x32xf32, #tpu.memory_space<vmem>>, vector<1x32xf32>
    %157 = vector.broadcast %156 : vector<1x32xf32> to vector<128x32xf32>
    %158 = arith.addf %155, %157 : vector<128x32xf32>
    %c0_133 = arith.constant 0 : index
    %c0_134 = arith.constant 0 : index
    %159 = vector.load %arg9[%c0_133, %c0_134] : memref<32x32xf32, #tpu.memory_space<vmem>>, vector<32x32xf32>
    %cst_135 = arith.constant dense<0.000000e+00> : vector<128x32xf32>
    %160 = tpu.matmul %158, %159, %cst_135 {dimension_numbers = #tpu.dot_dimension_numbers<[1], [0], [0], [1], [0, 0, 1, 1], [], []>} : vector<128x32xf32>, vector<32x32xf32>, vector<128x32xf32> -> vector<128x32xf32>
    %c0_136 = arith.constant 0 : index
    %c0_137 = arith.constant 0 : index
    %161 = vector.load %arg10[%c0_136, %c0_137] : memref<1x32xf32, #tpu.memory_space<vmem>>, vector<1x32xf32>
    %162 = vector.broadcast %161 : vector<1x32xf32> to vector<128x32xf32>
    %163 = arith.addf %160, %162 : vector<128x32xf32>
    %cst_138 = arith.constant 0.000000e+00 : f32
    %164 = vector.broadcast %cst_138 : f32 to vector<8x16x32xf32>
    %c0_139 = arith.constant 0 : index
    %c0_140 = arith.constant 0 : index
    %c0_141 = arith.constant 0 : index
    %165 = vector.load %arg11[%c0_139, %c0_140, %c0_141] : memref<3x3x32xf32, #tpu.memory_space<vmem>>, vector<1x1x32xf32>
    %166 = vector.shape_cast %165 : vector<1x1x32xf32> to vector<1x32xf32>
    %c0_142 = arith.constant 0 : index
    %c0_143 = arith.constant 0 : index
    %c0_144 = arith.constant 0 : index
    %c0_145 = arith.constant 0 : index
    %167 = vector.load %arg2[%c0_142, %c0_143, %c0_144, %c0_145] : memref<1x10x18x32xf32, #tpu.memory_space<vmem>>, vector<1x8x16x32xf32>
    %168 = vector.shape_cast %167 : vector<1x8x16x32xf32> to vector<8x16x32xf32>
    %169 = vector.shape_cast %166 : vector<1x32xf32> to vector<1x1x32xf32>
    %170 = vector.broadcast %169 : vector<1x1x32xf32> to vector<8x16x32xf32>
    %171 = arith.mulf %170, %168 : vector<8x16x32xf32>
    %172 = arith.addf %164, %171 : vector<8x16x32xf32>
    %c0_146 = arith.constant 0 : index
    %c1_147 = arith.constant 1 : index
    %c0_148 = arith.constant 0 : index
    %173 = vector.load %arg11[%c0_146, %c1_147, %c0_148] : memref<3x3x32xf32, #tpu.memory_space<vmem>>, vector<1x1x32xf32>
    %174 = vector.shape_cast %173 : vector<1x1x32xf32> to vector<1x32xf32>
    %c0_149 = arith.constant 0 : index
    %c0_150 = arith.constant 0 : index
    %c1_151 = arith.constant 1 : index
    %c0_152 = arith.constant 0 : index
    %175 = vector.load %arg2[%c0_149, %c0_150, %c1_151, %c0_152] : memref<1x10x18x32xf32, #tpu.memory_space<vmem>>, vector<1x8x16x32xf32>
    %176 = vector.shape_cast %175 : vector<1x8x16x32xf32> to vector<8x16x32xf32>
    %177 = vector.shape_cast %174 : vector<1x32xf32> to vector<1x1x32xf32>
    %178 = vector.broadcast %177 : vector<1x1x32xf32> to vector<8x16x32xf32>
    %179 = arith.mulf %178, %176 : vector<8x16x32xf32>
    %180 = arith.addf %172, %179 : vector<8x16x32xf32>
    %c0_153 = arith.constant 0 : index
    %c2_154 = arith.constant 2 : index
    %c0_155 = arith.constant 0 : index
    %181 = vector.load %arg11[%c0_153, %c2_154, %c0_155] : memref<3x3x32xf32, #tpu.memory_space<vmem>>, vector<1x1x32xf32>
    %182 = vector.shape_cast %181 : vector<1x1x32xf32> to vector<1x32xf32>
    %c0_156 = arith.constant 0 : index
    %c0_157 = arith.constant 0 : index
    %c2_158 = arith.constant 2 : index
    %c0_159 = arith.constant 0 : index
    %183 = vector.load %arg2[%c0_156, %c0_157, %c2_158, %c0_159] : memref<1x10x18x32xf32, #tpu.memory_space<vmem>>, vector<1x8x16x32xf32>
    %184 = vector.shape_cast %183 : vector<1x8x16x32xf32> to vector<8x16x32xf32>
    %185 = vector.shape_cast %182 : vector<1x32xf32> to vector<1x1x32xf32>
    %186 = vector.broadcast %185 : vector<1x1x32xf32> to vector<8x16x32xf32>
    %187 = arith.mulf %186, %184 : vector<8x16x32xf32>
    %188 = arith.addf %180, %187 : vector<8x16x32xf32>
    %c1_160 = arith.constant 1 : index
    %c0_161 = arith.constant 0 : index
    %c0_162 = arith.constant 0 : index
    %189 = vector.load %arg11[%c1_160, %c0_161, %c0_162] : memref<3x3x32xf32, #tpu.memory_space<vmem>>, vector<1x1x32xf32>
    %190 = vector.shape_cast %189 : vector<1x1x32xf32> to vector<1x32xf32>
    %c0_163 = arith.constant 0 : index
    %c1_164 = arith.constant 1 : index
    %c0_165 = arith.constant 0 : index
    %c0_166 = arith.constant 0 : index
    %191 = vector.load %arg2[%c0_163, %c1_164, %c0_165, %c0_166] : memref<1x10x18x32xf32, #tpu.memory_space<vmem>>, vector<1x8x16x32xf32>
    %192 = vector.shape_cast %191 : vector<1x8x16x32xf32> to vector<8x16x32xf32>
    %193 = vector.shape_cast %190 : vector<1x32xf32> to vector<1x1x32xf32>
    %194 = vector.broadcast %193 : vector<1x1x32xf32> to vector<8x16x32xf32>
    %195 = arith.mulf %194, %192 : vector<8x16x32xf32>
    %196 = arith.addf %188, %195 : vector<8x16x32xf32>
    %c1_167 = arith.constant 1 : index
    %c1_168 = arith.constant 1 : index
    %c0_169 = arith.constant 0 : index
    %197 = vector.load %arg11[%c1_167, %c1_168, %c0_169] : memref<3x3x32xf32, #tpu.memory_space<vmem>>, vector<1x1x32xf32>
    %198 = vector.shape_cast %197 : vector<1x1x32xf32> to vector<1x32xf32>
    %c0_170 = arith.constant 0 : index
    %c1_171 = arith.constant 1 : index
    %c1_172 = arith.constant 1 : index
    %c0_173 = arith.constant 0 : index
    %199 = vector.load %arg2[%c0_170, %c1_171, %c1_172, %c0_173] : memref<1x10x18x32xf32, #tpu.memory_space<vmem>>, vector<1x8x16x32xf32>
    %200 = vector.shape_cast %199 : vector<1x8x16x32xf32> to vector<8x16x32xf32>
    %201 = vector.shape_cast %198 : vector<1x32xf32> to vector<1x1x32xf32>
    %202 = vector.broadcast %201 : vector<1x1x32xf32> to vector<8x16x32xf32>
    %203 = arith.mulf %202, %200 : vector<8x16x32xf32>
    %204 = arith.addf %196, %203 : vector<8x16x32xf32>
    %c1_174 = arith.constant 1 : index
    %c2_175 = arith.constant 2 : index
    %c0_176 = arith.constant 0 : index
    %205 = vector.load %arg11[%c1_174, %c2_175, %c0_176] : memref<3x3x32xf32, #tpu.memory_space<vmem>>, vector<1x1x32xf32>
    %206 = vector.shape_cast %205 : vector<1x1x32xf32> to vector<1x32xf32>
    %c0_177 = arith.constant 0 : index
    %c1_178 = arith.constant 1 : index
    %c2_179 = arith.constant 2 : index
    %c0_180 = arith.constant 0 : index
    %207 = vector.load %arg2[%c0_177, %c1_178, %c2_179, %c0_180] : memref<1x10x18x32xf32, #tpu.memory_space<vmem>>, vector<1x8x16x32xf32>
    %208 = vector.shape_cast %207 : vector<1x8x16x32xf32> to vector<8x16x32xf32>
    %209 = vector.shape_cast %206 : vector<1x32xf32> to vector<1x1x32xf32>
    %210 = vector.broadcast %209 : vector<1x1x32xf32> to vector<8x16x32xf32>
    %211 = arith.mulf %210, %208 : vector<8x16x32xf32>
    %212 = arith.addf %204, %211 : vector<8x16x32xf32>
    %c2_181 = arith.constant 2 : index
    %c0_182 = arith.constant 0 : index
    %c0_183 = arith.constant 0 : index
    %213 = vector.load %arg11[%c2_181, %c0_182, %c0_183] : memref<3x3x32xf32, #tpu.memory_space<vmem>>, vector<1x1x32xf32>
    %214 = vector.shape_cast %213 : vector<1x1x32xf32> to vector<1x32xf32>
    %c0_184 = arith.constant 0 : index
    %c2_185 = arith.constant 2 : index
    %c0_186 = arith.constant 0 : index
    %c0_187 = arith.constant 0 : index
    %215 = vector.load %arg2[%c0_184, %c2_185, %c0_186, %c0_187] : memref<1x10x18x32xf32, #tpu.memory_space<vmem>>, vector<1x8x16x32xf32>
    %216 = vector.shape_cast %215 : vector<1x8x16x32xf32> to vector<8x16x32xf32>
    %217 = vector.shape_cast %214 : vector<1x32xf32> to vector<1x1x32xf32>
    %218 = vector.broadcast %217 : vector<1x1x32xf32> to vector<8x16x32xf32>
    %219 = arith.mulf %218, %216 : vector<8x16x32xf32>
    %220 = arith.addf %212, %219 : vector<8x16x32xf32>
    %c2_188 = arith.constant 2 : index
    %c1_189 = arith.constant 1 : index
    %c0_190 = arith.constant 0 : index
    %221 = vector.load %arg11[%c2_188, %c1_189, %c0_190] : memref<3x3x32xf32, #tpu.memory_space<vmem>>, vector<1x1x32xf32>
    %222 = vector.shape_cast %221 : vector<1x1x32xf32> to vector<1x32xf32>
    %c0_191 = arith.constant 0 : index
    %c2_192 = arith.constant 2 : index
    %c1_193 = arith.constant 1 : index
    %c0_194 = arith.constant 0 : index
    %223 = vector.load %arg2[%c0_191, %c2_192, %c1_193, %c0_194] : memref<1x10x18x32xf32, #tpu.memory_space<vmem>>, vector<1x8x16x32xf32>
    %224 = vector.shape_cast %223 : vector<1x8x16x32xf32> to vector<8x16x32xf32>
    %225 = vector.shape_cast %222 : vector<1x32xf32> to vector<1x1x32xf32>
    %226 = vector.broadcast %225 : vector<1x1x32xf32> to vector<8x16x32xf32>
    %227 = arith.mulf %226, %224 : vector<8x16x32xf32>
    %228 = arith.addf %220, %227 : vector<8x16x32xf32>
    %c2_195 = arith.constant 2 : index
    %c2_196 = arith.constant 2 : index
    %c0_197 = arith.constant 0 : index
    %229 = vector.load %arg11[%c2_195, %c2_196, %c0_197] : memref<3x3x32xf32, #tpu.memory_space<vmem>>, vector<1x1x32xf32>
    %230 = vector.shape_cast %229 : vector<1x1x32xf32> to vector<1x32xf32>
    %c0_198 = arith.constant 0 : index
    %c2_199 = arith.constant 2 : index
    %c2_200 = arith.constant 2 : index
    %c0_201 = arith.constant 0 : index
    %231 = vector.load %arg2[%c0_198, %c2_199, %c2_200, %c0_201] : memref<1x10x18x32xf32, #tpu.memory_space<vmem>>, vector<1x8x16x32xf32>
    %232 = vector.shape_cast %231 : vector<1x8x16x32xf32> to vector<8x16x32xf32>
    %233 = vector.shape_cast %230 : vector<1x32xf32> to vector<1x1x32xf32>
    %234 = vector.broadcast %233 : vector<1x1x32xf32> to vector<8x16x32xf32>
    %235 = arith.mulf %234, %232 : vector<8x16x32xf32>
    %236 = arith.addf %228, %235 : vector<8x16x32xf32>
    %237 = vector.shape_cast %236 : vector<8x16x32xf32> to vector<128x32xf32>
    %c0_202 = arith.constant 0 : index
    %c0_203 = arith.constant 0 : index
    %238 = vector.load %arg12[%c0_202, %c0_203] : memref<1x32xf32, #tpu.memory_space<vmem>>, vector<1x32xf32>
    %239 = vector.broadcast %238 : vector<1x32xf32> to vector<128x32xf32>
    %240 = arith.addf %237, %239 : vector<128x32xf32>
    %c0_204 = arith.constant 0 : index
    %c0_205 = arith.constant 0 : index
    %241 = vector.load %arg13[%c0_204, %c0_205] : memref<32x32xf32, #tpu.memory_space<vmem>>, vector<32x32xf32>
    %cst_206 = arith.constant dense<0.000000e+00> : vector<128x32xf32>
    %242 = tpu.matmul %240, %241, %cst_206 {dimension_numbers = #tpu.dot_dimension_numbers<[1], [0], [0], [1], [0, 0, 1, 1], [], []>} : vector<128x32xf32>, vector<32x32xf32>, vector<128x32xf32> -> vector<128x32xf32>
    %c0_207 = arith.constant 0 : index
    %c0_208 = arith.constant 0 : index
    %243 = vector.load %arg14[%c0_207, %c0_208] : memref<1x32xf32, #tpu.memory_space<vmem>>, vector<1x32xf32>
    %244 = vector.broadcast %243 : vector<1x32xf32> to vector<128x32xf32>
    %245 = arith.addf %242, %244 : vector<128x32xf32>
    %246 = vector.extract_strided_slice %81 {offsets = [0, 0], sizes = [16, 32], strides = [1, 1]} : vector<128x32xf32> to vector<16x32xf32>
    %247 = vector.extract_strided_slice %163 {offsets = [0, 0], sizes = [16, 32], strides = [1, 1]} : vector<128x32xf32> to vector<16x32xf32>
    %248 = vector.extract_strided_slice %245 {offsets = [0, 0], sizes = [16, 32], strides = [1, 1]} : vector<128x32xf32> to vector<16x32xf32>
    %cst_209 = arith.constant dense<0.000000e+00> : vector<32x32xf32>
    %249 = tpu.matmul %246, %247, %cst_209 {dimension_numbers = #tpu.dot_dimension_numbers<[0], [0], [1], [1], [0, 1, 1, 1], [], []>} : vector<16x32xf32>, vector<16x32xf32>, vector<32x32xf32> -> vector<32x32xf32>
    %cst_210 = arith.constant 0.353553385 : f32
    %250 = vector.broadcast %cst_210 : f32 to vector<32x32xf32>
    %251 = arith.mulf %249, %250 : vector<32x32xf32>
    %cst_211 = arith.constant dense<0xFF800000> : vector<32xf32>
    %252 = vector.multi_reduction <maximumf>, %251, %cst_211 [1] : vector<32x32xf32> to vector<32xf32>
    %253 = vector.shape_cast %252 : vector<32xf32> to vector<32x1xf32>
    %254 = vector.broadcast %253 : vector<32x1xf32> to vector<32x32xf32>
    %255 = arith.subf %251, %254 : vector<32x32xf32>
    %256 = math.exp %255 : vector<32x32xf32>
    %cst_212 = arith.constant dense<0.000000e+00> : vector<32xf32>
    %257 = vector.multi_reduction <add>, %256, %cst_212 [1] : vector<32x32xf32> to vector<32xf32>
    %258 = vector.shape_cast %257 : vector<32xf32> to vector<32x1xf32>
    %259 = tpu.reciprocal %258 : vector<32x1xf32> -> vector<32x1xf32>
    %260 = vector.broadcast %259 : vector<32x1xf32> to vector<32x32xf32>
    %261 = arith.mulf %256, %260 : vector<32x32xf32>
    %cst_213 = arith.constant dense<0.000000e+00> : vector<32x16xf32>
    %262 = tpu.matmul %261, %248, %cst_213 {dimension_numbers = #tpu.dot_dimension_numbers<[1], [1], [0], [0], [0, 0, 1, 0], [], []>} : vector<32x32xf32>, vector<16x32xf32>, vector<32x16xf32> -> vector<32x16xf32>
    %c0_214 = arith.constant 0 : index
    %c0_215 = arith.constant 0 : index
    %c0_216 = arith.constant 0 : index
    %263 = vector.load %arg15[%c0_214, %c0_215, %c0_216] : memref<1x32x128xf32, #tpu.memory_space<vmem>>, vector<1x32x16xf32>
    %264 = vector.shape_cast %263 : vector<1x32x16xf32> to vector<32x16xf32>
    %265 = vector.shape_cast %262 : vector<32x16xf32> to vector<1x32x16xf32>
    tpu.vector_store %arg15[%c0_214, %c0_215, %c0_216], %265 {strides = array<i32>} : memref<1x32x128xf32, #tpu.memory_space<vmem>>, vector<1x32x16xf32>,
    %266 = vector.extract_strided_slice %81 {offsets = [16, 0], sizes = [16, 32], strides = [1, 1]} : vector<128x32xf32> to vector<16x32xf32>
    %267 = vector.extract_strided_slice %163 {offsets = [16, 0], sizes = [16, 32], strides = [1, 1]} : vector<128x32xf32> to vector<16x32xf32>
    %268 = vector.extract_strided_slice %245 {offsets = [16, 0], sizes = [16, 32], strides = [1, 1]} : vector<128x32xf32> to vector<16x32xf32>
    %cst_217 = arith.constant dense<0.000000e+00> : vector<32x32xf32>
    %269 = tpu.matmul %266, %267, %cst_217 {dimension_numbers = #tpu.dot_dimension_numbers<[0], [0], [1], [1], [0, 1, 1, 1], [], []>} : vector<16x32xf32>, vector<16x32xf32>, vector<32x32xf32> -> vector<32x32xf32>
    %cst_218 = arith.constant 0.353553385 : f32
    %270 = vector.broadcast %cst_218 : f32 to vector<32x32xf32>
    %271 = arith.mulf %269, %270 : vector<32x32xf32>
    %cst_219 = arith.constant dense<0xFF800000> : vector<32xf32>
    %272 = vector.multi_reduction <maximumf>, %271, %cst_219 [1] : vector<32x32xf32> to vector<32xf32>
    %273 = vector.shape_cast %272 : vector<32xf32> to vector<32x1xf32>
    %274 = vector.broadcast %273 : vector<32x1xf32> to vector<32x32xf32>
    %275 = arith.subf %271, %274 : vector<32x32xf32>
    %276 = math.exp %275 : vector<32x32xf32>
    %cst_220 = arith.constant dense<0.000000e+00> : vector<32xf32>
    %277 = vector.multi_reduction <add>, %276, %cst_220 [1] : vector<32x32xf32> to vector<32xf32>
    %278 = vector.shape_cast %277 : vector<32xf32> to vector<32x1xf32>
    %279 = tpu.reciprocal %278 : vector<32x1xf32> -> vector<32x1xf32>
    %280 = vector.broadcast %279 : vector<32x1xf32> to vector<32x32xf32>
    %281 = arith.mulf %276, %280 : vector<32x32xf32>
    %cst_221 = arith.constant dense<0.000000e+00> : vector<32x16xf32>
    %282 = tpu.matmul %281, %268, %cst_221 {dimension_numbers = #tpu.dot_dimension_numbers<[1], [1], [0], [0], [0, 0, 1, 0], [], []>} : vector<32x32xf32>, vector<16x32xf32>, vector<32x16xf32> -> vector<32x16xf32>
    %c0_222 = arith.constant 0 : index
    %c0_223 = arith.constant 0 : index
    %c16 = arith.constant 16 : index
    %283 = vector.load %arg15[%c0_222, %c0_223, %c16] : memref<1x32x128xf32, #tpu.memory_space<vmem>>, vector<1x32x16xf32>
    %284 = vector.shape_cast %283 : vector<1x32x16xf32> to vector<32x16xf32>
    %285 = vector.shape_cast %282 : vector<32x16xf32> to vector<1x32x16xf32>
    tpu.vector_store %arg15[%c0_222, %c0_223, %c16], %285 {strides = array<i32>} : memref<1x32x128xf32, #tpu.memory_space<vmem>>, vector<1x32x16xf32>,
    %286 = vector.extract_strided_slice %81 {offsets = [32, 0], sizes = [16, 32], strides = [1, 1]} : vector<128x32xf32> to vector<16x32xf32>
    %287 = vector.extract_strided_slice %163 {offsets = [32, 0], sizes = [16, 32], strides = [1, 1]} : vector<128x32xf32> to vector<16x32xf32>
    %288 = vector.extract_strided_slice %245 {offsets = [32, 0], sizes = [16, 32], strides = [1, 1]} : vector<128x32xf32> to vector<16x32xf32>
    %cst_224 = arith.constant dense<0.000000e+00> : vector<32x32xf32>
    %289 = tpu.matmul %286, %287, %cst_224 {dimension_numbers = #tpu.dot_dimension_numbers<[0], [0], [1], [1], [0, 1, 1, 1], [], []>} : vector<16x32xf32>, vector<16x32xf32>, vector<32x32xf32> -> vector<32x32xf32>
    %cst_225 = arith.constant 0.353553385 : f32
    %290 = vector.broadcast %cst_225 : f32 to vector<32x32xf32>
    %291 = arith.mulf %289, %290 : vector<32x32xf32>
    %cst_226 = arith.constant dense<0xFF800000> : vector<32xf32>
    %292 = vector.multi_reduction <maximumf>, %291, %cst_226 [1] : vector<32x32xf32> to vector<32xf32>
    %293 = vector.shape_cast %292 : vector<32xf32> to vector<32x1xf32>
    %294 = vector.broadcast %293 : vector<32x1xf32> to vector<32x32xf32>
    %295 = arith.subf %291, %294 : vector<32x32xf32>
    %296 = math.exp %295 : vector<32x32xf32>
    %cst_227 = arith.constant dense<0.000000e+00> : vector<32xf32>
    %297 = vector.multi_reduction <add>, %296, %cst_227 [1] : vector<32x32xf32> to vector<32xf32>
    %298 = vector.shape_cast %297 : vector<32xf32> to vector<32x1xf32>
    %299 = tpu.reciprocal %298 : vector<32x1xf32> -> vector<32x1xf32>
    %300 = vector.broadcast %299 : vector<32x1xf32> to vector<32x32xf32>
    %301 = arith.mulf %296, %300 : vector<32x32xf32>
    %cst_228 = arith.constant dense<0.000000e+00> : vector<32x16xf32>
    %302 = tpu.matmul %301, %288, %cst_228 {dimension_numbers = #tpu.dot_dimension_numbers<[1], [1], [0], [0], [0, 0, 1, 0], [], []>} : vector<32x32xf32>, vector<16x32xf32>, vector<32x16xf32> -> vector<32x16xf32>
    %c0_229 = arith.constant 0 : index
    %c0_230 = arith.constant 0 : index
    %c32 = arith.constant 32 : index
    %303 = vector.load %arg15[%c0_229, %c0_230, %c32] : memref<1x32x128xf32, #tpu.memory_space<vmem>>, vector<1x32x16xf32>
    %304 = vector.shape_cast %303 : vector<1x32x16xf32> to vector<32x16xf32>
    %305 = vector.shape_cast %302 : vector<32x16xf32> to vector<1x32x16xf32>
    tpu.vector_store %arg15[%c0_229, %c0_230, %c32], %305 {strides = array<i32>} : memref<1x32x128xf32, #tpu.memory_space<vmem>>, vector<1x32x16xf32>,
    %306 = vector.extract_strided_slice %81 {offsets = [48, 0], sizes = [16, 32], strides = [1, 1]} : vector<128x32xf32> to vector<16x32xf32>
    %307 = vector.extract_strided_slice %163 {offsets = [48, 0], sizes = [16, 32], strides = [1, 1]} : vector<128x32xf32> to vector<16x32xf32>
    %308 = vector.extract_strided_slice %245 {offsets = [48, 0], sizes = [16, 32], strides = [1, 1]} : vector<128x32xf32> to vector<16x32xf32>
    %cst_231 = arith.constant dense<0.000000e+00> : vector<32x32xf32>
    %309 = tpu.matmul %306, %307, %cst_231 {dimension_numbers = #tpu.dot_dimension_numbers<[0], [0], [1], [1], [0, 1, 1, 1], [], []>} : vector<16x32xf32>, vector<16x32xf32>, vector<32x32xf32> -> vector<32x32xf32>
    %cst_232 = arith.constant 0.353553385 : f32
    %310 = vector.broadcast %cst_232 : f32 to vector<32x32xf32>
    %311 = arith.mulf %309, %310 : vector<32x32xf32>
    %cst_233 = arith.constant dense<0xFF800000> : vector<32xf32>
    %312 = vector.multi_reduction <maximumf>, %311, %cst_233 [1] : vector<32x32xf32> to vector<32xf32>
    %313 = vector.shape_cast %312 : vector<32xf32> to vector<32x1xf32>
    %314 = vector.broadcast %313 : vector<32x1xf32> to vector<32x32xf32>
    %315 = arith.subf %311, %314 : vector<32x32xf32>
    %316 = math.exp %315 : vector<32x32xf32>
    %cst_234 = arith.constant dense<0.000000e+00> : vector<32xf32>
    %317 = vector.multi_reduction <add>, %316, %cst_234 [1] : vector<32x32xf32> to vector<32xf32>
    %318 = vector.shape_cast %317 : vector<32xf32> to vector<32x1xf32>
    %319 = tpu.reciprocal %318 : vector<32x1xf32> -> vector<32x1xf32>
    %320 = vector.broadcast %319 : vector<32x1xf32> to vector<32x32xf32>
    %321 = arith.mulf %316, %320 : vector<32x32xf32>
    %cst_235 = arith.constant dense<0.000000e+00> : vector<32x16xf32>
    %322 = tpu.matmul %321, %308, %cst_235 {dimension_numbers = #tpu.dot_dimension_numbers<[1], [1], [0], [0], [0, 0, 1, 0], [], []>} : vector<32x32xf32>, vector<16x32xf32>, vector<32x16xf32> -> vector<32x16xf32>
    %c0_236 = arith.constant 0 : index
    %c0_237 = arith.constant 0 : index
    %c48 = arith.constant 48 : index
    %323 = vector.load %arg15[%c0_236, %c0_237, %c48] : memref<1x32x128xf32, #tpu.memory_space<vmem>>, vector<1x32x16xf32>
    %324 = vector.shape_cast %323 : vector<1x32x16xf32> to vector<32x16xf32>
    %325 = vector.shape_cast %322 : vector<32x16xf32> to vector<1x32x16xf32>
    tpu.vector_store %arg15[%c0_236, %c0_237, %c48], %325 {strides = array<i32>} : memref<1x32x128xf32, #tpu.memory_space<vmem>>, vector<1x32x16xf32>,
    %326 = vector.extract_strided_slice %81 {offsets = [64, 0], sizes = [16, 32], strides = [1, 1]} : vector<128x32xf32> to vector<16x32xf32>
    %327 = vector.extract_strided_slice %163 {offsets = [64, 0], sizes = [16, 32], strides = [1, 1]} : vector<128x32xf32> to vector<16x32xf32>
    %328 = vector.extract_strided_slice %245 {offsets = [64, 0], sizes = [16, 32], strides = [1, 1]} : vector<128x32xf32> to vector<16x32xf32>
    %cst_238 = arith.constant dense<0.000000e+00> : vector<32x32xf32>
    %329 = tpu.matmul %326, %327, %cst_238 {dimension_numbers = #tpu.dot_dimension_numbers<[0], [0], [1], [1], [0, 1, 1, 1], [], []>} : vector<16x32xf32>, vector<16x32xf32>, vector<32x32xf32> -> vector<32x32xf32>
    %cst_239 = arith.constant 0.353553385 : f32
    %330 = vector.broadcast %cst_239 : f32 to vector<32x32xf32>
    %331 = arith.mulf %329, %330 : vector<32x32xf32>
    %cst_240 = arith.constant dense<0xFF800000> : vector<32xf32>
    %332 = vector.multi_reduction <maximumf>, %331, %cst_240 [1] : vector<32x32xf32> to vector<32xf32>
    %333 = vector.shape_cast %332 : vector<32xf32> to vector<32x1xf32>
    %334 = vector.broadcast %333 : vector<32x1xf32> to vector<32x32xf32>
    %335 = arith.subf %331, %334 : vector<32x32xf32>
    %336 = math.exp %335 : vector<32x32xf32>
    %cst_241 = arith.constant dense<0.000000e+00> : vector<32xf32>
    %337 = vector.multi_reduction <add>, %336, %cst_241 [1] : vector<32x32xf32> to vector<32xf32>
    %338 = vector.shape_cast %337 : vector<32xf32> to vector<32x1xf32>
    %339 = tpu.reciprocal %338 : vector<32x1xf32> -> vector<32x1xf32>
    %340 = vector.broadcast %339 : vector<32x1xf32> to vector<32x32xf32>
    %341 = arith.mulf %336, %340 : vector<32x32xf32>
    %cst_242 = arith.constant dense<0.000000e+00> : vector<32x16xf32>
    %342 = tpu.matmul %341, %328, %cst_242 {dimension_numbers = #tpu.dot_dimension_numbers<[1], [1], [0], [0], [0, 0, 1, 0], [], []>} : vector<32x32xf32>, vector<16x32xf32>, vector<32x16xf32> -> vector<32x16xf32>
    %c0_243 = arith.constant 0 : index
    %c0_244 = arith.constant 0 : index
    %c64 = arith.constant 64 : index
    %343 = vector.load %arg15[%c0_243, %c0_244, %c64] : memref<1x32x128xf32, #tpu.memory_space<vmem>>, vector<1x32x16xf32>
    %344 = vector.shape_cast %343 : vector<1x32x16xf32> to vector<32x16xf32>
    %345 = vector.shape_cast %342 : vector<32x16xf32> to vector<1x32x16xf32>
    tpu.vector_store %arg15[%c0_243, %c0_244, %c64], %345 {strides = array<i32>} : memref<1x32x128xf32, #tpu.memory_space<vmem>>, vector<1x32x16xf32>,
    %346 = vector.extract_strided_slice %81 {offsets = [80, 0], sizes = [16, 32], strides = [1, 1]} : vector<128x32xf32> to vector<16x32xf32>
    %347 = vector.extract_strided_slice %163 {offsets = [80, 0], sizes = [16, 32], strides = [1, 1]} : vector<128x32xf32> to vector<16x32xf32>
    %348 = vector.extract_strided_slice %245 {offsets = [80, 0], sizes = [16, 32], strides = [1, 1]} : vector<128x32xf32> to vector<16x32xf32>
    %cst_245 = arith.constant dense<0.000000e+00> : vector<32x32xf32>
    %349 = tpu.matmul %346, %347, %cst_245 {dimension_numbers = #tpu.dot_dimension_numbers<[0], [0], [1], [1], [0, 1, 1, 1], [], []>} : vector<16x32xf32>, vector<16x32xf32>, vector<32x32xf32> -> vector<32x32xf32>
    %cst_246 = arith.constant 0.353553385 : f32
    %350 = vector.broadcast %cst_246 : f32 to vector<32x32xf32>
    %351 = arith.mulf %349, %350 : vector<32x32xf32>
    %cst_247 = arith.constant dense<0xFF800000> : vector<32xf32>
    %352 = vector.multi_reduction <maximumf>, %351, %cst_247 [1] : vector<32x32xf32> to vector<32xf32>
    %353 = vector.shape_cast %352 : vector<32xf32> to vector<32x1xf32>
    %354 = vector.broadcast %353 : vector<32x1xf32> to vector<32x32xf32>
    %355 = arith.subf %351, %354 : vector<32x32xf32>
    %356 = math.exp %355 : vector<32x32xf32>
    %cst_248 = arith.constant dense<0.000000e+00> : vector<32xf32>
    %357 = vector.multi_reduction <add>, %356, %cst_248 [1] : vector<32x32xf32> to vector<32xf32>
    %358 = vector.shape_cast %357 : vector<32xf32> to vector<32x1xf32>
    %359 = tpu.reciprocal %358 : vector<32x1xf32> -> vector<32x1xf32>
    %360 = vector.broadcast %359 : vector<32x1xf32> to vector<32x32xf32>
    %361 = arith.mulf %356, %360 : vector<32x32xf32>
    %cst_249 = arith.constant dense<0.000000e+00> : vector<32x16xf32>
    %362 = tpu.matmul %361, %348, %cst_249 {dimension_numbers = #tpu.dot_dimension_numbers<[1], [1], [0], [0], [0, 0, 1, 0], [], []>} : vector<32x32xf32>, vector<16x32xf32>, vector<32x16xf32> -> vector<32x16xf32>
    %c0_250 = arith.constant 0 : index
    %c0_251 = arith.constant 0 : index
    %c80 = arith.constant 80 : index
    %363 = vector.load %arg15[%c0_250, %c0_251, %c80] : memref<1x32x128xf32, #tpu.memory_space<vmem>>, vector<1x32x16xf32>
    %364 = vector.shape_cast %363 : vector<1x32x16xf32> to vector<32x16xf32>
    %365 = vector.shape_cast %362 : vector<32x16xf32> to vector<1x32x16xf32>
    tpu.vector_store %arg15[%c0_250, %c0_251, %c80], %365 {strides = array<i32>} : memref<1x32x128xf32, #tpu.memory_space<vmem>>, vector<1x32x16xf32>,
    %366 = vector.extract_strided_slice %81 {offsets = [96, 0], sizes = [16, 32], strides = [1, 1]} : vector<128x32xf32> to vector<16x32xf32>
    %367 = vector.extract_strided_slice %163 {offsets = [96, 0], sizes = [16, 32], strides = [1, 1]} : vector<128x32xf32> to vector<16x32xf32>
    %368 = vector.extract_strided_slice %245 {offsets = [96, 0], sizes = [16, 32], strides = [1, 1]} : vector<128x32xf32> to vector<16x32xf32>
    %cst_252 = arith.constant dense<0.000000e+00> : vector<32x32xf32>
    %369 = tpu.matmul %366, %367, %cst_252 {dimension_numbers = #tpu.dot_dimension_numbers<[0], [0], [1], [1], [0, 1, 1, 1], [], []>} : vector<16x32xf32>, vector<16x32xf32>, vector<32x32xf32> -> vector<32x32xf32>
    %cst_253 = arith.constant 0.353553385 : f32
    %370 = vector.broadcast %cst_253 : f32 to vector<32x32xf32>
    %371 = arith.mulf %369, %370 : vector<32x32xf32>
    %cst_254 = arith.constant dense<0xFF800000> : vector<32xf32>
    %372 = vector.multi_reduction <maximumf>, %371, %cst_254 [1] : vector<32x32xf32> to vector<32xf32>
    %373 = vector.shape_cast %372 : vector<32xf32> to vector<32x1xf32>
    %374 = vector.broadcast %373 : vector<32x1xf32> to vector<32x32xf32>
    %375 = arith.subf %371, %374 : vector<32x32xf32>
    %376 = math.exp %375 : vector<32x32xf32>
    %cst_255 = arith.constant dense<0.000000e+00> : vector<32xf32>
    %377 = vector.multi_reduction <add>, %376, %cst_255 [1] : vector<32x32xf32> to vector<32xf32>
    %378 = vector.shape_cast %377 : vector<32xf32> to vector<32x1xf32>
    %379 = tpu.reciprocal %378 : vector<32x1xf32> -> vector<32x1xf32>
    %380 = vector.broadcast %379 : vector<32x1xf32> to vector<32x32xf32>
    %381 = arith.mulf %376, %380 : vector<32x32xf32>
    %cst_256 = arith.constant dense<0.000000e+00> : vector<32x16xf32>
    %382 = tpu.matmul %381, %368, %cst_256 {dimension_numbers = #tpu.dot_dimension_numbers<[1], [1], [0], [0], [0, 0, 1, 0], [], []>} : vector<32x32xf32>, vector<16x32xf32>, vector<32x16xf32> -> vector<32x16xf32>
    %c0_257 = arith.constant 0 : index
    %c0_258 = arith.constant 0 : index
    %c96 = arith.constant 96 : index
    %383 = vector.load %arg15[%c0_257, %c0_258, %c96] : memref<1x32x128xf32, #tpu.memory_space<vmem>>, vector<1x32x16xf32>
    %384 = vector.shape_cast %383 : vector<1x32x16xf32> to vector<32x16xf32>
    %385 = vector.shape_cast %382 : vector<32x16xf32> to vector<1x32x16xf32>
    tpu.vector_store %arg15[%c0_257, %c0_258, %c96], %385 {strides = array<i32>} : memref<1x32x128xf32, #tpu.memory_space<vmem>>, vector<1x32x16xf32>,
    %386 = vector.extract_strided_slice %81 {offsets = [112, 0], sizes = [16, 32], strides = [1, 1]} : vector<128x32xf32> to vector<16x32xf32>
    %387 = vector.extract_strided_slice %163 {offsets = [112, 0], sizes = [16, 32], strides = [1, 1]} : vector<128x32xf32> to vector<16x32xf32>
    %388 = vector.extract_strided_slice %245 {offsets = [112, 0], sizes = [16, 32], strides = [1, 1]} : vector<128x32xf32> to vector<16x32xf32>
    %cst_259 = arith.constant dense<0.000000e+00> : vector<32x32xf32>
    %389 = tpu.matmul %386, %387, %cst_259 {dimension_numbers = #tpu.dot_dimension_numbers<[0], [0], [1], [1], [0, 1, 1, 1], [], []>} : vector<16x32xf32>, vector<16x32xf32>, vector<32x32xf32> -> vector<32x32xf32>
    %cst_260 = arith.constant 0.353553385 : f32
    %390 = vector.broadcast %cst_260 : f32 to vector<32x32xf32>
    %391 = arith.mulf %389, %390 : vector<32x32xf32>
    %cst_261 = arith.constant dense<0xFF800000> : vector<32xf32>
    %392 = vector.multi_reduction <maximumf>, %391, %cst_261 [1] : vector<32x32xf32> to vector<32xf32>
    %393 = vector.shape_cast %392 : vector<32xf32> to vector<32x1xf32>
    %394 = vector.broadcast %393 : vector<32x1xf32> to vector<32x32xf32>
    %395 = arith.subf %391, %394 : vector<32x32xf32>
    %396 = math.exp %395 : vector<32x32xf32>
    %cst_262 = arith.constant dense<0.000000e+00> : vector<32xf32>
    %397 = vector.multi_reduction <add>, %396, %cst_262 [1] : vector<32x32xf32> to vector<32xf32>
    %398 = vector.shape_cast %397 : vector<32xf32> to vector<32x1xf32>
    %399 = tpu.reciprocal %398 : vector<32x1xf32> -> vector<32x1xf32>
    %400 = vector.broadcast %399 : vector<32x1xf32> to vector<32x32xf32>
    %401 = arith.mulf %396, %400 : vector<32x32xf32>
    %cst_263 = arith.constant dense<0.000000e+00> : vector<32x16xf32>
    %402 = tpu.matmul %401, %388, %cst_263 {dimension_numbers = #tpu.dot_dimension_numbers<[1], [1], [0], [0], [0, 0, 1, 0], [], []>} : vector<32x32xf32>, vector<16x32xf32>, vector<32x16xf32> -> vector<32x16xf32>
    %c0_264 = arith.constant 0 : index
    %c0_265 = arith.constant 0 : index
    %c112 = arith.constant 112 : index
    %403 = vector.load %arg15[%c0_264, %c0_265, %c112] : memref<1x32x128xf32, #tpu.memory_space<vmem>>, vector<1x32x16xf32>
    %404 = vector.shape_cast %403 : vector<1x32x16xf32> to vector<32x16xf32>
    %405 = vector.shape_cast %402 : vector<32x16xf32> to vector<1x32x16xf32>
    tpu.vector_store %arg15[%c0_264, %c0_265, %c112], %405 {strides = array<i32>} : memref<1x32x128xf32, #tpu.memory_space<vmem>>, vector<1x32x16xf32>,
    return
  }
  func.func @transform_0(%arg0: i32) -> (i32, i32, i32, i32) {
    %c0_i32 = arith.constant 0 : i32
    %c0_i32_0 = arith.constant 0 : i32
    %c0_i32_1 = arith.constant 0 : i32
    %c0_i32_2 = arith.constant 0 : i32
    return %arg0, %c0_i32, %c0_i32_0, %c0_i32_1 : i32, i32, i32, i32
  }
  func.func @transform_1(%arg0: i32) -> (i32, i32, i32, i32) {
    %c0_i32 = arith.constant 0 : i32
    %c0_i32_0 = arith.constant 0 : i32
    %c0_i32_1 = arith.constant 0 : i32
    %c0_i32_2 = arith.constant 0 : i32
    return %arg0, %c0_i32, %c0_i32_0, %c0_i32_1 : i32, i32, i32, i32
  }
  func.func @transform_2(%arg0: i32) -> (i32, i32, i32) {
    %c0_i32 = arith.constant 0 : i32
    %c0_i32_0 = arith.constant 0 : i32
    %c0_i32_1 = arith.constant 0 : i32
    %c0_i32_2 = arith.constant 0 : i32
    return %c0_i32, %c0_i32_0, %c0_i32_1 : i32, i32, i32
  }
  func.func @transform_3(%arg0: i32) -> (i32, i32) {
    %c0_i32 = arith.constant 0 : i32
    %c0_i32_0 = arith.constant 0 : i32
    %c0_i32_1 = arith.constant 0 : i32
    return %c0_i32, %c0_i32_0 : i32, i32
  }
  func.func @transform_4(%arg0: i32) -> (i32, i32) {
    %c0_i32 = arith.constant 0 : i32
    %c0_i32_0 = arith.constant 0 : i32
    %c0_i32_1 = arith.constant 0 : i32
    return %c0_i32, %c0_i32_0 : i32, i32
  }
  func.func @transform_5(%arg0: i32) -> (i32, i32) {
    %c0_i32 = arith.constant 0 : i32
    %c0_i32_0 = arith.constant 0 : i32
    %c0_i32_1 = arith.constant 0 : i32
    return %c0_i32, %c0_i32_0 : i32, i32
  }
  func.func @transform_6(%arg0: i32) -> (i32, i32, i32) {
    %c0_i32 = arith.constant 0 : i32
    %c0_i32_0 = arith.constant 0 : i32
    %c0_i32_1 = arith.constant 0 : i32
    %c0_i32_2 = arith.constant 0 : i32
    return %c0_i32, %c0_i32_0, %c0_i32_1 : i32, i32, i32
  }
  func.func @transform_7(%arg0: i32) -> (i32, i32) {
    %c0_i32 = arith.constant 0 : i32
    %c0_i32_0 = arith.constant 0 : i32
    %c0_i32_1 = arith.constant 0 : i32
    return %c0_i32, %c0_i32_0 : i32, i32
  }
  func.func @transform_8(%arg0: i32) -> (i32, i32) {
    %c0_i32 = arith.constant 0 : i32
    %c0_i32_0 = arith.constant 0 : i32
    %c0_i32_1 = arith.constant 0 : i32
    return %c0_i32, %c0_i32_0 : i32, i32
  }
  func.func @transform_9(%arg0: i32) -> (i32, i32) {
    %c0_i32 = arith.constant 0 : i32
    %c0_i32_0 = arith.constant 0 : i32
    %c0_i32_1 = arith.constant 0 : i32
    return %c0_i32, %c0_i32_0 : i32, i32
  }
  func.func @transform_10(%arg0: i32) -> (i32, i32, i32) {
    %c0_i32 = arith.constant 0 : i32
    %c0_i32_0 = arith.constant 0 : i32
    %c0_i32_1 = arith.constant 0 : i32
    %c0_i32_2 = arith.constant 0 : i32
    return %c0_i32, %c0_i32_0, %c0_i32_1 : i32, i32, i32
  }
  func.func @transform_11(%arg0: i32) -> (i32, i32) {
    %c0_i32 = arith.constant 0 : i32
    %c0_i32_0 = arith.constant 0 : i32
    %c0_i32_1 = arith.constant 0 : i32
    return %c0_i32, %c0_i32_0 : i32, i32
  }
  func.func @transform_12(%arg0: i32) -> (i32, i32) {
    %c0_i32 = arith.constant 0 : i32
    %c0_i32_0 = arith.constant 0 : i32
    %c0_i32_1 = arith.constant 0 : i32
    return %c0_i32, %c0_i32_0 : i32, i32
  }
  func.func @transform_13(%arg0: i32) -> (i32, i32) {
    %c0_i32 = arith.constant 0 : i32
    %c0_i32_0 = arith.constant 0 : i32
    %c0_i32_1 = arith.constant 0 : i32
    return %c0_i32, %c0_i32_0 : i32, i32
  }
  func.func @transform_14(%arg0: i32) -> (i32, i32, i32) {
    %c0_i32 = arith.constant 0 : i32
    %c0_i32_0 = arith.constant 0 : i32
    %c0_i32_1 = arith.constant 0 : i32
    return %arg0, %c0_i32, %c0_i32_0 : i32, i32, i32
  }
}

</mosaic_0001>

<bundles_post_ra>
// kernel: cross_attention_forward.1
= control target key start
LH: loop header
LB: loop body
LE: loop exit
PB: predicated region body
PF: predicated region fallthrough
CT: control target
= control target key end

     0   :  { %s6087_s29 = smov 0   ;;  %s8195_s0 = inlined_call_operand.vmem [shape: f32[2,10,18,32], index: 0, kind: input, shape index: {}]   ;;  %s8196_s1 = inlined_call_operand.vmem [shape: f32[2,10,18,32], index: 1, kind: input, shape index: {}]   ;;  %s8197_s2 = inlined_call_operand.vmem [shape: f32[3,3,32], index: 2, kind: input, shape index: {}]   ;;  %s8198_s3 = inlined_call_operand.vmem [shape: f32[1,32], index: 3, kind: input, shape index: {}]   ;;  %s8199_s4 = inlined_call_operand.vmem [shape: f32[32,32], index: 4, kind: input, shape index: {}]   ;;  %s8200_s5 = inlined_call_operand.vmem [shape: f32[1,32], index: 5, kind: input, shape index: {}]   ;;  %s8201_s6 = inlined_call_operand.vmem [shape: f32[3,3,32], index: 6, kind: input, shape index: {}]   ;;  %s8202_s7 = inlined_call_operand.vmem [shape: f32[1,32], index: 7, kind: input, shape index: {}]   ;;  %s8203_s8 = inlined_call_operand.vmem [shape: f32[32,32], index: 8, kind: input, shape index: {}]   ;;  %s8204_s9 = inlined_call_operand.vmem [shape: f32[1,32], index: 9, kind: input, shape index: {}]   ;;  %s8205_s10 = inlined_call_operand.vmem [shape: f32[3,3,32], index: 10, kind: input, shape index: {}]   ;;  %s8206_s11 = inlined_call_operand.vmem [shape: f32[1,32], index: 11, kind: input, shape index: {}]   ;;  %s8207_s12 = inlined_call_operand.vmem [shape: f32[32,32], index: 12, kind: input, shape index: {}]   ;;  %s8208_s13 = inlined_call_operand.vmem [shape: f32[1,32], index: 13, kind: input, shape index: {}]   ;;  %s8209_s14 = inlined_call_operand.vmem [shape: f32[2,32,128], index: 14, kind: output, shape index: {}]  }
   0x1 LB: > { %s4926_s30 = sadd.s32 4294967295, %s6003_s29   ;;  %p4930_p0 = scmp.ge.s32.totalorder %s6003_s29, 1  ;;  %s6003_s29 = sphi %s6087_s29, %s24_s29  }
   0x2   : > { %p422_p1 = scmp.lt.s32.totalorder %s6003_s29, 3 }
   0x4   : > { %p423_p2 = pnand %p4930_p0, %p422_p1 }
   0x6   : > { %426 = sbr.rel (%p423_p2) target bundleno = 1895 (0x767), region = 76 }
   0xd   : > { %v992_v0 = vld [vmem:[%s8199_s4] sm:$0xff]  ;;  %v993_v1 = vld [vmem:[%s8199_s4 + $0x8] sm:$0xff]  ;;  %v994_v2 = vld [vmem:[%s8199_s4 + $0x10] sm:$0xff]  ;;  %p473_p3 = scmp.lt.s32.totalorder %s4926_s30, 1  ;;  %vm1003_vm0 = vcmask 261120   ;;  %vm2499_vm1 = vcmask 130048  }
   0xe   : > { %v5721_v3 = vpack.c.bf16 %v993_v1, %v992_v0  ;;  %v995_v4 = vld [vmem:[%s8199_s4 + $0x18] sm:$0xff]  ;;  %v1701_v6 = vld [vmem:[%s8203_s8] sm:$0xff]  ;;  %v1702_v9 = vld [vmem:[%s8203_s8 + $0x8] sm:$0xff]  ;;  %s6006_s16 = smov 32   ;;  %s6009_s17 = smov 80   ;;  %vm3048_vm3 = vcmask 261248  }
   0xf   : > { %v5725_v5 = vpack.c.bf16 %v995_v4, %v994_v2  ;;  %s8372_s30 = smov (!%p473_p3, %s4926_s30), 1  ;;  %v6116_v7 = vld [vmem:[%s8197_s2] ss:$0 sm:$0xff]  ;;  %v6121_v8 = vld [vmem:[%s8197_s2 + $0x1] ss:$0 sm:$0xff]  ;;  %v5729_v11 = vpack.c.bf16 %v1702_v9, %v1701_v6  ;;  %v1703_v12 = vld [vmem:[%s8203_s8 + $0x10] sm:$0xff] }
  0x10   : > { %5722 = vmatprep.subr.bf16.mxu0 %v5721_v3  ;;  %s5825_s25 = smul.u32 240, %s8372_s30  ;;  %v6129_v10 = vld [vmem:[%s8197_s2 + $0x2] ss:$0 sm:$0xff]  ;;  %v1704_v13 = vld [vmem:[%s8203_s8 + $0x18] sm:$0xff]  ;;  %v6147_v14 = vld [vmem:[%s8197_s2 + $0x4] ss:$0 sm:$0xff] }
  0x11   : > { %5724 = vmatpush3.bf16.msra.mxu0 %v5721_v3  ;;  %v5733_v15 = vpack.c.bf16 %v1704_v13, %v1703_v12  ;;  %5730 = vmatprep.subr.bf16.mxu1 %v5729_v11  ;;  %v6161_v23 = vld [vmem:[%s8197_s2 + $0x5] ss:$0 sm:$0xff]  ;;  %v6166_v24 = vld [vmem:[%s8197_s2 + $0x6] ss:$0 sm:$0xff]  ;;  %v6177_v27 = vld [vmem:[%s8201_s6] ss:$0 sm:$0xff] }
  0x12   : > { %5726 = vmatprep.subr.bf16.mxu0 %v5725_v5  ;;  %s6142_s27 = scalar_lea.vmem %s8195_s0, %s5825_s25  ;;  %5732 = vmatpush3.bf16.msra.mxu1 %v5729_v11  ;;  %8269 = vst [vmem:[#allocation2_spill] sm:$0xff] %v6177_v27  ;;  %s6189_s24 = scalar_lea.vmem %s8196_s1, %s5825_s25  ;;  %v6200_v37 = vld [vmem:[%s8201_s6 + $0x1] ss:$0 sm:$0xff]  ;;  %v6205_v38 = vld [vmem:[%s8201_s6 + $0x2] ss:$0 sm:$0xff]  ;;  %vm7307_vm2 = vmpackc.low %vm1003_vm0, %vm1003_vm0  ;;  %vm3349_vm4 = vcmask 392448  }
  0x13   : > { %v489_v16 = vld [vmem:[%s6142_s27] sm:$0xff]  ;;  %v6156_v22 = vld [vmem:[%s6142_s27 + $0x18] sm:$0xff]  ;;  %5734 = vmatprep.subr.bf16.mxu1 %v5733_v15  ;;  %v490_v30 = vld [vmem:[%s6142_s27 + $0x8] sm:$0xff]  ;;  %8270 = vst [vmem:[#allocation3_spill] sm:$0xff] %v6200_v37  ;;  %s5308_s23 = sshll.u32 %s8372_s30, 5  ;;  %s6005_s30 = smov 16  }
  0x14   : > { %v542_v17 = vld [vmem:[%s6142_s27 + $0x1] sm:$0xff]  ;;  %v509_v19 = vmul.f32 %v6116_v7, %v489_v16  ;;  %v6169_v25 = vld [vmem:[%s6142_s27 + $0x19] sm:$0xff]  ;;  %v670_v29 = vmul.f32 %v6147_v14, %v6156_v22  ;;  %v543_v31 = vld [vmem:[%s6142_s27 + $0x9] sm:$0xff]  ;;  %v510_v33 = vmul.f32 %v6116_v7, %v490_v30  ;;  %8271 = vst [vmem:[#allocation4_spill] sm:$0xff] %v6205_v38  ;;  %s7813_s15 = scalar_lea.vmem %s8209_s14, %s5308_s23  ;;  %s6008_s25 = smov 64   ;;  %vm3650_vm5 = vcmask 523648  }
  0x15   : > { %v595_v18 = vld [vmem:[%s6142_s27 + $0x2] sm:$0xff]  ;;  %5728 = vmatpush3.bf16.msra.mxu0 %v5725_v5  ;;  %v562_v20 = vmul.f32 %v6121_v8, %v542_v17  ;;  %v6172_v26 = vld [vmem:[%s6142_s27 + $0x1a] sm:$0xff]  ;;  %v596_v32 = vld [vmem:[%s6142_s27 + $0xa] sm:$0xff]  ;;  %v563_v34 = vmul.f32 %v6121_v8, %v543_v31  ;;  %v723_v40 = vmul.f32 %v6161_v23, %v6169_v25  ;;  %s6011_s18 = smov 112   ;;  %vm3951_vm6 = vcmask 654848  }
  0x16   : > { %v615_v21 = vmul.f32 %v6129_v10, %v595_v18  ;;  %v616_v35 = vmul.f32 %v6129_v10, %v596_v32  ;;  %v6195_v36 = vld [vmem:[%s6142_s27 + $0x20] sm:$0xff]  ;;  %v6212_v41 = vld [vmem:[%s8197_s2 + $0x8] ss:$0 sm:$0xff]  ;;  %v6215_v42 = vld [vmem:[%s6142_s27 + $0x30] sm:$0xff]  ;;  %5736 = vmatpush3.bf16.msra.mxu1 %v5733_v15  ;;  %v776_v44 = vmul.f32 %v6166_v24, %v6172_v26  ;;  %vm4252_vm7 = vcmask 786048  }
  0x17   : > { %v578_v28 = vadd.f32 %v562_v20, %v509_v19  ;;  %v6218_v43 = vld [vmem:[%s6142_s27 + $0x21] sm:$0xff]  ;;  %v6225_v45 = vld [vmem:[%s8197_s2 + $0x9] ss:$0 sm:$0xff]  ;;  %v579_v46 = vadd.f32 %v563_v34, %v510_v33  ;;  %v671_v47 = vmul.f32 %v6147_v14, %v6195_v36  ;;  %v6253_v57 = vld [vmem:[%s6189_s24 + $0x18] sm:$0xff]  ;;  %v831_v0 = vmul.f32 %v6212_v41, %v6215_v42 }
  0x18   : > { %v6230_v48 = vld [vmem:[%s6189_s24] sm:$0xff]  ;;  %v6256_v58 = vld [vmem:[%s6142_s27 + $0x31] sm:$0xff]  ;;  %v724_v60 = vmul.f32 %v6161_v23, %v6218_v43  ;;  %v6273_v1 = vld [vmem:[%s8197_s2 + $0xa] ss:$0 sm:$0xff]  ;;  %vm4553_vm8 = vcmask 917248   ;;  %vm4854_vm9 = vcmask 1048448  }
  0x19   : > { %v631_v39 = vadd.f32 %v615_v21, %v578_v28  ;;  %v6233_v49 = vld [vmem:[%s6189_s24 + $0x1] sm:$0xff]  ;;  %v1218_v53 = vmul.f32 %v6177_v27, %v6230_v48  ;;  %v632_v59 = vadd.f32 %v616_v35, %v579_v46  ;;  %v6266_v62 = vld [vmem:[%s6189_s24 + $0x19] sm:$0xff]  ;;  %v884_v15 = vmul.f32 %v6225_v45, %v6256_v58  ;;  %v6320_v34 = vld [vmem:[%s8201_s6 + $0x9] ss:$0 sm:$0xff] }
  0x1a   : > { %v6236_v50 = vld [vmem:[%s6189_s24 + $0x2] sm:$0xff]  ;;  %v1271_v54 = vmul.f32 %v6200_v37, %v6233_v49  ;;  %v6276_v2 = vld [vmem:[%s6142_s27 + $0x38] sm:$0xff] }
  0x1b   : > { %v686_v51 = vadd.f32 %v670_v29, %v631_v39  ;;  %v6239_v52 = vld [vmem:[%s6142_s27 + $0x22] sm:$0xff]  ;;  %v1324_v55 = vmul.f32 %v6205_v38, %v6236_v50  ;;  %v6281_v5 = vld [vmem:[%s6142_s27 + $0x32] sm:$0xff]  ;;  %v687_v6 = vadd.f32 %v671_v47, %v632_v59  ;;  %v6291_v12 = vld [vmem:[%s6189_s24 + $0x1a] sm:$0xff]  ;;  %v832_v20 = vmul.f32 %v6212_v41, %v6276_v2 }
  0x1c   : > { %v6250_v56 = vld [vmem:[%s8201_s6 + $0x4] ss:$0 sm:$0xff]  ;;  %v6263_v61 = vld [vmem:[%s8201_s6 + $0x5] ss:$0 sm:$0xff]  ;;  %v1287_v3 = vadd.f32 %v1271_v54, %v1218_v53  ;;  %v777_v9 = vmul.f32 %v6166_v24, %v6239_v52  ;;  %v6288_v11 = vld [vmem:[%s8201_s6 + $0x6] ss:$0 sm:$0xff]  ;;  %v937_v31 = vmul.f32 %v6273_v1, %v6281_v5 }
  0x1d   : > { %8272 = vst [vmem:[#allocation5_spill] sm:$0xff] %v6263_v61  ;;  %v739_v63 = vadd.f32 %v723_v40, %v686_v51  ;;  %v1379_v4 = vmul.f32 %v6250_v56, %v6253_v57  ;;  %v6296_v16 = vld [vmem:[%s6142_s27 + $0x39] sm:$0xff]  ;;  %v1432_v18 = vmul.f32 %v6263_v61, %v6266_v62  ;;  %v740_v19 = vadd.f32 %v724_v60, %v687_v6  ;;  %v6308_v28 = vld [vmem:[%s8201_s6 + $0x8] ss:$0 sm:$0xff]  ;;  %v6311_v29 = vld [vmem:[%s6189_s24 + $0x30] sm:$0xff] }
  0x1e   : > { %v1340_v17 = vadd.f32 %v1324_v55, %v1287_v3  ;;  %v6303_v21 = vld [vmem:[%s6142_s27 + $0x3a] sm:$0xff]  ;;  %v1485_v33 = vmul.f32 %v6288_v11, %v6291_v12  ;;  %v885_v39 = vmul.f32 %v6225_v45, %v6296_v16  ;;  %v6325_v40 = vld [vmem:[%s6189_s24 + $0x31] sm:$0xff]  ;;  %v1252_v46 = vld [vmem:[%s6189_s24 + $0x9] sm:$0xff]  ;;  %v1540_v55 = vmul.f32 %v6308_v28, %v6311_v29 }
  0x1f   : > { %v792_v13 = vadd.f32 %v776_v44, %v739_v63  ;;  %8273 = vst [vmem:[#allocation6_spill] sm:$0xff] %v6303_v21  ;;  %v793_v35 = vadd.f32 %v777_v9, %v740_v19  ;;  %v1199_v44 = vld [vmem:[%s6189_s24 + $0x8] sm:$0xff]  ;;  %v6332_v51 = vld [vmem:[%s8198_s3] ss:$0 sm:$0xff]  ;;  %v938_v53 = vmul.f32 %v6273_v1, %v6303_v21  ;;  %v6348_v3 = vld [vmem:[%s6189_s24 + $0x32] sm:$0xff]  ;;  %v1272_v6 = vmul.f32 %v6200_v37, %v1252_v46 }
  0x20   : > { %v1395_v32 = vadd.f32 %v1379_v4, %v1340_v17  ;;  %v1305_v59 = vld [vmem:[%s6189_s24 + $0xa] sm:$0xff]  ;;  %v6340_v60 = vld [vmem:[%s6189_s24 + $0x20] sm:$0xff]  ;;  %v1219_v4 = vmul.f32 %v6177_v27, %v1199_v44 }
  0x21   : > { %v847_v30 = vadd.f32 %v831_v0, %v792_v13  ;;  %v848_v63 = vadd.f32 %v832_v20, %v793_v35  ;;  %v6345_v0 = vld [vmem:[%s8201_s6 + $0xa] ss:$0 sm:$0xff]  ;;  %v1325_v9 = vmul.f32 %v6205_v38, %v1305_v59  ;;  %v6354_v13 = vld [vmem:[%s6189_s24 + $0x21] sm:$0xff]  ;;  %v5193_v19 = vld [vmem:[%s8205_s10] ss:$0 sm:$0xff] }
  0x22   : > { %v1448_v54 = vadd.f32 %v1432_v18, %v1395_v32  ;;  %8274 = vst [vmem:[#allocation7_spill] sm:$0xff] %v6345_v0  ;;  %v1593_v18 = vmul.f32 %v6320_v34, %v6325_v40  ;;  %v5194_v20 = vld [vmem:[%s8205_s10 + $0x1] ss:$0 sm:$0xff]  ;;  %v5195_v32 = vld [vmem:[%s8205_s10 + $0x2] ss:$0 sm:$0xff]  ;;  %v1433_v38 = vmul.f32 %v6263_v61, %v6354_v13  ;;  %v1911_v27 = vmul.f32 %v5193_v19, %v1199_v44 }
  0x23   : > { %v900_v47 = vadd.f32 %v884_v15, %v847_v30  ;;  %v901_v30 = vadd.f32 %v885_v39, %v848_v63  ;;  %v6375_v37 = vld [vmem:[%s6189_s24 + $0x22] sm:$0xff]  ;;  %v1948_v21 = vmul.f32 %v5194_v20, %v1252_v46 }
  0x24   : > { %v1501_v17 = vadd.f32 %v1485_v33, %v1448_v54  ;;  %v1380_v33 = vmul.f32 %v6250_v56, %v6340_v60  ;;  %v1646_v54 = vmul.f32 %v6345_v0, %v6348_v3 }
  0x25   : > { %v953_v15 = vadd.f32 %v937_v31, %v900_v47  ;;  %v1288_v31 = vadd.f32 %v1272_v6, %v1219_v4  ;;  %v954_v39 = vadd.f32 %v938_v53, %v901_v30  ;;  %v6379_v6 = vld [vmem:[%s6189_s24 + $0x38] sm:$0xff]  ;;  %v1486_v53 = vmul.f32 %v6288_v11, %v6375_v37 }
  0x26   : > { %v1556_v47 = vadd.f32 %v1540_v55, %v1501_v17  ;;  %8275 = vst [vmem:[#allocation8_spill] sm:$0xff] %v6379_v6  ;;  %v1985_v55 = vmul.f32 %v5195_v32, %v1305_v59  ;;  %v6385_v17 = vld [vmem:[%s8202_s7] ss:$0 sm:$0xff]  ;;  %v1964_v44 = vadd.f32 %v1948_v21, %v1911_v27  ;;  %v1541_v59 = vmul.f32 %v6308_v28, %v6379_v6 }
  0x27   : > { %v976_v35 = vadd.f32 %v6332_v51, %v953_v15  ;;  %v1341_v63 = vadd.f32 %v1325_v9, %v1288_v31  ;;  %v977_v15 = vadd.f32 %v6332_v51, %v954_v39  ;;  %8276 = vst [vmem:[#allocation9_spill] sm:$0xff] %v6385_v17  ;;  %v6390_v9 = vld [vmem:[%s6189_s24 + $0x39] sm:$0xff]  ;;  %v5197_v39 = vld [vmem:[%s8205_s10 + $0x4] ss:$0 sm:$0xff] }
  0x28   : > { %v1609_v4 = vadd.f32 %v1593_v18, %v1556_v47  ;;  %8277 = vst [vmem:[#allocation10_spill] sm:$0xff] %v6390_v9  ;;  %v2001_v30 = vadd.f32 %v1985_v55, %v1964_v44 }
  0x29   : > { %5473 = vmatprep.mubr.msk.f32.mxu0 %vm1003_vm0, %v976_v35  ;;  %v1396_v61 = vadd.f32 %v1380_v33, %v1341_v63  ;;  %v6397_v35 = vld [vmem:[%s6189_s24 + $0x3a] sm:$0xff]  ;;  %v1594_v33 = vmul.f32 %v6320_v34, %v6390_v9  ;;  %v2023_v63 = vmul.f32 %v5197_v39, %v6340_v60 }
  0x2a   : > { %v1662_v46 = vadd.f32 %v1646_v54, %v1609_v4  ;;  %5474 = vmatmul.mubr.msk.f32.vlgmr.msra.gmra.mrb[0].mxu0 %vm1003_vm0, %v977_v15  ;;  %8278 = vst [vmem:[#allocation11_spill] sm:$0xff] %v6397_v35  ;;  %v1647_v21 = vmul.f32 %v6345_v0, %v6397_v35  ;;  %v5199_v4 = vld [vmem:[%s8205_s10 + $0x5] ss:$0 sm:$0xff] }
  0x2b   : > { %v1449_v18 = vadd.f32 %v1433_v38, %v1396_v61  ;;  %v2039_v55 = vadd.f32 %v2023_v63, %v2001_v30  ;;  %v2060_v15 = vmul.f32 %v5199_v4, %v6354_v13  ;;  %v5205_v30 = vld [vmem:[%s8205_s10 + $0x9] ss:$0 sm:$0xff]  ;;  %v6437_v63 = vmul.f32 %v5195_v32, %v6236_v50 }
  0x2c   : > { %v1685_v31 = vadd.f32 %v6385_v17, %v1662_v46  ;;  %v564_v50 = vmul.f32 %v6169_v25, %v6121_v8  ;;  %v4995_v25 = vld [vmem:[%s6142_s27 + $0x48] sm:$0xff] }
  0x2d   : > { %v1502_v47 = vadd.f32 %v1486_v53, %v1449_v18  ;;  %v5201_v53 = vld [vmem:[%s8205_s10 + $0x6] ss:$0 sm:$0xff]  ;;  %v2076_v44 = vadd.f32 %v2060_v15, %v2039_v55  ;;  %v5203_v18 = vld [vmem:[%s8205_s10 + $0x8] ss:$0 sm:$0xff]  ;;  %v6440_v55 = vmul.f32 %v5197_v39, %v6253_v57  ;;  %v6443_v15 = vmul.f32 %v5199_v4, %v6266_v62  ;;  %v5013_v32 = vld [vmem:[%s6142_s27 + $0x49] sm:$0xff] }
  0x2e   : > { %5505 = vmatprep.mubr.msk.f32.mxu1 %vm1003_vm0, %v1685_v31  ;;  %v2097_v46 = vmul.f32 %v5201_v53, %v6375_v37  ;;  %v2135_v31 = vmul.f32 %v5203_v18, %v6379_v6  ;;  %v617_v57 = vmul.f32 %v6172_v26, %v6129_v10  ;;  %v512_v26 = vmul.f32 %v6195_v36, %v6116_v7 }
  0x2f   : > { %v1557_v27 = vadd.f32 %v1541_v59, %v1502_v47  ;;  %v778_v39 = vmul.f32 %v6281_v5, %v6166_v24  ;;  %v833_v4 = vmul.f32 %v6212_v41, %v4995_v25  ;;  %v568_v6 = vmul.f32 %v5013_v32, %v6121_v8 }
  0x30   : > { %v2113_v59 = vadd.f32 %v2097_v46, %v2076_v44  ;;  %v6446_v44 = vmul.f32 %v5201_v53, %v6291_v12  ;;  %v886_v53 = vmul.f32 %v6225_v45, %v5013_v32  ;;  %v5031_v46 = vld [vmem:[%s6142_s27 + $0x4a] sm:$0xff] }
  0x31   : > { %v1610_v54 = vadd.f32 %v1594_v33, %v1557_v27  ;;  %v2172_v33 = vmul.f32 %v5205_v30, %v6390_v9  ;;  %v5207_v27 = vld [vmem:[%s8205_s10 + $0xa] ss:$0 sm:$0xff] }
  0x32   : > { %v2151_v47 = vadd.f32 %v2135_v31, %v2113_v59  ;;  %v6461_v62 = vmul.f32 %v5207_v27, %v6348_v3  ;;  %v939_v31 = vmul.f32 %v6273_v1, %v5031_v46 }
  0x33   : > { %v1663_v38 = vadd.f32 %v1647_v21, %v1610_v54  ;;  %v2209_v54 = vmul.f32 %v5207_v27, %v6397_v35  ;;  %v566_v27 = vmul.f32 %v6256_v58, %v6121_v8  ;;  %v6507_v35 = vld [vmem:[%s6142_s27 + $0x60] sm:$0xff] }
  0x34   : > { %v2188_v21 = vadd.f32 %v2172_v33, %v2151_v47  ;;  %8281 = vst [vmem:[#allocation14_spill] sm:$0xff] %v6461_v62  ;;  %v4996_v47 = vld [vmem:[%s6142_s27 + $0x50] sm:$0xff]  ;;  %v513_v33 = vmul.f32 %v6215_v42, %v6116_v7  ;;  %v780_v62 = vmul.f32 %v5031_v46, %v6166_v24 }
  0x35   : > { %v1686_v61 = vadd.f32 %v6385_v17, %v1663_v38  ;;  %v6431_v38 = vmul.f32 %v5193_v19, %v6230_v48  ;;  %v6449_v48 = vmul.f32 %v5203_v18, %v6311_v29  ;;  %v6458_v19 = vmul.f32 %v5205_v30, %v6325_v40 }
  0x36   : > { %v6463_v12 = vadd.f32 %v2209_v54, %v2188_v21  ;;  %v672_v29 = vmul.f32 %v6215_v42, %v6147_v14  ;;  %v565_v40 = vmul.f32 %v6218_v43, %v6121_v8  ;;  %v618_v18 = vmul.f32 %v6239_v52, %v6129_v10 }
  0x37   : > { %5506 = vmatmul.mubr.msk.f32.vlgmr.msra.gmra.mrb[0].mxu1 %vm1003_vm0, %v1686_v61  ;;  %v6434_v61 = vmul.f32 %v5194_v20, %v6233_v49  ;;  %8279 = vst [vmem:[#allocation12_spill] sm:$0xff] %v6449_v48  ;;  %v511_v49 = vmul.f32 %v6156_v22, %v6116_v7  ;;  %8280 = vst [vmem:[#allocation13_spill] sm:$0xff] %v6458_v19  ;;  %v725_v22 = vmul.f32 %v6256_v58, %v6161_v23  ;;  %v6510_v19 = vld [vmem:[%s6142_s27 + $0x61] sm:$0xff] }
  0x38   : > { %8282 = vst [vmem:[#allocation15_spill] sm:$0xff] %v6463_v12  ;;  %v581_v36 = vadd.f32 %v565_v40, %v512_v26  ;;  %v673_v43 = vmul.f32 %v6276_v2, %v6147_v14  ;;  %v726_v30 = vmul.f32 %v6296_v16, %v6161_v23  ;;  %v619_v52 = vmul.f32 %v6281_v5, %v6129_v10  ;;  %v5032_v26 = vld [vmem:[%s6142_s27 + $0x52] sm:$0xff]  ;;  %v6529_v48 = vld [vmem:[%s6142_s27 + $0x68] sm:$0xff] }
  0x39   : > { %v580_v20 = vadd.f32 %v564_v50, %v511_v49  ;;  %v8283_v49 = vld [vmem:[#allocation6_spill] sm:$0xff]  ;;  %v940_v42 = vmul.f32 %v6273_v1, %v5032_v26  ;;  %v582_v17 = vadd.f32 %v566_v27, %v513_v33  ;;  %v674_v58 = vmul.f32 %v4995_v25, %v6147_v14 }
  0x3a   : > { %v634_v54 = vadd.f32 %v618_v18, %v581_v36  ;;  %v779_v50 = vmul.f32 %v8283_v49, %v6166_v24  ;;  %v727_v18 = vmul.f32 %v5013_v32, %v6161_v23  ;;  %v567_v33 = vmul.f32 %v6296_v16, %v6121_v8 }
  0x3b   : > { %v633_v59 = vadd.f32 %v617_v57, %v580_v20  ;;  %v834_v57 = vmul.f32 %v6212_v41, %v4996_v47  ;;  %v5014_v20 = vld [vmem:[%s6142_s27 + $0x51] sm:$0xff]  ;;  %v635_v36 = vadd.f32 %v619_v52, %v582_v17  ;;  %v620_v27 = vmul.f32 %v8283_v49, %v6129_v10  ;;  %v6521_v17 = vld [vmem:[%s6142_s27 + $0x62] sm:$0xff] }
  0x3c   : > { %v887_v40 = vmul.f32 %v6225_v45, %v5014_v20  ;;  %v675_v16 = vmul.f32 %v4996_v47, %v6147_v14 }
  0x3d   : > { %v688_v21 = vadd.f32 %v672_v29, %v633_v59  ;;  %v689_v29 = vadd.f32 %v673_v43, %v634_v54  ;;  %v514_v59 = vmul.f32 %v6276_v2, %v6116_v7  ;;  %v888_v2 = vmul.f32 %v6225_v45, %v6510_v19 }
  0x3e   : > { %v690_v52 = vadd.f32 %v674_v58, %v635_v36  ;;  %v941_v54 = vmul.f32 %v6273_v1, %v6521_v17  ;;  %v621_v58 = vmul.f32 %v5031_v46, %v6129_v10 }
  0x3f   : > { %v741_v5 = vadd.f32 %v725_v22, %v688_v21  ;;  %v742_v43 = vadd.f32 %v726_v30, %v689_v29  ;;  %v835_v21 = vmul.f32 %v6212_v41, %v6507_v35  ;;  %v583_v9 = vadd.f32 %v567_v33, %v514_v59 }
  0x40   : > { %v515_v30 = vmul.f32 %v4995_v25, %v6116_v7  ;;  %v781_v59 = vmul.f32 %v5032_v26, %v6166_v24 }
  0x41   : > { %v794_v22 = vadd.f32 %v778_v39, %v741_v5  ;;  %v795_v12 = vadd.f32 %v779_v50, %v742_v43  ;;  %v728_v39 = vmul.f32 %v5014_v20, %v6161_v23  ;;  %v743_v5 = vadd.f32 %v727_v18, %v690_v52 }
  0x42   : > { %v636_v29 = vadd.f32 %v620_v27, %v583_v9  ;;  %v584_v25 = vadd.f32 %v568_v6, %v515_v30  ;;  %v676_v9 = vmul.f32 %v6507_v35, %v6147_v14  ;;  %v782_v27 = vmul.f32 %v6521_v17, %v6166_v24 }
  0x43   : > { %v849_v49 = vadd.f32 %v833_v4, %v794_v22  ;;  %v850_v0 = vadd.f32 %v834_v57, %v795_v12  ;;  %v836_v4 = vmul.f32 %v6212_v41, %v6529_v48  ;;  %v796_v50 = vadd.f32 %v780_v62, %v743_v5  ;;  %v6537_v22 = vld [vmem:[%s6142_s27 + $0x69] sm:$0xff]  ;;  %v4999_v5 = vld [vmem:[%s6142_s27 + $0x78] sm:$0xff] }
  0x44   : > { %v691_v33 = vadd.f32 %v675_v16, %v636_v29  ;;  %v729_v12 = vmul.f32 %v6510_v19, %v6161_v23  ;;  %v637_v62 = vadd.f32 %v621_v58, %v584_v25  ;;  %v516_v52 = vmul.f32 %v4996_v47, %v6116_v7  ;;  %v5034_v16 = vld [vmem:[%s6142_s27 + $0x6a] sm:$0xff] }
  0x45   : > { %v902_v36 = vadd.f32 %v886_v53, %v849_v49  ;;  %v903_v32 = vadd.f32 %v887_v40, %v850_v0  ;;  %v889_v53 = vmul.f32 %v6225_v45, %v6537_v22  ;;  %v851_v46 = vadd.f32 %v835_v21, %v796_v50 }
  0x46   : > { %v744_v57 = vadd.f32 %v728_v39, %v691_v33  ;;  %v569_v0 = vmul.f32 %v5014_v20, %v6121_v8  ;;  %v692_v49 = vadd.f32 %v676_v9, %v637_v62  ;;  %v622_v21 = vmul.f32 %v5032_v26, %v6129_v10  ;;  %v5035_v26 = vld [vmem:[%s6142_s27 + $0x7a] sm:$0xff] }
  0x47   : > { %v955_v18 = vadd.f32 %v939_v31, %v902_v36  ;;  %v956_v43 = vadd.f32 %v940_v42, %v903_v32  ;;  %v904_v31 = vadd.f32 %v888_v2, %v851_v46  ;;  %v942_v30 = vmul.f32 %v6273_v1, %v5034_v16  ;;  %v5017_v36 = vld [vmem:[%s6142_s27 + $0x79] sm:$0xff] }
  0x48   : > { %v797_v40 = vadd.f32 %v781_v59, %v744_v57  ;;  %v585_v42 = vadd.f32 %v569_v0, %v516_v52  ;;  %v677_v47 = vmul.f32 %v6529_v48, %v6147_v14  ;;  %v745_v2 = vadd.f32 %v729_v12, %v692_v49  ;;  %v5000_v46 = vld [vmem:[%s6142_s27 + $0x80] sm:$0xff] }
  0x49   : > { %v978_v6 = vadd.f32 %v6332_v51, %v955_v18  ;;  %v979_v39 = vadd.f32 %v6332_v51, %v956_v43  ;;  %v957_v20 = vadd.f32 %v941_v54, %v904_v31  ;;  %v837_v58 = vmul.f32 %v6212_v41, %v4999_v5  ;;  %v6572_v57 = vld [vmem:[%s6142_s27 + $0x81] sm:$0xff] }
  0x4a   : > { %v852_v29 = vadd.f32 %v836_v4, %v797_v40  ;;  %v890_v59 = vmul.f32 %v6225_v45, %v5017_v36  ;;  %v943_v50 = vmul.f32 %v6273_v1, %v5035_v26  ;;  %v638_v33 = vadd.f32 %v622_v21, %v585_v42  ;;  %v5036_v52 = vld [vmem:[%s6142_s27 + $0x82] sm:$0xff] }
  0x4b   : > { %5476 = vmatprep.mubr.msk.f32.mxu0 %vm1003_vm0, %v978_v6  ;;  %v730_v25 = vmul.f32 %v6537_v22, %v6161_v23  ;;  %v980_v54 = vadd.f32 %v6332_v51, %v957_v20  ;;  %v798_v9 = vadd.f32 %v782_v27, %v745_v2  ;;  %v517_v18 = vmul.f32 %v6507_v35, %v6116_v7  ;;  %v6591_v20 = vld [vmem:[%s6142_s27 + $0x91] sm:$0xff] }
  0x4c   : > { %5477 = vmatmul.mubr.msk.f32.gmra.mrb[2].mxu0 %vm1003_vm0, %v979_v39  ;;  %v905_v4 = vadd.f32 %v889_v53, %v852_v29  ;;  %v693_v32 = vadd.f32 %v677_v47, %v638_v33  ;;  %v783_v12 = vmul.f32 %v5034_v16, %v6166_v24  ;;  %v570_v62 = vmul.f32 %v6510_v19, %v6121_v8  ;;  %v5001_v47 = vld [vmem:[%s6142_s27 + $0x90] sm:$0xff] }
  0x4d   : > { %v623_v6 = vmul.f32 %v6521_v17, %v6129_v10  ;;  %5479 = vmatprep.mubr.msk.f32.mxu0 %vm1003_vm0, %v980_v54  ;;  %v853_v27 = vadd.f32 %v837_v58, %v798_v9  ;;  %v838_v35 = vmul.f32 %v6212_v41, %v5000_v46  ;;  %v891_v43 = vmul.f32 %v6225_v45, %v6572_v57 }
  0x4e   : > { %v958_v53 = vadd.f32 %v942_v30, %v905_v4  ;;  %v746_v0 = vadd.f32 %v730_v25, %v693_v32  ;;  %v944_v31 = vmul.f32 %v6273_v1, %v5036_v52  ;;  %v586_v40 = vadd.f32 %v570_v62, %v517_v18  ;;  %v5037_v4 = vld [vmem:[%s6142_s27 + $0x92] sm:$0xff] }
  0x4f   : > { %v678_v19 = vmul.f32 %v4999_v5, %v6147_v14  ;;  %v906_v49 = vadd.f32 %v890_v59, %v853_v27  ;;  %v731_v21 = vmul.f32 %v5017_v36, %v6161_v23  ;;  %v518_v39 = vmul.f32 %v6529_v48, %v6116_v7 }
  0x50   : > { %v981_v17 = vadd.f32 %v6332_v51, %v958_v53  ;;  %v799_v30 = vadd.f32 %v783_v12, %v746_v0  ;;  %v639_v42 = vadd.f32 %v623_v6, %v586_v40  ;;  %v571_v29 = vmul.f32 %v6537_v22, %v6121_v8  ;;  %v6609_v53 = vld [vmem:[%s6142_s27 + $0x98] sm:$0xff] }
  0x51   : > { %v624_v2 = vmul.f32 %v5034_v16, %v6129_v10  ;;  %v959_v58 = vadd.f32 %v943_v50, %v906_v49  ;;  %v784_v59 = vmul.f32 %v5035_v26, %v6166_v24  ;;  %v839_v33 = vmul.f32 %v6212_v41, %v5001_v47  ;;  %v5020_v49 = vld [vmem:[%s6142_s27 + $0x99] sm:$0xff] }
  0x52   : > { %5480 = vmatmul.mubr.msk.f32.gmra.mrb[4].mxu0 %vm1003_vm0, %v981_v17  ;;  %v892_v48 = vmul.f32 %v6225_v45, %v6591_v20  ;;  %v854_v25 = vadd.f32 %v838_v35, %v799_v30  ;;  %v694_v54 = vadd.f32 %v678_v19, %v639_v42  ;;  %v587_v9 = vadd.f32 %v571_v29, %v518_v39 }
  0x53   : > { %v679_v18 = vmul.f32 %v5000_v46, %v6147_v14  ;;  %v982_v22 = vadd.f32 %v6332_v51, %v959_v58  ;;  %v945_v16 = vmul.f32 %v6273_v1, %v5037_v4  ;;  %v732_v50 = vmul.f32 %v6572_v57, %v6161_v23 }
  0x54   : > { %v519_v32 = vmul.f32 %v4999_v5, %v6116_v7  ;;  %v907_v12 = vadd.f32 %v891_v43, %v854_v25  ;;  %v747_v62 = vadd.f32 %v731_v21, %v694_v54  ;;  %v640_v6 = vadd.f32 %v624_v2, %v587_v9  ;;  %v5038_v21 = vld [vmem:[%s6142_s27 + $0x9a] sm:$0xff]  ;;  %v6633_v9 = vld [vmem:[%s6142_s27 + $0xa9] sm:$0xff] }
  0x55   : > { %v572_v27 = vmul.f32 %v5017_v36, %v6121_v8  ;;  %5482 = vmatprep.mubr.msk.f32.mxu0 %vm1003_vm0, %v982_v22  ;;  %v785_v35 = vmul.f32 %v5036_v52, %v6166_v24  ;;  %v840_v0 = vmul.f32 %v6212_v41, %v6609_v53  ;;  %v625_v40 = vmul.f32 %v5035_v26, %v6129_v10 }
  0x56   : > { %v680_v19 = vmul.f32 %v5001_v47, %v6147_v14  ;;  %v960_v5 = vadd.f32 %v944_v31, %v907_v12  ;;  %v800_v43 = vadd.f32 %v784_v59, %v747_v62  ;;  %v695_v17 = vadd.f32 %v679_v18, %v640_v6  ;;  %v6627_v59 = vld [vmem:[%s6142_s27 + $0xa8] sm:$0xff] }
  0x57   : > { %v588_v39 = vadd.f32 %v572_v27, %v519_v32  ;;  %v893_v36 = vmul.f32 %v6225_v45, %v5020_v49  ;;  %v946_v30 = vmul.f32 %v6273_v1, %v5038_v21  ;;  %v733_v42 = vmul.f32 %v6591_v20, %v6161_v23  ;;  %v5039_v12 = vld [vmem:[%s6142_s27 + $0xaa] sm:$0xff] }
  0x58   : > { %v520_v29 = vmul.f32 %v5000_v46, %v6116_v7  ;;  %v983_v26 = vadd.f32 %v6332_v51, %v960_v5  ;;  %v855_v2 = vadd.f32 %v839_v33, %v800_v43  ;;  %v748_v31 = vadd.f32 %v732_v50, %v695_v17  ;;  %v6649_v43 = vld [vmem:[%s6142_s27 + $0xb0] sm:$0xff] }
  0x59   : > { %v641_v58 = vadd.f32 %v625_v40, %v588_v39  ;;  %v786_v25 = vmul.f32 %v5037_v4, %v6166_v24  ;;  %v841_v54 = vmul.f32 %v6212_v41, %v6627_v59  ;;  %v573_v18 = vmul.f32 %v6572_v57, %v6121_v8 }
  0x5a   : > { %v626_v46 = vmul.f32 %v5036_v52, %v6129_v10  ;;  %5483 = vmatmul.mubr.msk.f32.gmra.mrb[6].mxu0 %vm1003_vm0, %v983_v26  ;;  %v908_v33 = vadd.f32 %v892_v48, %v855_v2  ;;  %v801_v22 = vadd.f32 %v785_v35, %v748_v31  ;;  %v894_v32 = vmul.f32 %v6225_v45, %v6633_v9  ;;  %v6663_v31 = vld [vmem:[%s6142_s27 + $0xb2] sm:$0xff] }
  0x5b   : > { %v696_v50 = vadd.f32 %v680_v19, %v641_v58  ;;  %v947_v62 = vmul.f32 %v6273_v1, %v5039_v12  ;;  %v589_v6 = vadd.f32 %v573_v18, %v520_v29  ;;  %v681_v27 = vmul.f32 %v6609_v53, %v6147_v14 }
  0x5c   : > { %v734_v57 = vmul.f32 %v5020_v49, %v6161_v23  ;;  %v961_v52 = vadd.f32 %v945_v16, %v908_v33  ;;  %v856_v40 = vadd.f32 %v840_v0, %v801_v22  ;;  %v521_v48 = vmul.f32 %v5001_v47, %v6116_v7  ;;  %v6658_v0 = vld [vmem:[%s6142_s27 + $0xb1] sm:$0xff] }
  0x5d   : > { %v749_v5 = vadd.f32 %v733_v42, %v696_v50  ;;  %v642_v35 = vadd.f32 %v626_v46, %v589_v6  ;;  %v787_v19 = vmul.f32 %v5038_v21, %v6166_v24  ;;  %v574_v17 = vmul.f32 %v6591_v20, %v6121_v8 }
  0x5e   : > { %v627_v39 = vmul.f32 %v5037_v4, %v6129_v10  ;;  %v984_v29 = vadd.f32 %v6332_v51, %v961_v52  ;;  %v909_v26 = vadd.f32 %v893_v36, %v856_v40  ;;  %v842_v16 = vmul.f32 %v6212_v41, %v6649_v43 }
  0x5f   : > { %v802_v2 = vadd.f32 %v786_v25, %v749_v5  ;;  %v697_v47 = vadd.f32 %v681_v27, %v642_v35  ;;  %v895_v42 = vmul.f32 %v6225_v45, %v6658_v0  ;;  %v590_v58 = vadd.f32 %v574_v17, %v521_v48  ;;  %v5023_v48 = vld [vmem:[%s6142_s27 + $0xc1] sm:$0xff] }
  0x60   : > { %v682_v20 = vmul.f32 %v6627_v59, %v6147_v14  ;;  %5485 = vmatprep.mubr.msk.f32.mxu0 %vm1003_vm0, %v984_v29  ;;  %v962_v4 = vadd.f32 %v946_v30, %v909_v26  ;;  %v948_v25 = vmul.f32 %v6273_v1, %v6663_v31  ;;  %v735_v18 = vmul.f32 %v6633_v9, %v6161_v23  ;;  %v5005_v30 = vld [vmem:[%s6142_s27 + $0xc0] sm:$0xff] }
  0x61   : > { %v857_v36 = vadd.f32 %v841_v54, %v802_v2  ;;  %v750_v46 = vadd.f32 %v734_v57, %v697_v47  ;;  %v643_v33 = vadd.f32 %v627_v39, %v590_v58  ;;  %v522_v22 = vmul.f32 %v6609_v53, %v6116_v7  ;;  %v2263_v53 = vld [vmem:[%s8207_s12] sm:$0xff] }
  0x62   : > { %v575_v50 = vmul.f32 %v5020_v49, %v6121_v8  ;;  %v985_v6 = vadd.f32 %v6332_v51, %v962_v4  ;;  %v788_v52 = vmul.f32 %v5039_v12, %v6166_v24  ;;  %v628_v54 = vmul.f32 %v5038_v21, %v6129_v10  ;;  %v2264_v49 = vld [vmem:[%s8207_s12 + $0x8] sm:$0xff] }
  0x63   : > { %v910_v27 = vadd.f32 %v894_v32, %v857_v36  ;;  %v803_v40 = vadd.f32 %v787_v19, %v750_v46  ;;  %v698_v5 = vadd.f32 %v682_v20, %v643_v33  ;;  %v683_v57 = vmul.f32 %v6649_v43, %v6147_v14  ;;  %v5041_v46 = vld [vmem:[%s6142_s27 + $0xc2] sm:$0xff] }
  0x64   : > { %v591_v35 = vadd.f32 %v575_v50, %v522_v22  ;;  %5486 = vmatmul.mubr.msk.f32.gmra.mrb[8].mxu0 %vm1003_vm0, %v985_v6  ;;  %v843_v21 = vmul.f32 %v6212_v41, %v5005_v30  ;;  %v896_v19 = vmul.f32 %v6225_v45, %v5023_v48  ;;  %v736_v17 = vmul.f32 %v6658_v0, %v6161_v23  ;;  %v5006_v22 = vld [vmem:[%s6142_s27 + $0xc8] sm:$0xff] }
  0x65   : > { %v963_v32 = vadd.f32 %v947_v62, %v910_v27  ;;  %v858_v39 = vadd.f32 %v842_v16, %v803_v40  ;;  %v751_v29 = vadd.f32 %v735_v18, %v698_v5  ;;  %v789_v2 = vmul.f32 %v6663_v31, %v6166_v24 }
  0x66   : > { %v644_v26 = vadd.f32 %v628_v54, %v591_v35  ;;  %v5737_v58 = vpack.c.bf16 %v2264_v49, %v2263_v53  ;;  %v523_v62 = vmul.f32 %v6627_v59, %v6116_v7  ;;  %v576_v20 = vmul.f32 %v6633_v9, %v6121_v8  ;;  %v5042_v54 = vld [vmem:[%s6142_s27 + $0xca] sm:$0xff]  ;;  %v5025_v53 = vld [vmem:[%s6142_s27 + $0xd9] sm:$0xff] }
  0x67   : > { %v986_v47 = vadd.f32 %v6332_v51, %v963_v32  ;;  %v911_v4 = vadd.f32 %v895_v42, %v858_v39  ;;  %v804_v36 = vadd.f32 %v788_v52, %v751_v29  ;;  %v629_v18 = vmul.f32 %v5039_v12, %v6129_v10  ;;  %v5024_v52 = vld [vmem:[%s6142_s27 + $0xc9] sm:$0xff]  ;;  %v5043_v32 = vld [vmem:[%s6142_s27 + $0xda] sm:$0xff] }
  0x68   : > { %v699_v16 = vadd.f32 %v683_v57, %v644_v26  ;;  %v949_v33 = vmul.f32 %v6273_v1, %v5041_v46  ;;  %5738 = vmatprep.subr.bf16.mxu0 %v5737_v58  ;;  %v592_v59 = vadd.f32 %v576_v20, %v523_v62  ;;  %v684_v50 = vmul.f32 %v5005_v30, %v6147_v14  ;;  %v5007_v57 = vld [vmem:[%s6142_s27 + $0xd8] sm:$0xff] }
  0x69   : > { %5488 = vmatprep.mubr.msk.f32.mxu0 %vm1003_vm0, %v986_v47  ;;  %v964_v9 = vadd.f32 %v948_v25, %v911_v4  ;;  %v859_v42 = vadd.f32 %v843_v21, %v804_v36  ;;  %v844_v27 = vmul.f32 %v6212_v41, %v5006_v22  ;;  %5740 = vmatpush3.bf16.msra.mxu0 %v5737_v58  ;;  %v2266_v26 = vld [vmem:[%s8207_s12 + $0x18] sm:$0xff] }
  0x6a   : > { %v752_v6 = vadd.f32 %v736_v17, %v699_v16  ;;  %v897_v12 = vmul.f32 %v6225_v45, %v5024_v52  ;;  %v950_v40 = vmul.f32 %v6273_v1, %v5042_v54  ;;  %v645_v5 = vadd.f32 %v629_v18, %v592_v59  ;;  %v6738_v62 = vld [vmem:[%s6189_s24 + $0x19] sm:$0xff] }
  0x6b   : > { %v737_v35 = vmul.f32 %v5023_v48, %v6161_v23  ;;  %v987_v30 = vadd.f32 %v6332_v51, %v964_v9  ;;  %v912_v25 = vadd.f32 %v896_v19, %v859_v42  ;;  %v524_v21 = vmul.f32 %v6649_v43, %v6116_v7  ;;  %v2265_v19 = vld [vmem:[%s8207_s12 + $0x10] sm:$0xff]  ;;  %v6741_v20 = vld [vmem:[%s6189_s24 + $0x1a] sm:$0xff] }
  0x6c   : > { %v805_v49 = vadd.f32 %v789_v2, %v752_v6  ;;  %v700_v17 = vadd.f32 %v684_v50, %v645_v5  ;;  %v790_v39 = vmul.f32 %v5041_v46, %v6166_v24  ;;  %v577_v29 = vmul.f32 %v6658_v0, %v6121_v8  ;;  %v6733_v0 = vld [vmem:[%s6189_s24 + $0x18] sm:$0xff]  ;;  %v5008_v59 = vld [vmem:[%s6142_s27 + $0xe0] sm:$0xff] }
  0x6d   : > { %v630_v48 = vmul.f32 %v6663_v31, %v6129_v10  ;;  %5489 = vmatmul.mubr.msk.f32.gmra.mrb[10].mxu0 %vm1003_vm0, %v987_v30  ;;  %v965_v7 = vadd.f32 %v949_v33, %v912_v25  ;;  %v845_v2 = vmul.f32 %v6212_v41, %v5007_v57  ;;  %v898_v8 = vmul.f32 %v6225_v45, %v5025_v53  ;;  %v8284_v9 = vld [vmem:[#allocation2_spill] sm:$0xff] }
  0x6e   : > { %v860_v43 = vadd.f32 %v844_v27, %v805_v49  ;;  %v753_v10 = vadd.f32 %v737_v35, %v700_v17  ;;  %v951_v31 = vmul.f32 %v6273_v1, %v5043_v32  ;;  %v593_v47 = vadd.f32 %v577_v29, %v524_v21  ;;  %v5026_v6 = vld [vmem:[%s6142_s27 + $0xe1] sm:$0xff] }
  0x6f   : > { %v685_v58 = vmul.f32 %v5006_v22, %v6147_v14  ;;  %v988_v4 = vadd.f32 %v6332_v51, %v965_v7  ;;  %v738_v46 = vmul.f32 %v5024_v52, %v6161_v23  ;;  %v5741_v16 = vpack.c.bf16 %v2266_v26, %v2265_v19  ;;  %v6751_v22 = vld [vmem:[%s6189_s24 + $0x30] sm:$0xff]  ;;  %v8285_v23 = vld [vmem:[#allocation3_spill] sm:$0xff] }
  0x70   : > { %v913_v36 = vadd.f32 %v897_v12, %v860_v43  ;;  %v806_v18 = vadd.f32 %v790_v39, %v753_v10  ;;  %v646_v33 = vadd.f32 %v630_v48, %v593_v47  ;;  %v1963_v50 = vadd.f32 %v6434_v61, %v6431_v38  ;;  %v8286_v52 = vld [vmem:[#allocation4_spill] sm:$0xff]  ;;  %v5044_v61 = vld [vmem:[%s6142_s27 + $0xe2] sm:$0xff]  ;;  %s6007_s27 = smov 48  }
  0x71   : > { %v1220_v14 = vmul.f32 %v8284_v9, %v6733_v0  ;;  %5491 = vmatprep.mubr.msk.f32.mxu0 %vm1003_vm0, %v988_v4  ;;  %5742 = vmatprep.subr.bf16.mxu0 %v5741_v16  ;;  %v1273_v27 = vmul.f32 %v8285_v23, %v6738_v62  ;;  %v1326_v12 = vmul.f32 %v8286_v52, %v6741_v20  ;;  %v6779_v26 = vld [vmem:[%s6189_s24 + $0x48] sm:$0xff] }
  0x72   : > { %v966_v42 = vadd.f32 %v950_v40, %v913_v36  ;;  %v861_v5 = vadd.f32 %v845_v2, %v806_v18  ;;  %v701_v35 = vadd.f32 %v685_v58, %v646_v33  ;;  %v791_v38 = vmul.f32 %v5042_v54, %v6166_v24  ;;  %5744 = vmatpush3.bf16.msra.mxu0 %v5741_v16  ;;  %v6769_v54 = vld [vmem:[%s6189_s24 + $0x31] sm:$0xff]  ;;  %v6791_v43 = vld [vmem:[%s6189_s24 + $0x49] sm:$0xff] }
  0x73   : > { %v2000_v57 = vadd.f32 %v6437_v63, %v1963_v50  ;;  %v846_v40 = vmul.f32 %v6212_v41, %v5008_v59  ;;  %v1289_v30 = vadd.f32 %v1273_v27, %v1220_v14  ;;  %v1381_v25 = vmul.f32 %v6250_v56, %v6751_v22  ;;  %v8287_v41 = vld [vmem:[#allocation5_spill] sm:$0xff]  ;;  %v6802_v47 = vld [vmem:[%s6189_s24 + $0x4a] sm:$0xff]  ;;  %v8292_v14 = vld [vmem:[#allocation10_spill] sm:$0xff] }
  0x74   : > { %v989_v53 = vadd.f32 %v6332_v51, %v966_v42  ;;  %v914_v49 = vadd.f32 %v898_v8, %v861_v5  ;;  %v754_v32 = vadd.f32 %v738_v46, %v701_v35  ;;  %v899_v21 = vmul.f32 %v6225_v45, %v5026_v6  ;;  %v8288_v4 = vld [vmem:[#allocation7_spill] sm:$0xff]  ;;  %v8290_v18 = vld [vmem:[#allocation12_spill] sm:$0xff] }
  0x75   : > { %v2038_v24 = vadd.f32 %v6440_v55, %v2000_v57  ;;  %v952_v63 = vmul.f32 %v6273_v1, %v5044_v61  ;;  %v1342_v17 = vadd.f32 %v1326_v12, %v1289_v30  ;;  %v1434_v39 = vmul.f32 %v8287_v41, %v6769_v54  ;;  %v6786_v1 = vld [vmem:[%s8206_s11] ss:$0 sm:$0xff]  ;;  %v8291_v59 = vld [vmem:[#allocation15_spill] sm:$0xff] }
  0x76   : > { %5492 = vmatmul.mubr.msk.f32.gmra.mrb[12].mxu0 %vm1003_vm0, %v989_v53  ;;  %v1487_v29 = vmul.f32 %v6348_v3, %v6288_v11  ;;  %v967_v48 = vadd.f32 %v951_v31, %v914_v49  ;;  %v807_v19 = vadd.f32 %v791_v38, %v754_v32  ;;  %v1221_v55 = vmul.f32 %v6340_v60, %v8284_v9  ;;  %v8293_v38 = vld [vmem:[#allocation13_spill] sm:$0xff]  ;;  %v8294_v57 = vld [vmem:[#allocation11_spill] sm:$0xff] }
  0x77   : > { %v2075_v45 = vadd.f32 %v6443_v15, %v2038_v24  ;;  %v1397_v7 = vadd.f32 %v1381_v25, %v1342_v17  ;;  %v1542_v3 = vmul.f32 %v6308_v28, %v6779_v26  ;;  %v1274_v15 = vmul.f32 %v6354_v13, %v8285_v23  ;;  %v8289_v13 = vld [vmem:[#allocation8_spill] sm:$0xff]  ;;  %v6838_v24 = vld [vmem:[%s6189_s24 + $0x39] sm:$0xff] }
  0x78   : > { %v1327_v2 = vmul.f32 %v6375_v37, %v8286_v52  ;;  %v990_v60 = vadd.f32 %v6332_v51, %v967_v48  ;;  %v862_v8 = vadd.f32 %v846_v40, %v807_v19  ;;  %v1595_v31 = vmul.f32 %v6320_v34, %v6791_v43  ;;  %v6809_v37 = vld [vmem:[%s6189_s24 + $0x32] sm:$0xff]  ;;  %v8295_v17 = vld [vmem:[#allocation14_spill] sm:$0xff] }
  0x79   : > { %v2112_v10 = vadd.f32 %v6446_v44, %v2075_v45  ;;  %v1450_v58 = vadd.f32 %v1434_v39, %v1397_v7  ;;  %v1648_v36 = vmul.f32 %v8288_v4, %v6802_v47  ;;  %v1290_v46 = vadd.f32 %v1274_v15, %v1221_v55  ;;  %v6825_v40 = vld [vmem:[%s6189_s24 + $0x50] sm:$0xff]  ;;  %v6847_v48 = vld [vmem:[%s6189_s24 + $0x3a] sm:$0xff] }
  0x7a   : > { %v1382_v16 = vmul.f32 %v8289_v13, %v6250_v56  ;;  %5494 = vmatprep.mubr.msk.f32.mxu0 %vm1003_vm0, %v990_v60  ;;  %v915_v44 = vadd.f32 %v899_v21, %v862_v8  ;;  %v2248_v50 = vadd.f32 %v6786_v1, %v8291_v59  ;;  %v1435_v42 = vmul.f32 %v8292_v14, %v8287_v41  ;;  %v6830_v32 = vld [vmem:[%s6189_s24 + $0x51] sm:$0xff]  ;;  %v6861_v15 = vld [vmem:[%s8201_s6] ss:$0 sm:$0xff] }
  0x7b   : > { %v2150_v33 = vadd.f32 %v8290_v18, %v2112_v10  ;;  %v1503_v6 = vadd.f32 %v1487_v29, %v1450_v58  ;;  %v1343_v27 = vadd.f32 %v1327_v2, %v1290_v46  ;;  %v1222_v12 = vmul.f32 %v6751_v22, %v8284_v9  ;;  %v6835_v21 = vld [vmem:[%s6189_s24 + $0x38] sm:$0xff]  ;;  %v6878_v58 = vld [vmem:[%s8201_s6 + $0x2] ss:$0 sm:$0xff] }
  0x7c   : > { %v1275_v5 = vmul.f32 %v6769_v54, %v8285_v23  ;;  %v968_v35 = vadd.f32 %v952_v63, %v915_v44  ;;  %v1488_v53 = vmul.f32 %v8294_v57, %v6288_v11  ;;  %v1328_v30 = vmul.f32 %v8286_v52, %v6809_v37  ;;  %v6873_v10 = vld [vmem:[%s6189_s24 + $0x52] sm:$0xff] }
  0x7d   : > { %v2187_v61 = vadd.f32 %v8293_v38, %v2150_v33  ;;  %v1558_v25 = vadd.f32 %v1542_v3, %v1503_v6  ;;  %v1398_v49 = vadd.f32 %v1382_v16, %v1343_v27  ;;  %v1383_v23 = vmul.f32 %v6779_v26, %v6250_v56  ;;  %v6856_v3 = vld [vmem:[%s6189_s24 + $0x60] sm:$0xff]  ;;  %v8296_v18 = vld [vmem:[#allocation9_spill] sm:$0xff]  ;;  %v6899_v27 = vld [vmem:[%s6189_s24 + $0x68] sm:$0xff] }
  0x7e   : > { %v1291_v9 = vadd.f32 %v1275_v5, %v1222_v12  ;;  %v991_v63 = vadd.f32 %v6332_v51, %v968_v35  ;;  %v1543_v52 = vmul.f32 %v6308_v28, %v6825_v40  ;;  %v1596_v29 = vmul.f32 %v6320_v34, %v6830_v32  ;;  %v6896_v6 = vld [vmem:[%s6189_s24 + $0x61] sm:$0xff] }
  0x7f   : > { %v2224_v39 = vadd.f32 %v8295_v17, %v2187_v61  ;;  %v1611_v19 = vadd.f32 %v1595_v31, %v1558_v25  ;;  %v1451_v45 = vadd.f32 %v1435_v42, %v1398_v49  ;;  %v1436_v55 = vmul.f32 %v6791_v43, %v8287_v41  ;;  %v6868_v41 = vld [vmem:[%s8201_s6 + $0x1] ss:$0 sm:$0xff]  ;;  %v6907_v35 = vld [vmem:[%s8201_s6 + $0x5] ss:$0 sm:$0xff] }
  0x80   : > { %v1344_v56 = vadd.f32 %v1328_v30, %v1291_v9  ;;  %5495 = vmatmul.mubr.msk.f32.gmra.mrb[14].mxu0 %vm1003_vm0, %v991_v63  ;;  %v1489_v7 = vmul.f32 %v6802_v47, %v6288_v11  ;;  %v1223_v2 = vmul.f32 %v6861_v15, %v6835_v21  ;;  %v1276_v60 = vmul.f32 %v6868_v41, %v6838_v24 }
  0x81   : > { %v2247_v51 = vadd.f32 %v6786_v1, %v2224_v39  ;;  %v1664_v11 = vadd.f32 %v1648_v36, %v1611_v19  ;;  %v1504_v8 = vadd.f32 %v1488_v53, %v1451_v45  ;;  %v1329_v46 = vmul.f32 %v6878_v58, %v6847_v48  ;;  %v6888_v36 = vld [vmem:[%s8201_s6 + $0x4] ss:$0 sm:$0xff] }
  0x82   : > { %v1399_v31 = vadd.f32 %v1383_v23, %v1344_v56  ;;  %v1649_v13 = vmul.f32 %v8288_v4, %v6873_v10  ;;  %v1292_v16 = vadd.f32 %v1276_v60, %v1223_v2  ;;  %v1384_v44 = vmul.f32 %v6888_v36, %v6825_v40  ;;  %v6915_v53 = vld [vmem:[%s6189_s24 + $0x62] sm:$0xff]  ;;  %v6945_v60 = vld [vmem:[%s6189_s24 + $0x6a] sm:$0xff] }
  0x83   : > { %5537 = vmatprep.mubr.msk.f32.mxu0 %vm1003_vm0, %v2247_v51  ;;  %v1687_v33 = vadd.f32 %v8296_v18, %v1664_v11  ;;  %v1559_v59 = vadd.f32 %v1543_v52, %v1504_v8  ;;  %v1544_v42 = vmul.f32 %v6308_v28, %v6856_v3  ;;  %v1597_v12 = vmul.f32 %v6320_v34, %v6896_v6  ;;  %v6926_v23 = vld [vmem:[%s8201_s6 + $0x6] ss:$0 sm:$0xff] }
  0x84   : > { %v1452_v14 = vadd.f32 %v1436_v55, %v1399_v31  ;;  %5538 = vmatmul.mubr.msk.f32.vlgmr.msra.gmra.mrb[16].mxu0 %vm1003_vm0, %v2248_v50  ;;  %v1345_v5 = vadd.f32 %v1329_v46, %v1292_v16  ;;  %v1437_v38 = vmul.f32 %v6907_v35, %v6830_v32  ;;  %v1224_v61 = vmul.f32 %v6861_v15, %v6779_v26 }
  0x85   : > { %5508 = vmatprep.mubr.msk.f32.mxu1 %vm1003_vm0, %v1687_v33  ;;  %v1612_v57 = vadd.f32 %v1596_v29, %v1559_v59  ;;  %v1277_v30 = vmul.f32 %v6868_v41, %v6791_v43  ;;  %v1330_v25 = vmul.f32 %v6878_v58, %v6802_v47  ;;  %v1650_v49 = vmul.f32 %v8288_v4, %v6915_v53  ;;  %v6933_v29 = vld [vmem:[%s6189_s24 + $0x69] sm:$0xff]  ;;  %v6957_v33 = vld [vmem:[%s6189_s24 + $0x78] sm:$0xff] }
  0x86   : > { %v1505_v50 = vadd.f32 %v1489_v7, %v1452_v14  ;;  %v1400_v9 = vadd.f32 %v1384_v44, %v1345_v5  ;;  %v1490_v63 = vmul.f32 %v6926_v23, %v6873_v10  ;;  %v1545_v17 = vmul.f32 %v6308_v28, %v6899_v27  ;;  %v6960_v59 = vld [vmem:[%s6189_s24 + $0x79] sm:$0xff] }
  0x87   : > { %v1665_v39 = vadd.f32 %v1649_v13, %v1612_v57  ;;  %v1293_v19 = vadd.f32 %v1277_v30, %v1224_v61  ;;  %v1385_v45 = vmul.f32 %v6888_v36, %v6856_v3  ;;  %v1598_v55 = vmul.f32 %v6320_v34, %v6933_v29  ;;  %8297 = vst [vmem:[#allocation6_spill] sm:$0xff] %v6960_v59 }
  0x88   : > { %v1560_v52 = vadd.f32 %v1544_v42, %v1505_v50  ;;  %v1453_v56 = vadd.f32 %v1437_v38, %v1400_v9  ;;  %v1438_v51 = vmul.f32 %v6907_v35, %v6896_v6  ;;  %v1225_v28 = vmul.f32 %v6861_v15, %v6825_v40  ;;  %v6974_v38 = vld [vmem:[%s8201_s6 + $0x9] ss:$0 sm:$0xff] }
  0x89   : > { %v1688_v7 = vadd.f32 %v8296_v18, %v1665_v39  ;;  %v1346_v11 = vadd.f32 %v1330_v25, %v1293_v19  ;;  %v1278_v8 = vmul.f32 %v6868_v41, %v6830_v32  ;;  %v1651_v34 = vmul.f32 %v8288_v4, %v6945_v60  ;;  %v6982_v25 = vld [vmem:[%s6189_s24 + $0x7a] sm:$0xff] }
  0x8a   : > { %v1613_v2 = vadd.f32 %v1597_v12, %v1560_v52  ;;  %v1506_v31 = vadd.f32 %v1490_v63, %v1453_v56  ;;  %v1491_v46 = vmul.f32 %v6926_v23, %v6915_v53  ;;  %v1331_v13 = vmul.f32 %v6878_v58, %v6873_v10  ;;  %v6967_v12 = vld [vmem:[%s8201_s6 + $0x8] ss:$0 sm:$0xff]  ;;  %8298 = vst [vmem:[#allocation2_spill] sm:$0xff] %v6982_v25  ;;  %v6994_v52 = vld [vmem:[%s6189_s24 + $0x80] sm:$0xff] }
  0x8b   : > { %5509 = vmatmul.mubr.msk.f32.gmra.mrb[2].mxu1 %vm1003_vm0, %v1688_v7  ;;  %v1401_v44 = vadd.f32 %v1385_v45, %v1346_v11  ;;  %v1294_v14 = vadd.f32 %v1278_v8, %v1225_v28  ;;  %v1386_v4 = vmul.f32 %v6888_v36, %v6899_v27  ;;  %v1546_v5 = vmul.f32 %v6967_v12, %v6957_v33  ;;  %v7006_v28 = vld [vmem:[%s6189_s24 + $0x81] sm:$0xff] }
  0x8c   : > { %v1666_v16 = vadd.f32 %v1650_v49, %v1613_v2  ;;  %v1561_v42 = vadd.f32 %v1545_v17, %v1506_v31  ;;  %v1599_v61 = vmul.f32 %v6974_v38, %v6960_v59  ;;  %v1439_v57 = vmul.f32 %v6907_v35, %v6933_v29  ;;  %v6989_v17 = vld [vmem:[%s8201_s6 + $0xa] ss:$0 sm:$0xff]  ;;  %8299 = vst [vmem:[#allocation3_spill] sm:$0xff] %v6994_v52 }
  0x8d   : > { %v1454_v30 = vadd.f32 %v1438_v51, %v1401_v44  ;;  %v1347_v49 = vadd.f32 %v1331_v13, %v1294_v14  ;;  %v1226_v9 = vmul.f32 %v6861_v15, %v6856_v3  ;;  %v1652_v39 = vmul.f32 %v6989_v17, %v6982_v25  ;;  %8300 = vst [vmem:[#allocation4_spill] sm:$0xff] %v7006_v28  ;;  %v7023_v14 = vld [vmem:[%s6189_s24 + $0x82] sm:$0xff] }
  0x8e   : > { %v1689_v50 = vadd.f32 %v8296_v18, %v1666_v16  ;;  %v1614_v63 = vadd.f32 %v1598_v55, %v1561_v42  ;;  %v1279_v18 = vmul.f32 %v6868_v41, %v6896_v6  ;;  %v1332_v19 = vmul.f32 %v6878_v58, %v6915_v53  ;;  %8301 = vst [vmem:[#allocation5_spill] sm:$0xff] %v7023_v14 }
  0x8f   : > { %v1507_v45 = vadd.f32 %v1491_v46, %v1454_v30  ;;  %v1402_v56 = vadd.f32 %v1386_v4, %v1347_v49  ;;  %v1492_v55 = vmul.f32 %v6926_v23, %v6945_v60  ;;  %v1547_v51 = vmul.f32 %v6967_v12, %v6994_v52 }
  0x90   : > { %5511 = vmatprep.mubr.msk.f32.mxu1 %vm1003_vm0, %v1689_v50  ;;  %v1667_v7 = vadd.f32 %v1651_v34, %v1614_v63  ;;  %v1600_v2 = vmul.f32 %v6974_v38, %v7006_v28  ;;  %v1295_v11 = vadd.f32 %v1279_v18, %v1226_v9  ;;  %v1387_v8 = vmul.f32 %v6888_v36, %v6957_v33  ;;  %v7019_v34 = vld [vmem:[%s8202_s7] ss:$0 sm:$0xff]  ;;  %v7034_v9 = vld [vmem:[%s6189_s24 + $0x90] sm:$0xff] }
  0x91   : > { %v1562_v31 = vadd.f32 %v1546_v5, %v1507_v45  ;;  %v1455_v46 = vadd.f32 %v1439_v57, %v1402_v56  ;;  %v1440_v13 = vmul.f32 %v6907_v35, %v6960_v59  ;;  %v1227_v16 = vmul.f32 %v6861_v15, %v6899_v27 }
  0x92   : > { %v1690_v44 = vadd.f32 %v7019_v34, %v1667_v7  ;;  %v1348_v4 = vadd.f32 %v1332_v19, %v1295_v11  ;;  %v1280_v42 = vmul.f32 %v6868_v41, %v6933_v29  ;;  %v1333_v5 = vmul.f32 %v6878_v58, %v6945_v60  ;;  %v7040_v19 = vld [vmem:[%s6189_s24 + $0x91] sm:$0xff] }
  0x93   : > { %v1615_v57 = vadd.f32 %v1599_v61, %v1562_v31  ;;  %v1508_v50 = vadd.f32 %v1492_v55, %v1455_v46  ;;  %v1653_v30 = vmul.f32 %v6989_v17, %v7023_v14  ;;  %v1493_v49 = vmul.f32 %v6926_v23, %v6982_v25  ;;  %8302 = vst [vmem:[#allocation7_spill] sm:$0xff] %v7040_v19 }
  0x94   : > { %5512 = vmatmul.mubr.msk.f32.gmra.mrb[4].mxu1 %vm1003_vm0, %v1690_v44  ;;  %v1403_v63 = vadd.f32 %v1387_v8, %v1348_v4  ;;  %v1548_v18 = vmul.f32 %v6967_v12, %v7034_v9  ;;  %v1296_v45 = vadd.f32 %v1280_v42, %v1227_v16  ;;  %v1388_v61 = vmul.f32 %v6888_v36, %v6994_v52 }
  0x95   : > { %v1668_v56 = vadd.f32 %v1652_v39, %v1615_v57  ;;  %v1563_v55 = vadd.f32 %v1547_v51, %v1508_v50  ;;  %v1601_v7 = vmul.f32 %v6974_v38, %v7040_v19  ;;  %v1441_v11 = vmul.f32 %v6907_v35, %v7006_v28  ;;  %v7058_v57 = vld [vmem:[%s6189_s24 + $0x92] sm:$0xff] }
  0x96   : > { %v1456_v8 = vadd.f32 %v1440_v13, %v1403_v63  ;;  %v1349_v31 = vadd.f32 %v1333_v5, %v1296_v45  ;;  %v1228_v46 = vmul.f32 %v6861_v15, %v6957_v33  ;;  %v1281_v16 = vmul.f32 %v6868_v41, %v6960_v59  ;;  %8303 = vst [vmem:[#allocation8_spill] sm:$0xff] %v7058_v57  ;;  %v7061_v5 = vld [vmem:[%s6189_s24 + $0x98] sm:$0xff] }
  0x97   : > { %v1691_v44 = vadd.f32 %v7019_v34, %v1668_v56  ;;  %v1616_v4 = vadd.f32 %v1600_v2, %v1563_v55  ;;  %v1494_v39 = vmul.f32 %v6926_v23, %v7023_v14  ;;  %v1334_v51 = vmul.f32 %v6878_v58, %v6982_v25  ;;  %8304 = vst [vmem:[#allocation12_spill] sm:$0xff] %v7061_v5  ;;  %v7064_v50 = vld [vmem:[%s6189_s24 + $0x99] sm:$0xff] }
  0x98   : > { %v1509_v42 = vadd.f32 %v1493_v49, %v1456_v8  ;;  %v1404_v13 = vadd.f32 %v1388_v61, %v1349_v31  ;;  %8305 = vst [vmem:[#allocation15_spill] sm:$0xff] %v7064_v50  ;;  %v1297_v63 = vadd.f32 %v1281_v16, %v1228_v46  ;;  %v1389_v45 = vmul.f32 %v6888_v36, %v7034_v9 }
  0x99   : > { %5514 = vmatprep.mubr.msk.f32.mxu1 %vm1003_vm0, %v1691_v44  ;;  %v1669_v2 = vadd.f32 %v1653_v30, %v1616_v4  ;;  %v1654_v56 = vmul.f32 %v6989_v17, %v7058_v57  ;;  %v1549_v49 = vmul.f32 %v6967_v12, %v7061_v5  ;;  %v1602_v61 = vmul.f32 %v6974_v38, %v7064_v50 }
  0x9a   : > { %v1564_v55 = vadd.f32 %v1548_v18, %v1509_v42  ;;  %v1457_v8 = vadd.f32 %v1441_v11, %v1404_v13  ;;  %v1350_v31 = vadd.f32 %v1334_v51, %v1297_v63  ;;  %v1442_v46 = vmul.f32 %v6907_v35, %v7040_v19  ;;  %v7085_v18 = vld [vmem:[%s6189_s24 + $0x9a] sm:$0xff]  ;;  %v7090_v42 = vld [vmem:[%s6189_s24 + $0xa8] sm:$0xff] }
  0x9b   : > { %v1692_v16 = vadd.f32 %v7019_v34, %v1669_v2  ;;  %v1229_v30 = vmul.f32 %v6861_v15, %v6994_v52  ;;  %v1282_v44 = vmul.f32 %v6868_v41, %v7006_v28  ;;  %v1335_v4 = vmul.f32 %v6878_v58, %v7023_v14  ;;  %8306 = vst [vmem:[#allocation10_spill] sm:$0xff] %v7085_v18  ;;  %v7098_v2 = vld [vmem:[%s6189_s24 + $0xa9] sm:$0xff] }
  0x9c   : > { %v1617_v25 = vadd.f32 %v1601_v7, %v1564_v55  ;;  %v1510_v59 = vadd.f32 %v1494_v39, %v1457_v8  ;;  %v1405_v11 = vadd.f32 %v1389_v45, %v1350_v31  ;;  %v1495_v51 = vmul.f32 %v6926_v23, %v7058_v57  ;;  %8307 = vst [vmem:[#allocation13_spill] sm:$0xff] %v7090_v42 }
  0x9d   : > { %5515 = vmatmul.mubr.msk.f32.gmra.mrb[6].mxu1 %vm1003_vm0, %v1692_v16  ;;  %v1655_v13 = vmul.f32 %v6989_v17, %v7085_v18  ;;  %v1550_v63 = vmul.f32 %v6967_v12, %v7090_v42  ;;  %8308 = vst [vmem:[#allocation11_spill] sm:$0xff] %v7098_v2  ;;  %v1298_v7 = vadd.f32 %v1282_v44, %v1229_v30 }
  0x9e   : > { %v1390_v39 = vmul.f32 %v6888_v36, %v7061_v5  ;;  %v1670_v45 = vadd.f32 %v1654_v56, %v1617_v25  ;;  %v1565_v55 = vadd.f32 %v1549_v49, %v1510_v59  ;;  %v1458_v8 = vadd.f32 %v1442_v46, %v1405_v11  ;;  %v7114_v56 = vld [vmem:[%s6189_s24 + $0xaa] sm:$0xff] }
  0x9f   : > { %v1603_v31 = vmul.f32 %v6974_v38, %v7098_v2  ;;  %v1351_v16 = vadd.f32 %v1335_v4, %v1298_v7  ;;  %v1443_v14 = vmul.f32 %v6907_v35, %v7064_v50  ;;  %v1230_v28 = vmul.f32 %v6861_v15, %v7034_v9  ;;  %8309 = vst [vmem:[#allocation14_spill] sm:$0xff] %v7114_v56  ;;  %v7119_v4 = vld [vmem:[%s6189_s24 + $0xb0] sm:$0xff] }
  0xa0   : > { %v1283_v30 = vmul.f32 %v6868_v41, %v7040_v19  ;;  %v1693_v44 = vadd.f32 %v7019_v34, %v1670_v45  ;;  %v1618_v52 = vadd.f32 %v1602_v61, %v1565_v55  ;;  %v1511_v25 = vadd.f32 %v1495_v51, %v1458_v8  ;;  %v7129_v55 = vld [vmem:[%s6189_s24 + $0xb1] sm:$0xff] }
  0xa1   : > { %v1336_v59 = vmul.f32 %v6878_v58, %v7058_v57  ;;  %v1406_v49 = vadd.f32 %v1390_v39, %v1351_v16  ;;  %v1496_v46 = vmul.f32 %v6926_v23, %v7085_v18  ;;  %v1391_v7 = vmul.f32 %v6888_v36, %v7090_v42 }
  0xa2   : > { %v1299_v11 = vadd.f32 %v1283_v30, %v1230_v28  ;;  %5517 = vmatprep.mubr.msk.f32.mxu1 %vm1003_vm0, %v1693_v44  ;;  %v1671_v61 = vadd.f32 %v1655_v13, %v1618_v52  ;;  %v1566_v51 = vadd.f32 %v1550_v63, %v1511_v25  ;;  %v1656_v45 = vmul.f32 %v6989_v17, %v7114_v56 }
  0xa3   : > { %v1551_v39 = vmul.f32 %v6967_v12, %v7119_v4  ;;  %v1459_v8 = vadd.f32 %v1443_v14, %v1406_v49  ;;  %v1604_v28 = vmul.f32 %v6974_v38, %v7129_v55  ;;  %v1444_v30 = vmul.f32 %v6907_v35, %v7098_v2  ;;  %v7141_v14 = vld [vmem:[%s6189_s24 + $0xb2] sm:$0xff] }
  0xa4   : > { %v1352_v16 = vadd.f32 %v1336_v59, %v1299_v11  ;;  %v1694_v52 = vadd.f32 %v7019_v34, %v1671_v61  ;;  %v1619_v13 = vadd.f32 %v1603_v31, %v1566_v51  ;;  %v1231_v63 = vmul.f32 %v6861_v15, %v7061_v5  ;;  %v7151_v61 = vld [vmem:[%s6189_s24 + $0xc0] sm:$0xff] }
  0xa5   : > { %v1284_v44 = vmul.f32 %v6868_v41, %v7064_v50  ;;  %v1512_v25 = vadd.f32 %v1496_v46, %v1459_v8  ;;  %v1497_v57 = vmul.f32 %v6926_v23, %v7114_v56  ;;  %v1337_v59 = vmul.f32 %v6878_v58, %v7085_v18  ;;  %8310 = vst [vmem:[#allocation9_spill] sm:$0xff] %v7151_v61  ;;  %v7154_v51 = vld [vmem:[%s6189_s24 + $0xc1] sm:$0xff] }
  0xa6   : > { %v1407_v49 = vadd.f32 %v1391_v7, %v1352_v16  ;;  %5518 = vmatmul.mubr.msk.f32.gmra.mrb[8].mxu1 %vm1003_vm0, %v1694_v52  ;;  %v1672_v11 = vadd.f32 %v1656_v45, %v1619_v13  ;;  %v1657_v31 = vmul.f32 %v6989_v17, %v7141_v14  ;;  %v1392_v7 = vmul.f32 %v6888_v36, %v7119_v4 }
  0xa7   : > { %v1300_v46 = vadd.f32 %v1284_v44, %v1231_v63  ;;  %v1567_v8 = vadd.f32 %v1551_v39, %v1512_v25  ;;  %v1552_v18 = vmul.f32 %v6967_v12, %v7151_v61  ;;  %v1605_v45 = vmul.f32 %v6974_v38, %v7154_v51 }
  0xa8   : > { %v1460_v16 = vadd.f32 %v1444_v30, %v1407_v49  ;;  %v1695_v52 = vadd.f32 %v7019_v34, %v1672_v11  ;;  %v1445_v50 = vmul.f32 %v6907_v35, %v7129_v55  ;;  %v1232_v63 = vmul.f32 %v6861_v15, %v7090_v42  ;;  %v7168_v30 = vld [vmem:[%s6189_s24 + $0xc2] sm:$0xff] }
  0xa9   : > { %v1353_v13 = vadd.f32 %v1337_v59, %v1300_v46  ;;  %v1620_v44 = vadd.f32 %v1604_v28, %v1567_v8  ;;  %v1285_v25 = vmul.f32 %v6868_v41, %v7098_v2  ;;  %v1338_v49 = vmul.f32 %v6878_v58, %v7114_v56  ;;  %v7188_v56 = vld [vmem:[%s6189_s24 + $0xc9] sm:$0xff] }
  0xaa   : > { %v1513_v39 = vadd.f32 %v1497_v57, %v1460_v16  ;;  %5520 = vmatprep.mubr.msk.f32.mxu1 %vm1003_vm0, %v1695_v52  ;;  %v1658_v59 = vmul.f32 %v6989_v17, %v7168_v30  ;;  %v1498_v46 = vmul.f32 %v6926_v23, %v7141_v14  ;;  %v7182_v57 = vld [vmem:[%s8200_s5] ss:$0 sm:$0xff]  ;;  %v7185_v16 = vld [vmem:[%s6189_s24 + $0xc8] sm:$0xff]  ;;  %v1393_v2 = vmul.f32 %v6888_v36, %v7151_v61  ;;  %v7203_v61 = vld [vmem:[%s6189_s24 + $0xd8] sm:$0xff] }
  0xab   : > { %v1408_v11 = vadd.f32 %v1392_v7, %v1353_v13  ;;  %v1673_v28 = vadd.f32 %v1657_v31, %v1620_v44  ;;  %v1301_v52 = vadd.f32 %v1285_v25, %v1232_v63  ;;  %v1553_v42 = vmul.f32 %v6967_v12, %v7185_v16 }
  0xac   : > { %v1568_v8 = vadd.f32 %v1552_v18, %v1513_v39  ;;  %v1606_v5 = vmul.f32 %v6974_v38, %v7188_v56  ;;  %v1233_v18 = vmul.f32 %v6861_v15, %v7119_v4  ;;  %v1446_v25 = vmul.f32 %v6907_v35, %v7154_v51 }
  0xad   : > { %v1461_v13 = vadd.f32 %v1445_v50, %v1408_v11  ;;  %v1696_v44 = vadd.f32 %v7019_v34, %v1673_v28  ;;  %v1354_v63 = vadd.f32 %v1338_v49, %v1301_v52  ;;  %v1286_v19 = vmul.f32 %v6868_v41, %v7129_v55  ;;  %v7211_v28 = vld [vmem:[%s6189_s24 + $0xca] sm:$0xff]  ;;  %v7218_v41 = vld [vmem:[%s6189_s24 + $0xd9] sm:$0xff] }
  0xae   : > { %v1621_v39 = vadd.f32 %v1605_v45, %v1568_v8  ;;  %v1339_v15 = vmul.f32 %v6878_v58, %v7141_v14  ;;  %v1499_v8 = vmul.f32 %v6926_v23, %v7168_v30  ;;  %v1659_v52 = vmul.f32 %v6989_v17, %v7211_v28 }
  0xaf   : > { %v1514_v11 = vadd.f32 %v1498_v46, %v1461_v13  ;;  %5521 = vmatmul.mubr.msk.f32.gmra.mrb[10].mxu1 %vm1003_vm0, %v1696_v44  ;;  %v1409_v49 = vadd.f32 %v1393_v2, %v1354_v63  ;;  %v1302_v13 = vadd.f32 %v1286_v19, %v1233_v18  ;;  %v1394_v58 = vmul.f32 %v6888_v36, %v7185_v16  ;;  %v7235_v18 = vld [vmem:[%s6189_s24 + $0xe0] sm:$0xff] }
  0xb0   : > { %v1674_v45 = vadd.f32 %v1658_v59, %v1621_v39  ;;  %v1554_v2 = vmul.f32 %v6967_v12, %v7203_v61  ;;  %v7227_v39 = vld [vmem:[%s6189_s24 + $0xda] sm:$0xff]  ;;  %v1607_v19 = vmul.f32 %v6974_v38, %v7218_v41 }
  0xb1   : > { %v1569_v46 = vadd.f32 %v1553_v42, %v1514_v11  ;;  %v1355_v63 = vadd.f32 %v1339_v15, %v1302_v13  ;;  %v1660_v15 = vmul.f32 %v6989_v17, %v7227_v39  ;;  %v7253_v13 = vld [vmem:[%s6189_s24 + $0xe2] sm:$0xff] }
  0xb2   : > { %v1697_v59 = vadd.f32 %v7019_v34, %v1674_v45  ;;  %v7247_v45 = vld [vmem:[%s8204_s9] ss:$0 sm:$0xff] }
  0xb3   : > { %v1622_v42 = vadd.f32 %v1606_v5, %v1569_v46  ;;  %v1410_v11 = vadd.f32 %v1394_v58, %v1355_v63  ;;  %v1500_v5 = vmul.f32 %v6926_v23, %v7211_v28  ;;  %v1555_v46 = vmul.f32 %v6967_v12, %v7235_v18 }
  0xb4   : > { %5523 = vmatprep.mubr.msk.f32.mxu1 %vm1003_vm0, %v1697_v59  ;;  %v1661_v12 = vmul.f32 %v6989_v17, %v7253_v13 }
  0xfd   : > { %v5475_v7 = vpop.f32.mrb[0].mxu0 }
  0xfe   : > { %v1118_v31 = vpop.f32.mrb[1].mxu0  ;;  %v1124_v44 = vadd.f32 %v5475_v7, %v7182_v57 }
  0xff   : > { %v1119_v50 = vadd.f32 %v7182_v57, %v1118_v31  ;;  %v1462_v31 = vadd.f32 %v1446_v25, %v1409_v49  ;;  %v1675_v25 = vadd.f32 %v1659_v52, %v1622_v42 }
 0x101   : > { %2467 = vxpose.xlu0.b32.start [1/2] (short) (narrow) %v1119_v50, 32  ;;  %v1447_v50 = vmul.f32 %v6907_v35, %v7188_v56  ;;  %v1515_v36 = vadd.f32 %v1499_v8, %v1462_v31  ;;  %v7242_v35 = vld [vmem:[%s6189_s24 + $0xe1] sm:$0xff]  ;;  %v1698_v49 = vadd.f32 %v7019_v34, %v1675_v25 }
 0x102   : > { %v1608_v59 = vmul.f32 %v6974_v38, %v7242_v35 }
 0x103   : > { %v1570_v7 = vadd.f32 %v1554_v2, %v1515_v36  ;;  %v1463_v8 = vadd.f32 %v1447_v50, %v1410_v11  ;;  %5524 = vmatmul.mubr.msk.f32.gmra.mrb[12].mxu1 %vm1003_vm0, %v1698_v49 }
 0x105   : > { %2468 = vxpose.xlu0.b32.end [2/2] (short) (narrow) %v1124_v44, 32  ;;  %v1623_v52 = vadd.f32 %v1607_v19, %v1570_v7  ;;  %v1516_v58 = vadd.f32 %v1500_v5, %v1463_v8 }
 0x107   : > { %v1676_v44 = vadd.f32 %v1660_v15, %v1623_v52  ;;  %v1571_v63 = vadd.f32 %v1555_v46, %v1516_v58 }
 0x109   : > { %v1699_v50 = vadd.f32 %v7019_v34, %v1676_v44  ;;  %v1624_v19 = vadd.f32 %v1608_v59, %v1571_v63 }
 0x10a   : > { %v5507_v23 = vpop.f32.mrb[0].mxu1 }
 0x10b   : > { %v1832_v31 = vadd.f32 %v5507_v23, %v7247_v45  ;;  %v1826_v2 = vpop.f32.mrb[1].mxu1  ;;  %5526 = vmatprep.mubr.msk.f32.mxu1 %vm1003_vm0, %v1699_v50  ;;  %v1677_v25 = vadd.f32 %v1661_v12, %v1624_v19  ;;  %v7301_v12 = vld [vmem:[%s8208_s13] ss:$0 sm:$0xff] }
 0x10c   : > { %v1827_v42 = vadd.f32 %v7247_v45, %v1826_v2  ;;  %8321 = vst [vmem:[#allocation26_spill] sm:$0xff] %v7301_v12 }
 0x10d   : > { %v1700_v38 = vadd.f32 %v7019_v34, %v1677_v25 }
 0x10e   : > { %v5745_v36 = vpack.c.bf16 %v1832_v31, %v1827_v42 }
 0x10f   : > { %5527 = vmatmul.mubr.msk.f32.gmra.mrb[14].mxu1 %vm1003_vm0, %v1700_v38  ;;  %v8322_v38 = vmov 0 }
 0x110   : > { %5746 = vmatprep.subr.bf16.mxu1 %v5745_v36  ;;  %v8323_v38 = vsel %vm7307_vm2, 4294967295, %v8322_v38 }
 0x111   : > { %5748 = vmatpush3.bf16.msra.mxu1 %v5745_v36  ;;  %8324 = vst [vmem:[#allocation27_spill] sm:$0xff] %v8323_v38 }
 0x11f   : > { %v7266_v11 = vpop.f32.mrb[2].mxu0 }
 0x120   : > { %8311 = vst [vmem:[#allocation16_spill] sm:$0xff] %v7266_v11  ;;  %v7268_v5 = vpop.f32.mrb[3].mxu0  ;;  %v7406_v11 = vld [vmem:[%s8205_s10 + $0x5] ss:$0 sm:$0xff] }
 0x121   : > { %8312 = vst [vmem:[#allocation17_spill] sm:$0xff] %v7268_v5  ;;  %v5989_v5 = vld [vmem:[%s6189_s24 + $0x39] sm:$0xff] }
 0x125   : > { %v7270_v7 = vpop.f32.mrb[4].mxu0 }
 0x126   : > { %v7272_v17 = vpop.f32.mrb[5].mxu0 }
 0x12d   : > { %v7274_v15 = vpop.f32.mrb[6].mxu0 }
 0x12e   : > { %8313 = vst [vmem:[#allocation18_spill] sm:$0xff] %v7274_v15  ;;  %v7276_v49 = vpop.f32.mrb[7].mxu0 }
 0x12f   : > { %8314 = vst [vmem:[#allocation19_spill] sm:$0xff] %v7276_v49 }
 0x137   : > { %v7280_v34 = vpop.f32.mrb[8].mxu0 }
 0x138   : > { %8315 = vst [vmem:[#allocation20_spill] sm:$0xff] %v7280_v34  ;;  %v7282_v23 = vpop.f32.mrb[9].mxu0 }
 0x139   : > { %8316 = vst [vmem:[#allocation21_spill] sm:$0xff] %v7282_v23 }
 0x140   : > { %v7286_v59 = vpop.f32.mrb[10].mxu0 }
 0x141   : > { %8317 = vst [vmem:[#allocation22_spill] sm:$0xff] %v7286_v59  ;;  %v7288_v31 = vpop.f32.mrb[11].mxu0 }
 0x142   : > { %8318 = vst [vmem:[#allocation23_spill] sm:$0xff] %v7288_v31 }
 0x149   : > { %v7290_v2 = vpop.f32.mrb[12].mxu0 }
 0x14a   : > { %v7292_v44 = vpop.f32.mrb[13].mxu0 }
 0x153   : > { %v7294_v42 = vpop.f32.mrb[14].mxu0 }
 0x154   : > { %8319 = vst [vmem:[#allocation24_spill] sm:$0xff] %v7294_v42  ;;  %v7296_v63 = vpop.f32.mrb[15].mxu0 }
 0x155   : > { %8320 = vst [vmem:[#allocation25_spill] sm:$0xff] %v7296_v63 }
 0x157   : > { %v5539_v50 = vpop.f32.mrb[16].mxu0 }
 0x158   : > { %v2394_v36 = vadd.f32 %v5539_v50, %v7301_v12  ;;  %v2388_v19 = vpop.f32.mrb[17].mxu0 }
 0x159   : > { %v2389_v25 = vadd.f32 %v7301_v12, %v2388_v19 }
 0x181   : > { %v2483_v8 = vpop.trf.xlu0 }
 0x182   : > { %5565 = vmatprep.mubr.msk.f32.mxu1 %vm2499_vm1, %v2483_v8  ;;  %v5749_v8 = vpack.c.bf16 %v2394_v36, %v2389_v25 }
 0x184   : > { %5751 = vmatprep.subr.msk.bf16.mxu1 %vm7307_vm2, %v5749_v8 }
 0x185   : > { %v2484_v46 = vpop.trf.xlu0 }
 0x186   : > { %5566 = vmatmul.mubr.msk.f32.vlgmr.msra.gmra.mrb[16].mxu1 %vm2499_vm1, %v2484_v46  ;;  %v5510_v46 = vpop.f32.mrb[2].mxu1 }
 0x187   : > { %5754 = vmatpush3.bf16.xpose.msk.msra.mxu1 %vm7307_vm2, %v5749_v8 }
 0x189   : > { %v2485_v52 = vpop.trf.xlu0 }
 0x18a   : > { %5568 = vmatprep.mubr.msk.f32.mxu1 %vm2499_vm1, %v2485_v52  ;;  %v1842_v52 = vadd.f32 %v5510_v46, %v7247_v45 }
 0x18d   : > { %v2486_v58 = vpop.trf.xlu0 }
 0x18e   : > { %5569 = vmatmul.mubr.msk.f32.gmra.mrb[18].mxu1 %vm2499_vm1, %v2486_v58  ;;  %v1836_v58 = vpop.f32.mrb[3].mxu1 }
 0x18f   : > { %v1837_v50 = vadd.f32 %v7247_v45, %v1836_v58  ;;  %v5513_v12 = vpop.f32.mrb[4].mxu1 }
 0x190   : > { %v1852_v42 = vadd.f32 %v5513_v12, %v7247_v45  ;;  %v1846_v36 = vpop.f32.mrb[5].mxu1 }
 0x191   : > { %v7317_v19 = vpack.c.bf16 %v1842_v52, %v1837_v50  ;;  %v1847_v25 = vadd.f32 %v7247_v45, %v1846_v36  ;;  %v5516_v38 = vpop.f32.mrb[6].mxu1 }
 0x192   : > { %v1862_v8 = vadd.f32 %v5516_v38, %v7247_v45  ;;  %v1856_v46 = vpop.f32.mrb[7].mxu1 }
 0x193   : > { %8325 = vst [vmem:[#allocation28_spill] sm:$0xff] %v7317_v19  ;;  %5756 = vmatprep.subr.bf16.mxu1 %v7317_v19  ;;  %v5765_v63 = vpack.c.bf16 %v1852_v42, %v1847_v25  ;;  %v1857_v59 = vadd.f32 %v7247_v45, %v1856_v46  ;;  %v5519_v52 = vpop.f32.mrb[8].mxu1 }
 0x194   : > { %v1872_v50 = vadd.f32 %v5519_v52, %v7247_v45  ;;  %v1866_v12 = vpop.f32.mrb[9].mxu1 }
 0x195   : > { %5766 = vmatprep.subr.bf16.mxu0 %v5765_v63  ;;  %v7324_v58 = vpack.c.bf16 %v1862_v8, %v1857_v59  ;;  %v1867_v19 = vadd.f32 %v7247_v45, %v1866_v12  ;;  %v5522_v42 = vpop.f32.mrb[10].mxu1 }
 0x196   : > { %5768 = vmatpush3.bf16.msra.mxu0 %v5765_v63  ;;  %v1882_v63 = vadd.f32 %v5522_v42, %v7247_v45  ;;  %v1876_v25 = vpop.f32.mrb[11].mxu1 }
 0x197   : > { %8326 = vst [vmem:[#allocation29_spill] sm:$0xff] %v7324_v58  ;;  %5776 = vmatprep.subr.bf16.mxu0 %v7324_v58  ;;  %v7329_v36 = vpack.c.bf16 %v1872_v50, %v1867_v19  ;;  %v1877_v38 = vadd.f32 %v7247_v45, %v1876_v25  ;;  %v7420_v58 = vld [vmem:[%s8205_s10 + $0x6] ss:$0 sm:$0xff] }
 0x199   : > { %8327 = vst [vmem:[#allocation30_spill] sm:$0xff] %v7329_v36  ;;  %v7333_v31 = vpack.c.bf16 %v1882_v63, %v1877_v38 }
 0x19b   : > { %8328 = vst [vmem:[#allocation31_spill] sm:$0xff] %v7333_v31  ;;  %v5985_v31 = vld [vmem:[%s6189_s24 + $0x22] sm:$0xff] }
 0x1d6   : > { %v5525_v59 = vpop.f32.mrb[12].mxu1 }
 0x1d7   : > { %v1892_v8 = vadd.f32 %v5525_v59, %v7247_v45  ;;  %v1886_v46 = vpop.f32.mrb[13].mxu1 }
 0x1d8   : > { %v1887_v34 = vadd.f32 %v7247_v45, %v1886_v46 }
 0x1da   : > { %v7337_v52 = vpack.c.bf16 %v1892_v8, %v1887_v34 }
 0x1dc   : > { %8329 = vst [vmem:[#allocation32_spill] sm:$0xff] %v7337_v52 }
 0x1e2   : > { %v5528_v23 = vpop.f32.mrb[14].mxu1 }
 0x1e3   : > { %v1902_v19 = vadd.f32 %v5528_v23, %v7247_v45  ;;  %v1896_v50 = vpop.f32.mrb[15].mxu1 }
 0x1e4   : > { %v1897_v12 = vadd.f32 %v7247_v45, %v1896_v50  ;;  %v7362_v50 = vld [vmem:[%s8205_s10] ss:$0 sm:$0xff] }
 0x1e6   : > { %v7341_v42 = vpack.c.bf16 %v1902_v19, %v1897_v12  ;;  %v1912_v12 = vmul.f32 %v7362_v50, %v6733_v0  ;;  %v7380_v0 = vld [vmem:[%s8205_s10 + $0x2] ss:$0 sm:$0xff] }
 0x1e8   : > { %8330 = vst [vmem:[#allocation33_spill] sm:$0xff] %v7341_v42  ;;  %v1986_v42 = vmul.f32 %v7380_v0, %v6741_v20 }
 0x259   : > { %v5567_v15 = vpop.f32.mrb[16].mxu1 }
 0x25a   : > { %v2578_v25 = vpop.f32.mrb[17].mxu1  ;;  %v7345_v38 = vmul.f32 0.35355338, %v5567_v15 }
 0x25b   : > { %v7343_v63 = vmul.f32 0.35355338, %v2578_v25  ;;  %v7369_v25 = vld [vmem:[%s8205_s10 + $0x1] ss:$0 sm:$0xff] }
 0x25c   : > { %8332 = vst [vmem:[#allocation35_spill] sm:$0xff] %v7345_v38  ;;  %v2604_v23 = vsel %vm1003_vm0, %v7345_v38, -inf  ;;  %v1951_v20 = vmul.f32 %v7369_v25, %v6769_v54 }
 0x25d   : > { %8331 = vst [vmem:[#allocation34_spill] sm:$0xff] %v7343_v63  ;;  %v2601_v59 = vsel %vm1003_vm0, %v7343_v63, -inf  ;;  %v8341_v63 = vld [vmem:[#allocation8_spill] sm:$0xff] }
 0x25e   : > { %2602 = vmax.xlane.f32.xlu1 %v2601_v59  ;;  %v1949_v59 = vmul.f32 %v7369_v25, %v6738_v62  ;;  %v1987_v62 = vmul.f32 %v5985_v31, %v7380_v0 }
 0x261   : > { %v5570_v34 = vpop.f32.mrb[18].mxu1 }
 0x262   : > { %v7351_v8 = vmul.f32 0.35355338, %v5570_v34  ;;  %2605 = vmax.xlane.f32.xlu1 %v2604_v23  ;;  %v2588_v45 = vpop.f32.mrb[19].mxu1  ;;  %v5982_v34 = vld [vmem:[%s6189_s24 + $0x20] sm:$0xff] }
 0x263   : > { %v7353_v46 = vmul.f32 0.35355338, %v2588_v45  ;;  %v1913_v23 = vmul.f32 %v5982_v34, %v7362_v50  ;;  %v5983_v45 = vld [vmem:[%s6189_s24 + $0x21] sm:$0xff] }
 0x264   : > { %8333 = vst [vmem:[#allocation36_spill] sm:$0xff] %v7351_v8  ;;  %v2610_v15 = vsel %vm1003_vm0, %v7351_v8, -inf  ;;  %v7389_v34 = vld [vmem:[%s8205_s10 + $0x4] ss:$0 sm:$0xff] }
 0x265   : > { %8334 = vst [vmem:[#allocation37_spill] sm:$0xff] %v7353_v46  ;;  %v2607_v19 = vsel %vm1003_vm0, %v7353_v46, -inf  ;;  %v1916_v46 = vmul.f32 %v7362_v50, %v6779_v26 }
 0x266   : > { %2611 = vmax.xlane.f32.xlu1 %v2610_v15  ;;  %2608 = vmax.xlane.f32.xlu0 %v2607_v19  ;;  %v1950_v15 = vmul.f32 %v5983_v45, %v7369_v25  ;;  %v1965_v19 = vadd.f32 %v1949_v59, %v1912_v12  ;;  %v2024_v12 = vmul.f32 %v7389_v34, %v6751_v22  ;;  %v5987_v45 = vld [vmem:[%s6189_s24 + $0x38] sm:$0xff] }
 0x267   : > { %v1914_v59 = vmul.f32 %v7362_v50, %v6751_v22  ;;  %v2025_v31 = vmul.f32 %v5987_v45, %v7389_v34  ;;  %v2061_v22 = vmul.f32 %v7406_v11, %v6769_v54 }
 0x268   : > { %v1966_v52 = vadd.f32 %v1950_v15, %v1913_v23  ;;  %v2002_v49 = vadd.f32 %v1986_v42, %v1965_v19  ;;  %v1915_v42 = vmul.f32 %v7362_v50, %v6835_v21  ;;  %v1952_v15 = vmul.f32 %v7369_v25, %v6838_v24 }
 0x269   : > { %v2062_v21 = vmul.f32 %v5989_v5, %v7406_v11  ;;  %v1989_v24 = vmul.f32 %v7380_v0, %v6847_v48  ;;  %v2027_v48 = vmul.f32 %v7389_v34, %v6825_v40 }
 0x26a   : > { %v2003_v23 = vadd.f32 %v1987_v62, %v1966_v52  ;;  %v2040_v19 = vadd.f32 %v2024_v12, %v2002_v49  ;;  %v1967_v52 = vadd.f32 %v1951_v20, %v1914_v59  ;;  %v1988_v62 = vmul.f32 %v7380_v0, %v6809_v37  ;;  %v5990_v12 = vld [vmem:[%s6189_s24 + $0x32] sm:$0xff] }
 0x26b   : > { %v1968_v36 = vadd.f32 %v1952_v15, %v1915_v42  ;;  %v2098_v54 = vmul.f32 %v7420_v58, %v5990_v12  ;;  %v2026_v37 = vmul.f32 %v7389_v34, %v6779_v26  ;;  %v7432_v15 = vld [vmem:[%s8205_s10 + $0x8] ss:$0 sm:$0xff] }
 0x26c   : > { %v2041_v45 = vadd.f32 %v2025_v31, %v2003_v23  ;;  %v2077_v49 = vadd.f32 %v2061_v22, %v2040_v19  ;;  %v2004_v59 = vadd.f32 %v1988_v62, %v1967_v52  ;;  %v5992_v23 = vld [vmem:[%s6189_s24 + $0x3a] sm:$0xff]  ;;  %v2136_v19 = vmul.f32 %v7432_v15, %v6779_v26  ;;  %s6010_s24 = smov 96  }
 0x26d   : > { %v2099_v5 = vmul.f32 %v5992_v23, %v7420_v58  ;;  %v2005_v31 = vadd.f32 %v1989_v24, %v1968_v36  ;;  %v2063_v52 = vmul.f32 %v7406_v11, %v6791_v43  ;;  %v2137_v36 = vmul.f32 %v7432_v15, %v6825_v40 }
 0x26e   : > { %v2078_v20 = vadd.f32 %v2062_v21, %v2041_v45  ;;  %v2114_v42 = vadd.f32 %v2098_v54, %v2077_v49  ;;  %v2042_v22 = vadd.f32 %v2026_v37, %v2004_v59  ;;  %v2064_v21 = vmul.f32 %v7406_v11, %v6830_v32  ;;  %v7445_v49 = vld [vmem:[%s8205_s10 + $0x9] ss:$0 sm:$0xff] }
 0x26f   : > { %v2043_v45 = vadd.f32 %v2027_v48, %v2005_v31  ;;  %v2173_v12 = vmul.f32 %v7445_v49, %v6791_v43  ;;  %v2100_v59 = vmul.f32 %v7420_v58, %v6802_v47  ;;  %v7458_v48 = vld [vmem:[%s8205_s10 + $0xa] ss:$0 sm:$0xff] }
 0x270   : > { %v2115_v62 = vadd.f32 %v2099_v5, %v2078_v20  ;;  %v2152_v24 = vadd.f32 %v2136_v19, %v2114_v42  ;;  %v2079_v54 = vadd.f32 %v2063_v52, %v2042_v22  ;;  %v2174_v20 = vmul.f32 %v7445_v49, %v6830_v32 }
 0x271   : > { %v2080_v23 = vadd.f32 %v2064_v21, %v2043_v45  ;;  %v2101_v5 = vmul.f32 %v7420_v58, %v6873_v10  ;;  %v2210_v42 = vmul.f32 %v7458_v48, %v6802_v47  ;;  %v2138_v22 = vmul.f32 %v7432_v15, %v6856_v3 }
 0x272   : > { %v2153_v37 = vadd.f32 %v2137_v36, %v2115_v62  ;;  %v2189_v31 = vadd.f32 %v2173_v12, %v2152_v24  ;;  %v2116_v19 = vadd.f32 %v2100_v59, %v2079_v54  ;;  %v2211_v62 = vmul.f32 %v7458_v48, %v6873_v10 }
 0x273   : > { %v2117_v36 = vadd.f32 %v2101_v5, %v2080_v23  ;;  %v2139_v45 = vmul.f32 %v7432_v15, %v6899_v27  ;;  %v2175_v12 = vmul.f32 %v7445_v49, %v6896_v6  ;;  %v2212_v59 = vmul.f32 %v7458_v48, %v6915_v53 }
 0x274   : > { %v2190_v52 = vadd.f32 %v2174_v20, %v2153_v37  ;;  %v2226_v21 = vadd.f32 %v2210_v42, %v2189_v31  ;;  %v2154_v24 = vadd.f32 %v2138_v22, %v2116_v19  ;;  %v2176_v20 = vmul.f32 %v7445_v49, %v6933_v29 }
 0x275   : > { %v2155_v37 = vadd.f32 %v2139_v45, %v2117_v36  ;;  %v2213_v31 = vmul.f32 %v7458_v48, %v6945_v60  ;;  %v1953_v42 = vmul.f32 %v7369_v25, %v6791_v43  ;;  %v1990_v22 = vmul.f32 %v7380_v0, %v6802_v47 }
 0x276   : > { %v2227_v54 = vadd.f32 %v2211_v62, %v2190_v52  ;;  %v2249_v23 = vadd.f32 %v6786_v1, %v2226_v21  ;;  %v2191_v5 = vadd.f32 %v2175_v12, %v2154_v24  ;;  %v2028_v36 = vmul.f32 %v7389_v34, %v6856_v3 }
 0x277   : > { %v2192_v26 = vadd.f32 %v2176_v20, %v2155_v37  ;;  %v1969_v62 = vadd.f32 %v1953_v42, %v1916_v46  ;;  %v7489_v45 = vadd.f32 %v7270_v7, %v7182_v57  ;;  %v7493_v43 = vadd.f32 %v7182_v57, %v7272_v17  ;;  %v8335_v20 = vld [vmem:[#allocation6_spill] sm:$0xff] }
 0x278   : > { %v2250_v19 = vadd.f32 %v6786_v1, %v2227_v54  ;;  %5540 = vmatprep.mubr.msk.f32.mxu0 %vm1003_vm0, %v2249_v23  ;;  %v2228_v52 = vadd.f32 %v2212_v59, %v2191_v5  ;;  %v1917_v47 = vmul.f32 %v7362_v50, %v6825_v40  ;;  %v2065_v12 = vmul.f32 %v7406_v11, %v6896_v6 }
 0x279   : > { %v2229_v21 = vadd.f32 %v2213_v31, %v2192_v26  ;;  %v2006_v46 = vadd.f32 %v1990_v22, %v1969_v62  ;;  %v1954_v7 = vmul.f32 %v7369_v25, %v6830_v32  ;;  %v2102_v17 = vmul.f32 %v7420_v58, %v6915_v53 }
 0x27a   : > { %5541 = vmatmul.mubr.msk.f32.gmra.mrb[18].mxu0 %vm1003_vm0, %v2250_v19  ;;  %v2251_v24 = vadd.f32 %v6786_v1, %v2228_v52  ;;  %v2140_v59 = vmul.f32 %v7432_v15, %v6957_v33  ;;  %v1991_v40 = vmul.f32 %v7380_v0, %v6873_v10  ;;  %v2177_v23 = vmul.f32 %v7445_v49, %v8335_v20 }
 0x27b   : > { %v2252_v54 = vadd.f32 %v6786_v1, %v2229_v21  ;;  %v2044_v37 = vadd.f32 %v2028_v36, %v2006_v46  ;;  %v1970_v5 = vadd.f32 %v1954_v7, %v1917_v47  ;;  %v2029_v32 = vmul.f32 %v7389_v34, %v6899_v27  ;;  %v8336_v1 = vld [vmem:[#allocation2_spill] sm:$0xff]  ;;  %v8337_v36 = vld [vmem:[#allocation3_spill] sm:$0xff]  ;;  %v8338_v47 = vld [vmem:[#allocation4_spill] sm:$0xff] }
 0x27c   : > { %5543 = vmatprep.mubr.msk.f32.mxu0 %vm1003_vm0, %v2251_v24  ;;  %v2214_v31 = vmul.f32 %v7458_v48, %v8336_v1  ;;  %v2066_v42 = vmul.f32 %v7406_v11, %v6933_v29  ;;  %v1918_v10 = vmul.f32 %v7362_v50, %v6856_v3  ;;  %v1955_v19 = vmul.f32 %v7369_v25, %v6896_v6 }
 0x27d   : > { %v2081_v26 = vadd.f32 %v2065_v12, %v2044_v37  ;;  %v2007_v22 = vadd.f32 %v1991_v40, %v1970_v5  ;;  %v2103_v52 = vmul.f32 %v7420_v58, %v6945_v60  ;;  %v1992_v62 = vmul.f32 %v7380_v0, %v6915_v53  ;;  %v8339_v12 = vld [vmem:[#allocation5_spill] sm:$0xff] }
 0x27e   : > { %5544 = vmatmul.mubr.msk.f32.gmra.mrb[20].mxu0 %vm1003_vm0, %v2252_v54  ;;  %v2141_v21 = vmul.f32 %v7432_v15, %v8337_v36  ;;  %v2178_v24 = vmul.f32 %v7445_v49, %v8338_v47  ;;  %v1971_v46 = vadd.f32 %v1955_v19, %v1918_v10  ;;  %v2030_v3 = vmul.f32 %v7389_v34, %v6957_v33 }
 0x27f   : > { %v2118_v7 = vadd.f32 %v2102_v17, %v2081_v26  ;;  %v2045_v6 = vadd.f32 %v2029_v32, %v2007_v22  ;;  %v2215_v54 = vmul.f32 %v7458_v48, %v8339_v12  ;;  %v2067_v40 = vmul.f32 %v7406_v11, %v8335_v20  ;;  %v8340_v22 = vld [vmem:[#allocation7_spill] sm:$0xff] }
 0x280   : > { %v2008_v37 = vadd.f32 %v1992_v62, %v1971_v46  ;;  %v1919_v53 = vmul.f32 %v7362_v50, %v6899_v27  ;;  %v1956_v5 = vmul.f32 %v7369_v25, %v6933_v29  ;;  %v1993_v10 = vmul.f32 %v7380_v0, %v6945_v60 }
 0x281   : > { %v2156_v19 = vadd.f32 %v2140_v59, %v2118_v7  ;;  %v2082_v8 = vadd.f32 %v2066_v42, %v2045_v6  ;;  %v2104_v17 = vmul.f32 %v7420_v58, %v8336_v1  ;;  %v2142_v32 = vmul.f32 %v7432_v15, %v7034_v9 }
 0x282   : > { %v2046_v26 = vadd.f32 %v2030_v3, %v2008_v37  ;;  %v2179_v62 = vmul.f32 %v7445_v49, %v8340_v22  ;;  %v1972_v46 = vadd.f32 %v1956_v5, %v1919_v53  ;;  %v2031_v27 = vmul.f32 %v7389_v34, %v8337_v36 }
 0x283   : > { %v2193_v29 = vadd.f32 %v2177_v23, %v2156_v19  ;;  %v2119_v38 = vadd.f32 %v2103_v52, %v2082_v8  ;;  %v2216_v60 = vmul.f32 %v7458_v48, %v8341_v63  ;;  %v2068_v59 = vmul.f32 %v7406_v11, %v8338_v47 }
 0x284   : > { %v2083_v42 = vadd.f32 %v2067_v40, %v2046_v26  ;;  %v2009_v7 = vadd.f32 %v1993_v10, %v1972_v46  ;;  %v1920_v3 = vmul.f32 %v7362_v50, %v6957_v33  ;;  %v1957_v6 = vmul.f32 %v7369_v25, %v8335_v20  ;;  %v7569_v33 = vld [vmem:[%s8206_s11] ss:$0 sm:$0xff]  ;;  %v8343_v10 = vld [vmem:[#allocation15_spill] sm:$0xff] }
 0x285   : > { %v2230_v37 = vadd.f32 %v2214_v31, %v2193_v29  ;;  %v2157_v53 = vadd.f32 %v2141_v21, %v2119_v38  ;;  %v2105_v23 = vmul.f32 %v7420_v58, %v8339_v12  ;;  %v1994_v8 = vmul.f32 %v7380_v0, %v8336_v1  ;;  %v8342_v31 = vld [vmem:[#allocation12_spill] sm:$0xff] }
 0x286   : > { %v2120_v52 = vadd.f32 %v2104_v17, %v2083_v42  ;;  %v2047_v5 = vadd.f32 %v2031_v27, %v2009_v7  ;;  %v1973_v19 = vadd.f32 %v1957_v6, %v1920_v3  ;;  %v2032_v40 = vmul.f32 %v7389_v34, %v7034_v9 }
 0x287   : > { %v2253_v20 = vadd.f32 %v7569_v33, %v2230_v37  ;;  %v2194_v38 = vadd.f32 %v2178_v24, %v2157_v53  ;;  %v2143_v21 = vmul.f32 %v7432_v15, %v8342_v31  ;;  %v2180_v1 = vmul.f32 %v7445_v49, %v8343_v10  ;;  %v8344_v53 = vld [vmem:[#allocation10_spill] sm:$0xff] }
 0x288   : > { %v2158_v17 = vadd.f32 %v2142_v32, %v2120_v52  ;;  %v2084_v26 = vadd.f32 %v2068_v59, %v2047_v5  ;;  %v2010_v46 = vadd.f32 %v1994_v8, %v1973_v19  ;;  %v2069_v27 = vmul.f32 %v7406_v11, %v8340_v22 }
 0x289   : > { %5546 = vmatprep.mubr.msk.f32.mxu0 %vm1003_vm0, %v2253_v20  ;;  %v2231_v29 = vadd.f32 %v2215_v54, %v2194_v38  ;;  %v2106_v42 = vmul.f32 %v7420_v58, %v8341_v63  ;;  %v1921_v24 = vmul.f32 %v7362_v50, %v8337_v36  ;;  %v1958_v7 = vmul.f32 %v7369_v25, %v8338_v47  ;;  %v8345_v20 = vld [vmem:[#allocation13_spill] sm:$0xff] }
 0x28a   : > { %v2195_v3 = vadd.f32 %v2179_v62, %v2158_v17  ;;  %v2121_v6 = vadd.f32 %v2105_v23, %v2084_v26  ;;  %v2048_v32 = vadd.f32 %v2032_v40, %v2010_v46  ;;  %v1995_v59 = vmul.f32 %v7380_v0, %v8339_v12  ;;  %v8346_v12 = vld [vmem:[#allocation11_spill] sm:$0xff] }
 0x28b   : > { %v2254_v37 = vadd.f32 %v7569_v33, %v2231_v29  ;;  %v2217_v54 = vmul.f32 %v7458_v48, %v8344_v53  ;;  %v1974_v8 = vadd.f32 %v1958_v7, %v1921_v24  ;;  %v2033_v52 = vmul.f32 %v7389_v34, %v8342_v31  ;;  %v8347_v7 = vld [vmem:[#allocation14_spill] sm:$0xff] }
 0x28c   : > { %v2232_v5 = vadd.f32 %v2216_v60, %v2195_v3  ;;  %v2159_v36 = vadd.f32 %v2143_v21, %v2121_v6  ;;  %v2085_v19 = vadd.f32 %v2069_v27, %v2048_v32  ;;  %v2144_v47 = vmul.f32 %v7432_v15, %v8345_v20 }
 0x28d   : > { %v7596_v62 = vadd.f32 %v7290_v2, %v7182_v57  ;;  %5547 = vmatmul.mubr.msk.f32.gmra.mrb[22].mxu0 %vm1003_vm0, %v2254_v37  ;;  %v2181_v23 = vmul.f32 %v7445_v49, %v8346_v12  ;;  %v2011_v40 = vadd.f32 %v1995_v59, %v1974_v8  ;;  %v2070_v38 = vmul.f32 %v7406_v11, %v8343_v10 }
 0x28e   : > { %v2255_v60 = vadd.f32 %v7569_v33, %v2232_v5  ;;  %v2196_v21 = vadd.f32 %v2180_v1, %v2159_v36  ;;  %v2122_v17 = vadd.f32 %v2106_v42, %v2085_v19  ;;  %v1922_v26 = vmul.f32 %v7362_v50, %v7034_v9 }
 0x28f   : > { %v2049_v2 = vadd.f32 %v2033_v52, %v2011_v40  ;;  %v2107_v46 = vmul.f32 %v7420_v58, %v8344_v53  ;;  %v1959_v27 = vmul.f32 %v7369_v25, %v8340_v22  ;;  %v1996_v29 = vmul.f32 %v7380_v0, %v8341_v63 }
 0x290   : > { %5549 = vmatprep.mubr.msk.f32.mxu0 %vm1003_vm0, %v2255_v60  ;;  %v2160_v24 = vadd.f32 %v2144_v47, %v2122_v17  ;;  %v2218_v1 = vmul.f32 %v7458_v48, %v8347_v7  ;;  %v2145_v9 = vmul.f32 %v7432_v15, %v7119_v4  ;;  %v2182_v3 = vmul.f32 %v7445_v49, %v7129_v55 }
 0x291   : > { %v2086_v42 = vadd.f32 %v2070_v38, %v2049_v2  ;;  %v1975_v6 = vadd.f32 %v1959_v27, %v1922_v26  ;;  %v2034_v22 = vmul.f32 %v7389_v34, %v8345_v20  ;;  %v2071_v59 = vmul.f32 %v7406_v11, %v8346_v12  ;;  %v8348_v38 = vld [vmem:[#allocation9_spill] sm:$0xff] }
 0x292   : > { %v2197_v32 = vadd.f32 %v2181_v23, %v2160_v24  ;;  %v1923_v37 = vmul.f32 %v7362_v50, %v8342_v31  ;;  %v1960_v52 = vmul.f32 %v7369_v25, %v8343_v10  ;;  %v1997_v5 = vmul.f32 %v7380_v0, %v8344_v53 }
 0x293   : > { %3053 = vxpose.xlu0.b32.start [1/2] (short) (narrow) %v7493_v43, 32  ;;  %v2233_v43 = vadd.f32 %v2217_v54, %v2196_v21  ;;  %v2123_v54 = vadd.f32 %v2107_v46, %v2086_v42  ;;  %v2012_v8 = vadd.f32 %v1996_v29, %v1975_v6  ;;  %v2219_v19 = vmul.f32 %v7458_v48, %v7141_v14 }
 0x294   : > { %v2234_v36 = vadd.f32 %v2218_v1, %v2197_v32  ;;  %v2108_v31 = vmul.f32 %v7420_v58, %v8347_v7  ;;  %v1976_v40 = vadd.f32 %v1960_v52, %v1923_v37  ;;  %v2035_v10 = vmul.f32 %v7389_v34, %v7119_v4 }
 0x295   : > { %v2256_v63 = vadd.f32 %v7569_v33, %v2233_v43  ;;  %v2161_v47 = vadd.f32 %v2145_v9, %v2123_v54  ;;  %v2050_v23 = vadd.f32 %v2034_v22, %v2012_v8  ;;  %v2072_v60 = vmul.f32 %v7406_v11, %v7129_v55 }
 0x296   : > { %v2257_v53 = vadd.f32 %v7569_v33, %v2234_v36  ;;  %v1924_v21 = vmul.f32 %v7362_v50, %v8345_v20  ;;  %v2013_v2 = vadd.f32 %v1997_v5, %v1976_v40  ;;  %v1961_v46 = vmul.f32 %v7369_v25, %v8346_v12 }
 0x297   : > { %3054 = vxpose.xlu0.b32.end [2/2] (short) (narrow) %v7489_v45, 32  ;;  %v1179_v45 = vadd.f32 %v7182_v57, %v7292_v44  ;;  %5550 = vmatmul.mubr.msk.f32.gmra.mrb[24].mxu0 %vm1003_vm0, %v2256_v63  ;;  %v2146_v44 = vmul.f32 %v7432_v15, %v8348_v38  ;;  %v2198_v17 = vadd.f32 %v2182_v3, %v2161_v47 }
 0x298   : > { %v2087_v26 = vadd.f32 %v2071_v59, %v2050_v23  ;;  %5552 = vmatprep.mubr.msk.f32.mxu0 %vm1003_vm0, %v2257_v53  ;;  %v2183_v27 = vmul.f32 %v7445_v49, %v7154_v51  ;;  %v2109_v29 = vmul.f32 %v7420_v58, %v7141_v14  ;;  %v1998_v43 = vmul.f32 %v7380_v0, %v8347_v7 }
 0x299   : > { %v2036_v20 = vmul.f32 %v7389_v34, %v8348_v38  ;;  %v2235_v24 = vadd.f32 %v2219_v19, %v2198_v17  ;;  %v2051_v9 = vadd.f32 %v2035_v10, %v2013_v2  ;;  %v1977_v42 = vadd.f32 %v1961_v46, %v1924_v21  ;;  %v8350_v2 = vld [vmem:[#allocation35_spill] sm:$0xff] }
 0x29a   : > { %v2124_v1 = vadd.f32 %v2108_v31, %v2087_v26  ;;  %v2220_v12 = vmul.f32 %v7458_v48, %v7168_v30  ;;  %v2147_v3 = vmul.f32 %v7432_v15, %v7185_v16  ;;  %v2073_v6 = vmul.f32 %v7406_v11, %v7154_v51  ;;  %v8349_v26 = vld [vmem:[#allocation34_spill] sm:$0xff] }
 0x29b   : > { %v1925_v22 = vmul.f32 %v7362_v50, %v7119_v4  ;;  %v2258_v7 = vadd.f32 %v7569_v33, %v2235_v24  ;;  %v2088_v32 = vadd.f32 %v2072_v60, %v2051_v9  ;;  %v2014_v59 = vadd.f32 %v1998_v43, %v1977_v42 }
 0x29c   : > { %v2162_v63 = vadd.f32 %v2146_v44, %v2124_v1  ;;  %v2184_v37 = vmul.f32 %v7445_v49, %v7188_v56  ;;  %v1962_v54 = vmul.f32 %v7369_v25, %v7129_v55  ;;  %v1999_v8 = vmul.f32 %v7380_v0, %v7141_v14  ;;  %v8352_v1 = vld [vmem:[#allocation37_spill] sm:$0xff] }
 0x29d   : > { %5553 = vmatmul.mubr.msk.f32.gmra.mrb[26].mxu0 %vm1003_vm0, %v2258_v7  ;;  %v2125_v52 = vadd.f32 %v2109_v29, %v2088_v32  ;;  %v2052_v4 = vadd.f32 %v2036_v20, %v2014_v59  ;;  %v2110_v50 = vmul.f32 %v7420_v58, %v7168_v30  ;;  %v2221_v5 = vmul.f32 %v7458_v48, %v7211_v28 }
 0x29e   : > { %v2199_v51 = vadd.f32 %v2183_v27, %v2162_v63  ;;  %v2037_v36 = vmul.f32 %v7389_v34, %v7185_v16  ;;  %v2148_v14 = vmul.f32 %v7432_v15, %v7203_v61  ;;  %v2074_v31 = vmul.f32 %v7406_v11, %v7188_v56 }
 0x29f   : > { %v2163_v55 = vadd.f32 %v2147_v3, %v2125_v52  ;;  %v2089_v25 = vadd.f32 %v2073_v6, %v2052_v4  ;;  %v2185_v40 = vmul.f32 %v7445_v49, %v7218_v41  ;;  %v2111_v34 = vmul.f32 %v7420_v58, %v7211_v28  ;;  %v8356_v4 = vld [vmem:[#allocation16_spill] sm:$0xff] }
 0x2a0   : > { %4257 = vxpose.xlu0.b32.start [1/2] (short) (narrow) %v1179_v45, 32  ;;  %v1978_v45 = vadd.f32 %v1962_v54, %v1925_v22  ;;  %v2236_v19 = vadd.f32 %v2220_v12, %v2199_v51  ;;  %v2149_v56 = vmul.f32 %v7432_v15, %v7235_v18  ;;  %v2186_v41 = vmul.f32 %v7445_v49, %v7242_v35  ;;  %v8353_v54 = vld [vmem:[#allocation29_spill] sm:$0xff] }
 0x2a1   : > { %v2200_v47 = vadd.f32 %v2184_v37, %v2163_v55  ;;  %v2126_v23 = vadd.f32 %v2110_v50, %v2089_v25  ;;  %v2223_v60 = vmul.f32 %v7458_v48, %v7253_v13  ;;  %v8355_v51 = vld [vmem:[#allocation17_spill] sm:$0xff]  ;;  %v1134_v50 = vadd.f32 %v8356_v4, %v7182_v57  ;;  %v8358_v55 = vld [vmem:[#allocation18_spill] sm:$0xff] }
 0x2a2   : > { %v2015_v0 = vadd.f32 %v1999_v8, %v1978_v45  ;;  %v2259_v30 = vadd.f32 %v7569_v33, %v2236_v19  ;;  %v8354_v8 = vld [vmem:[#allocation30_spill] sm:$0xff]  ;;  %v1129_v52 = vadd.f32 %v7182_v57, %v8355_v51  ;;  %v8357_v45 = vld [vmem:[#allocation19_spill] sm:$0xff]  ;;  %v1154_v25 = vadd.f32 %v8358_v55, %v7182_v57 }
 0x2a3   : > { %v2237_v61 = vadd.f32 %v2221_v5, %v2200_v47  ;;  %v2164_v10 = vadd.f32 %v2148_v14, %v2126_v23  ;;  %v8359_v14 = vld [vmem:[#allocation21_spill] sm:$0xff]  ;;  %v8361_v47 = vld [vmem:[#allocation23_spill] sm:$0xff] }
 0x2a4   : > { %4258 = vxpose.xlu0.b32.end [2/2] (short) (narrow) %v7596_v62, 32  ;;  %v2053_v16 = vadd.f32 %v2037_v36, %v2015_v0  ;;  %5555 = vmatprep.mubr.msk.f32.mxu0 %vm1003_vm0, %v2259_v30  ;;  %v2222_v62 = vmul.f32 %v7458_v48, %v7227_v39  ;;  %v8351_v48 = vld [vmem:[#allocation36_spill] sm:$0xff]  ;;  %v1149_v36 = vadd.f32 %v7182_v57, %v8357_v45 }
 0x2a5   : > { %v2260_v11 = vadd.f32 %v7569_v33, %v2237_v61  ;;  %v2201_v38 = vadd.f32 %v2185_v40, %v2164_v10  ;;  %v1159_v0 = vadd.f32 %v7182_v57, %v8359_v14  ;;  %v1169_v23 = vadd.f32 %v7182_v57, %v8361_v47  ;;  %v8362_v40 = vld [vmem:[#allocation22_spill] sm:$0xff]  ;;  %v8364_v10 = vld [vmem:[#allocation24_spill] sm:$0xff] }
 0x2a6   : > { %v2090_v53 = vadd.f32 %v2074_v31, %v2053_v16  ;;  %v8360_v31 = vld [vmem:[#allocation20_spill] sm:$0xff]  ;;  %v1174_v16 = vadd.f32 %v8362_v40, %v7182_v57 }
 0x2a7   : > { %5556 = vmatmul.mubr.msk.f32.gmra.mrb[28].mxu0 %vm1003_vm0, %v2260_v11  ;;  %v2238_v28 = vadd.f32 %v2222_v62, %v2201_v38  ;;  %v1164_v30 = vadd.f32 %v8360_v31, %v7182_v57  ;;  %v1194_v62 = vadd.f32 %v8364_v10, %v7182_v57 }
 0x2a8   : > { %v2127_v44 = vadd.f32 %v2111_v34, %v2090_v53  ;;  %v8363_v34 = vld [vmem:[#allocation25_spill] sm:$0xff] }
 0x2a9   : > { %v2261_v39 = vadd.f32 %v7569_v33, %v2238_v28  ;;  %v1189_v61 = vadd.f32 %v7182_v57, %v8363_v34 }
 0x2aa   : > { %v2165_v58 = vadd.f32 %v2149_v56, %v2127_v44 }
 0x2ab   : > { %5558 = vmatprep.mubr.msk.f32.mxu0 %vm1003_vm0, %v2261_v39 }
 0x2ac   : > { %v2202_v21 = vadd.f32 %v2186_v41, %v2165_v58 }
 0x2ae   : > { %v2239_v18 = vadd.f32 %v2223_v60, %v2202_v21  ;;  %v8365_v60 = vld [vmem:[#allocation28_spill] sm:$0xff] }
 0x2b0   : > { %v2262_v15 = vadd.f32 %v7569_v33, %v2239_v18 }
 0x2b2   : > { %5559 = vmatmul.mubr.msk.f32.gmra.mrb[30].mxu0 %vm1003_vm0, %v2262_v15 }
 0x2eb   : > { %v2603_v17 = vpop.xlane.xlu1 %2602 }
 0x2ec   : > { %v2613_v35 = vsub.f32 %v8349_v26, %v2603_v17 }
 0x2ee   : > { %v2617_v27 = vmul.f32 1.442695, %v2613_v35 }
 0x2ef   : > { %v2606_v49 = vpop.xlane.xlu1 %2605 }
 0x2f0   : > { %v2614_v46 = vsub.f32 %v8350_v2, %v2606_v49 }
 0x2f2   : > { %v2619_v29 = vmul.f32 1.442695, %v2614_v46  ;;  %v8366_v46 = vld [vmem:[#allocation31_spill] sm:$0xff] }
 0x2f3   : > { %v2612_v43 = vpop.xlane.xlu1 %2611  ;;  %v2609_v13 = vpop.xlane.xlu0 %2608 }
 0x2f4   : > { %5842 = vpow2.f32 %v2619_v29  ;;  %v2616_v20 = vsub.f32 %v8351_v48, %v2612_v43  ;;  %v2615_v9 = vsub.f32 %v8352_v1, %v2609_v13  ;;  %v8367_v48 = vld [vmem:[#allocation32_spill] sm:$0xff] }
 0x2f5   : > { %5844 = vpow2.f32 %v2617_v27 }
 0x2f6   : > { %v2623_v24 = vmul.f32 1.442695, %v2616_v20  ;;  %v2621_v33 = vmul.f32 1.442695, %v2615_v9 }
 0x2f8   : > { %5846 = vpow2.f32 %v2623_v24 }
 0x2f9   : > { %5848 = vpow2.f32 %v2621_v33 }
 0x2fe   : > { %v5843_v42 = vpop.eup %5842 }
 0x2ff   : > { %v2628_v12 = vsel %vm1003_vm0, %v5843_v42, 0.0  ;;  %v5845_v3 = vpop.eup %5844 }
 0x300   : > { %2629 = vadd.xlane.f32.xlu1 %v2628_v12  ;;  %v2625_v6 = vsel %vm1003_vm0, %v5845_v3, 0.0  ;;  %v8368_v12 = vld [vmem:[#allocation33_spill] sm:$0xff] }
 0x302   : > { %v5847_v22 = vpop.eup %5846 }
 0x303   : > { %v2634_v7 = vsel %vm1003_vm0, %v5847_v22, 0.0  ;;  %v5849_v63 = vpop.eup %5848 }
 0x304   : > { %2626 = vadd.xlane.f32.xlu1 %v2625_v6  ;;  %v2631_v32 = vsel %vm1003_vm0, %v5849_v63, 0.0 }
 0x308   : > { %2635 = vadd.xlane.f32.xlu1 %v2634_v7 }
 0x30c   : > { %2632 = vadd.xlane.f32.xlu1 %v2631_v32 }
 0x313   : > { %v3069_v59 = vpop.trf.xlu0 }
 0x314   : > { %5605 = vmatprep.mubr.msk.f32.mxu0 %vm2499_vm1, %v3069_v59 }
 0x317   : > { %v3070_v37 = vpop.trf.xlu0 }
 0x318   : > { %5606 = vmatmul.mubr.msk.f32.vlgmr.msra.gmra.mrb[32].mxu0 %vm2499_vm1, %v3070_v37 }
 0x319   : > { %5778 = vmatpush3.bf16.msra.mxu0 %v8353_v54 }
 0x31a   : > { %5786 = vmatprep.subr.bf16.mxu0 %v8354_v8 }
 0x31b   : > { %v3071_v5 = vpop.trf.xlu0 }
 0x31c   : > { %5608 = vmatprep.mubr.msk.f32.mxu0 %vm2499_vm1, %v3071_v5 }
 0x31f   : > { %v3072_v19 = vpop.trf.xlu0 }
 0x320   : > { %5609 = vmatmul.mubr.msk.f32.gmra.mrb[34].mxu0 %vm2499_vm1, %v3072_v19 }
 0x323   : > { %v4273_v9 = vpop.trf.xlu0 }
 0x33f   : > { %2752 = vxpose.xlu1.b32.start [1/2] (short) (narrow) %v1129_v52, 32 }
 0x343   : > { %2753 = vxpose.xlu1.b32.end [2/2] (short) (narrow) %v1134_v50, 32 }
 0x34c   : > { %3354 = vxpose.xlu1.b32.start [1/2] (short) (narrow) %v1149_v36, 32 }
 0x34d   : > { %v5542_v7 = vpop.f32.mrb[18].mxu0 }
 0x34e   : > { %v2398_v59 = vpop.f32.mrb[19].mxu0 }
 0x350   : > { %3355 = vxpose.xlu1.b32.end [2/2] (short) (narrow) %v1154_v25, 32 }
 0x359   : > { %3655 = vxpose.xlu1.b32.start [1/2] (short) (narrow) %v1159_v0, 32 }
 0x35d   : > { %3656 = vxpose.xlu1.b32.end [2/2] (short) (narrow) %v1164_v30, 32 }
 0x366   : > { %3956 = vxpose.xlu1.b32.start [1/2] (short) (narrow) %v1169_v23, 32 }
 0x36a   : > { %3957 = vxpose.xlu1.b32.end [2/2] (short) (narrow) %v1174_v16, 32 }
 0x373   : > { %4558 = vxpose.xlu1.b32.start [1/2] (short) (narrow) %v1189_v61, 32 }
 0x377   : > { %4559 = vxpose.xlu1.b32.end [2/2] (short) (narrow) %v1194_v62, 32 }
 0x38d   : > { %v2630_v53 = vpop.xlane.xlu1 %2629 }
 0x38e   : > { %5850 = vrcp.f32 %v2630_v53 }
 0x391   : > { %v2627_v56 = vpop.xlane.xlu1 %2626 }
 0x392   : > { %5852 = vrcp.f32 %v2627_v56 }
 0x395   : > { %v2636_v11 = vpop.xlane.xlu1 %2635 }
 0x396   : > { %5854 = vrcp.f32 %v2636_v11 }
 0x398   : > { %v5851_v44 = vpop.eup %5850 }
 0x399   : > { %v2633_v38 = vpop.xlane.xlu1 %2632  ;;  %v2642_v58 = vmul.f32 %v5851_v44, %v5843_v42  ;;  %v4274_v42 = vpop.trf.xlu0 }
 0x39a   : > { %5856 = vrcp.f32 %v2633_v38 }
 0x39c   : > { %v5853_v41 = vpop.eup %5852 }
 0x39d   : > { %v2641_v28 = vmul.f32 %v5853_v41, %v5845_v3 }
 0x39f   : > { %5575 = vmatprep.mubr.msk.f32.mxu1 %vm1003_vm0, %v2641_v28 }
 0x3a0   : > { %5576 = vmatmul.mubr.msk.f32.vlgmr.msra.gmra.mrb[20].mxu1 %vm1003_vm0, %v2642_v58  ;;  %v5855_v57 = vpop.eup %5854 }
 0x3a1   : > { %5758 = vmatpush3.bf16.msra.mxu1 %v8365_v60  ;;  %v2644_v18 = vmul.f32 %v5855_v57, %v5847_v22  ;;  %v4275_v22 = vpop.trf.xlu0 }
 0x3a4   : > { %v5857_v39 = vpop.eup %5856 }
 0x3a5   : > { %v2643_v21 = vmul.f32 %v5857_v39, %v5849_v63  ;;  %v8369_v63 = vld [vmem:[#allocation26_spill] sm:$0xff]  ;;  %v4276_v4 = vpop.trf.xlu0 }
 0x3a6   : > { %v2404_v32 = vadd.f32 %v5542_v7, %v8369_v63  ;;  %v2399_v54 = vadd.f32 %v8369_v63, %v2398_v59 }
 0x3a7   : > { %5578 = vmatprep.mubr.msk.f32.mxu1 %vm1003_vm0, %v2643_v21 }
 0x3a8   : > { %5579 = vmatmul.mubr.msk.f32.gmra.mrb[22].mxu1 %vm1003_vm0, %v2644_v18  ;;  %v5759_v50 = vpack.c.bf16 %v2404_v32, %v2399_v54 }
 0x3aa   : > { %5761 = vmatprep.subr.msk.bf16.mxu1 %vm7307_vm2, %v5759_v50 }
 0x3bf   : > { %v2768_v15 = vpop.trf.xlu1 }
 0x3c0   : > { %5585 = vmatprep.mubr.msk.f32.mxu1 %vm2499_vm1, %v2768_v15 }
 0x3c3   : > { %v2769_v17 = vpop.trf.xlu1 }
 0x3c4   : > { %5586 = vmatmul.mubr.msk.f32.vlgmr.msra.gmra.mrb[24].mxu1 %vm2499_vm1, %v2769_v17 }
 0x3c5   : > { %5764 = vmatpush3.bf16.xpose.msk.msra.mxu1 %vm7307_vm2, %v5759_v50 }
 0x3c7   : > { %v2770_v26 = vpop.trf.xlu1 }
 0x3c8   : > { %5588 = vmatprep.mubr.msk.f32.mxu1 %vm2499_vm1, %v2770_v26 }
 0x3cb   : > { %v2771_v35 = vpop.trf.xlu1 }
 0x3cc   : > { %5589 = vmatmul.mubr.msk.f32.gmra.mrb[26].mxu1 %vm2499_vm1, %v2771_v35 }
 0x3cf   : > { %v3370_v49 = vpop.trf.xlu1 }
 0x3d0   : > { %5625 = vmatprep.mubr.msk.f32.mxu0 %vm2499_vm1, %v3370_v49 }
 0x3d3   : > { %v3371_v2 = vpop.trf.xlu1 }
 0x3d4   : > { %5626 = vmatmul.mubr.msk.f32.vlgmr.msra.gmra.mrb[36].mxu0 %vm2499_vm1, %v3371_v2 }
 0x3d5   : > { %5788 = vmatpush3.bf16.msra.mxu0 %v8354_v8  ;;  %v5545_v8 = vpop.f32.mrb[20].mxu0 }
 0x3d6   : > { %5796 = vmatprep.subr.bf16.mxu0 %v8366_v46  ;;  %v2414_v51 = vadd.f32 %v5545_v8, %v8369_v63  ;;  %v2408_v52 = vpop.f32.mrb[21].mxu0 }
 0x3d7   : > { %v3372_v27 = vpop.trf.xlu1  ;;  %v2409_v5 = vadd.f32 %v8369_v63, %v2408_v52  ;;  %v5548_v45 = vpop.f32.mrb[22].mxu0 }
 0x3d8   : > { %5628 = vmatprep.mubr.msk.f32.mxu0 %vm2499_vm1, %v3372_v27  ;;  %v2424_v36 = vadd.f32 %v5548_v45, %v8369_v63  ;;  %v2418_v19 = vpop.f32.mrb[23].mxu0 }
 0x3d9   : > { %v7776_v25 = vpack.c.bf16 %v2414_v51, %v2409_v5  ;;  %v2419_v14 = vadd.f32 %v8369_v63, %v2418_v19  ;;  %v5551_v0 = vpop.f32.mrb[24].mxu0 }
 0x3da   : > { %v2434_v30 = vadd.f32 %v5551_v0, %v8369_v63  ;;  %v2428_v47 = vpop.f32.mrb[25].mxu0 }
 0x3db   : > { %v3373_v29 = vpop.trf.xlu1  ;;  %v7786_v23 = vpack.c.bf16 %v2424_v36, %v2419_v14  ;;  %v2429_v40 = vadd.f32 %v8369_v63, %v2428_v47  ;;  %v5554_v16 = vpop.f32.mrb[26].mxu0  ;;  %5771 = vmatprep.subr.msk.bf16.mxu1 %vm7307_vm2, %v7776_v25 }
 0x3dc   : > { %5629 = vmatmul.mubr.msk.f32.gmra.mrb[38].mxu0 %vm2499_vm1, %v3373_v29  ;;  %v2444_v34 = vadd.f32 %v5554_v16, %v8369_v63  ;;  %v2438_v61 = vpop.f32.mrb[27].mxu0 }
 0x3dd   : > { %v7793_v62 = vpack.c.bf16 %v2434_v30, %v2429_v40  ;;  %v2439_v53 = vadd.f32 %v8369_v63, %v2438_v61  ;;  %v5557_v56 = vpop.f32.mrb[28].mxu0 }
 0x3de   : > { %v2454_v11 = vadd.f32 %v5557_v56, %v8369_v63  ;;  %v2448_v38 = vpop.f32.mrb[29].mxu0 }
 0x3df   : > { %v3671_v43 = vpop.trf.xlu1  ;;  %v7799_v44 = vpack.c.bf16 %v2444_v34, %v2439_v53  ;;  %v2449_v41 = vadd.f32 %v8369_v63, %v2448_v38  ;;  %v5560_v60 = vpop.f32.mrb[30].mxu0 }
 0x3e0   : > { %5645 = vmatprep.mubr.msk.f32.mxu0 %vm2499_vm1, %v3671_v43  ;;  %v2464_v57 = vadd.f32 %v5560_v60, %v8369_v63  ;;  %v2458_v39 = vpop.f32.mrb[31].mxu0 }
 0x3e1   : > { %v7802_v58 = vpack.c.bf16 %v2454_v11, %v2449_v41  ;;  %v2459_v21 = vadd.f32 %v8369_v63, %v2458_v39 }
 0x3e3   : > { %v3672_v13 = vpop.trf.xlu1  ;;  %v7807_v17 = vpack.c.bf16 %v2464_v57, %v2459_v21 }
 0x3e4   : > { %5646 = vmatmul.mubr.msk.f32.vlgmr.msra.gmra.mrb[40].mxu0 %vm2499_vm1, %v3672_v13 }
 0x3e5   : > { %5798 = vmatpush3.bf16.msra.mxu0 %v8366_v46 }
 0x3e6   : > { %5806 = vmatprep.subr.bf16.mxu0 %v8367_v48 }
 0x3e7   : > { %v3673_v20 = vpop.trf.xlu1 }
 0x3e8   : > { %5648 = vmatprep.mubr.msk.f32.mxu0 %vm2499_vm1, %v3673_v20 }
 0x3eb   : > { %v3674_v24 = vpop.trf.xlu1  ;;  %v5607_v18 = vpop.f32.mrb[32].mxu0 }
 0x3ec   : > { %5649 = vmatmul.mubr.msk.f32.gmra.mrb[42].mxu0 %vm2499_vm1, %v3674_v24  ;;  %v3163_v15 = vpop.f32.mrb[33].mxu0  ;;  %v7845_v63 = vmul.f32 0.35355338, %v5607_v18 }
 0x3ee   : > { %v3189_v51 = vsel %vm1003_vm0, %v7845_v63, -inf }
 0x3ef   : > { %v3972_v1 = vpop.trf.xlu1 }
 0x3f0   : > { %5665 = vmatprep.mubr.msk.f32.mxu0 %vm2499_vm1, %v3972_v1 }
 0x3f3   : > { %v3973_v33 = vpop.trf.xlu1  ;;  %v5610_v26 = vpop.f32.mrb[34].mxu0 }
 0x3f4   : > { %5666 = vmatmul.mubr.msk.f32.vlgmr.msra.gmra.mrb[44].mxu0 %vm2499_vm1, %v3973_v33  ;;  %v3173_v35 = vpop.f32.mrb[35].mxu0  ;;  %v7849_v54 = vmul.f32 0.35355338, %v5610_v26 }
 0x3f5   : > { %5808 = vmatpush3.bf16.msra.mxu0 %v8367_v48  ;;  %v7825_v48 = vmul.f32 0.35355338, %v3163_v15  ;;  %v7835_v33 = vmul.f32 0.35355338, %v3173_v35 }
 0x3f6   : > { %5816 = vmatprep.subr.bf16.mxu0 %v8368_v12 }
 0x3f7   : > { %v3974_v3 = vpop.trf.xlu1 }
 0x3f8   : > { %5668 = vmatprep.mubr.msk.f32.mxu0 %vm2499_vm1, %v3974_v3  ;;  %v3192_v3 = vsel %vm1003_vm0, %v7835_v33, -inf }
 0x3fb   : > { %v3975_v6 = vpop.trf.xlu1 }
 0x3fc   : > { %5669 = vmatmul.mubr.msk.f32.gmra.mrb[46].mxu0 %vm2499_vm1, %v3975_v6 }
 0x3fd   : > { %5685 = vmatprep.mubr.msk.f32.mxu0 %vm2499_vm1, %v4273_v9  ;;  %v3186_v9 = vsel %vm1003_vm0, %v7825_v48, -inf }
 0x3ff   : > { %v4574_v37 = vpop.trf.xlu1 }
 0x400   : > { %5686 = vmatmul.mubr.msk.f32.vlgmr.msra.gmra.mrb[48].mxu0 %vm2499_vm1, %v4274_v42 }
 0x401   : > { %5818 = vmatpush3.bf16.msra.mxu0 %v8368_v12  ;;  %5688 = vmatprep.mubr.msk.f32.mxu0 %vm2499_vm1, %v4275_v22 }
 0x403   : > { %v4575_v55 = vpop.trf.xlu1 }
 0x404   : > { %5689 = vmatmul.mubr.msk.f32.gmra.mrb[50].mxu0 %vm2499_vm1, %v4276_v4  ;;  %v3195_v4 = vsel %vm1003_vm0, %v7849_v54, -inf }
 0x405   : > { %5705 = vmatprep.mubr.msk.f32.mxu0 %vm2499_vm1, %v4574_v37 }
 0x407   : > { %v4576_v10 = vpop.trf.xlu1 }
 0x408   : > { %5706 = vmatmul.mubr.msk.f32.vlgmr.msra.gmra.mrb[52].mxu0 %vm2499_vm1, %v4575_v55 }
 0x409   : > { %5708 = vmatprep.mubr.msk.f32.mxu0 %vm2499_vm1, %v4576_v10 }
 0x40b   : > { %v4577_v28 = vpop.trf.xlu1 }
 0x40c   : > { %5709 = vmatmul.mubr.msk.f32.gmra.mrb[54].mxu0 %vm2499_vm1, %v4577_v28 }
 0x473   : > { %v5577_v49 = vpop.f32.mrb[20].mxu1 }
 0x474   : > { %2749 = vst.msk [vmem:[%s7813_s15 + $0x8] sm:$0xff] %vm2499_vm1, %v5577_v49  ;;  %v2729_v2 = vpop.f32.mrb[21].mxu1 }
 0x475   : > { %2748 = vst.msk [vmem:[%s7813_s15] sm:$0xff] %vm2499_vm1, %v2729_v2 }
 0x47b   : > { %v5580_v46 = vpop.f32.mrb[22].mxu1 }
 0x47c   : > { %2751 = vst.msk [vmem:[%s7813_s15 + $0x18] sm:$0xff] %vm2499_vm1, %v5580_v46  ;;  %v2739_v27 = vpop.f32.mrb[23].mxu1 }
 0x47d   : > { %2750 = vst.msk [vmem:[%s7813_s15 + $0x10] sm:$0xff] %vm2499_vm1, %v2739_v27 }
 0x497   : > { %v5587_v29 = vpop.f32.mrb[24].mxu1 }
 0x498   : > { %v7823_v43 = vmul.f32 0.35355338, %v5587_v29  ;;  %v2862_v13 = vpop.f32.mrb[25].mxu1 }
 0x499   : > { %v7827_v20 = vmul.f32 0.35355338, %v2862_v13 }
 0x49a   : > { %v2888_v24 = vsel %vm1003_vm0, %v7823_v43, -inf }
 0x49b   : > { %2889 = vmax.xlane.f32.xlu1 %v2888_v24  ;;  %v2885_v1 = vsel %vm1003_vm0, %v7827_v20, -inf }
 0x49c   : > { %2886 = vmax.xlane.f32.xlu0 %v2885_v1 }
 0x49f   : > { %v5590_v42 = vpop.f32.mrb[26].mxu1  ;;  %3187 = vmax.xlane.f32.xlu1 %v3186_v9 }
 0x4a0   : > { %v2872_v12 = vpop.f32.mrb[27].mxu1  ;;  %v7841_v22 = vmul.f32 0.35355338, %v5590_v42 }
 0x4a1   : > { %v7839_v6 = vmul.f32 0.35355338, %v2872_v12 }
 0x4a2   : > { %v2894_v59 = vsel %vm1003_vm0, %v7841_v22, -inf }
 0x4a3   : > { %3193 = vmax.xlane.f32.xlu1 %v3192_v3  ;;  %v2891_v7 = vsel %vm1003_vm0, %v7839_v6, -inf }
 0x4a4   : > { %2892 = vmax.xlane.f32.xlu0 %v2891_v7 }
 0x4a7   : > { %v5627_v32 = vpop.f32.mrb[36].mxu0 }
 0x4a8   : > { %2895 = vmax.xlane.f32.xlu0 %v2894_v59  ;;  %v3464_v37 = vpop.f32.mrb[37].mxu0  ;;  %v7859_v50 = vmul.f32 0.35355338, %v5627_v32 }
 0x4a9   : > { %v7851_v8 = vmul.f32 0.35355338, %v3464_v37 }
 0x4aa   : > { %v3490_v55 = vsel %vm1003_vm0, %v7859_v50, -inf }
 0x4ab   : > { %v3487_v52 = vsel %vm1003_vm0, %v7851_v8, -inf }
 0x4ac   : > { %3190 = vmax.xlane.f32.xlu0 %v3189_v51  ;;  %3488 = vmax.xlane.f32.xlu1 %v3487_v52 }
 0x4af   : > { %v5630_v5 = vpop.f32.mrb[38].mxu0 }
 0x4b0   : > { %3196 = vmax.xlane.f32.xlu0 %v3195_v4  ;;  %v3474_v45 = vpop.f32.mrb[39].mxu0  ;;  %v7863_v19 = vmul.f32 0.35355338, %v5630_v5 }
 0x4b1   : > { %v7861_v36 = vmul.f32 0.35355338, %v3474_v45 }
 0x4b2   : > { %v3496_v30 = vsel %vm1003_vm0, %v7863_v19, -inf }
 0x4b3   : > { %v3493_v14 = vsel %vm1003_vm0, %v7861_v36, -inf }
 0x4b4   : > { %3491 = vmax.xlane.f32.xlu0 %v3490_v55  ;;  %3494 = vmax.xlane.f32.xlu1 %v3493_v14 }
 0x4b7   : > { %v5647_v0 = vpop.f32.mrb[40].mxu0 }
 0x4b8   : > { %v7871_v47 = vmul.f32 0.35355338, %v5647_v0  ;;  %3497 = vmax.xlane.f32.xlu0 %v3496_v30  ;;  %v3765_v40 = vpop.f32.mrb[41].mxu0 }
 0x4b9   : > { %v7873_v16 = vmul.f32 0.35355338, %v3765_v40 }
 0x4ba   : > { %v3791_v34 = vsel %vm1003_vm0, %v7871_v47, -inf }
 0x4bb   : > { %v3788_v61 = vsel %vm1003_vm0, %v7873_v16, -inf }
 0x4bc   : > { %3792 = vmax.xlane.f32.xlu0 %v3791_v34  ;;  %3789 = vmax.xlane.f32.xlu1 %v3788_v61 }
 0x4bf   : > { %v5650_v10 = vpop.f32.mrb[42].mxu0 }
 0x4c0   : > { %v7879_v53 = vmul.f32 0.35355338, %v5650_v10  ;;  %v3775_v56 = vpop.f32.mrb[43].mxu0 }
 0x4c1   : > { %v7881_v11 = vmul.f32 0.35355338, %v3775_v56 }
 0x4c2   : > { %v3797_v38 = vsel %vm1003_vm0, %v7879_v53, -inf }
 0x4c3   : > { %3798 = vmax.xlane.f32.xlu0 %v3797_v38  ;;  %v3794_v41 = vsel %vm1003_vm0, %v7881_v11, -inf }
 0x4c4   : > { %3795 = vmax.xlane.f32.xlu1 %v3794_v41 }
 0x4c7   : > { %v5667_v28 = vpop.f32.mrb[44].mxu0 }
 0x4c8   : > { %v7887_v60 = vmul.f32 0.35355338, %v5667_v28  ;;  %v4066_v57 = vpop.f32.mrb[45].mxu0 }
 0x4c9   : > { %v7889_v39 = vmul.f32 0.35355338, %v4066_v57 }
 0x4ca   : > { %v4092_v21 = vsel %vm1003_vm0, %v7887_v60, -inf }
 0x4cb   : > { %4093 = vmax.xlane.f32.xlu0 %v4092_v21  ;;  %v4089_v18 = vsel %vm1003_vm0, %v7889_v39, -inf }
 0x4cc   : > { %4090 = vmax.xlane.f32.xlu1 %v4089_v18 }
 0x4cf   : > { %v5670_v15 = vpop.f32.mrb[46].mxu0 }
 0x4d0   : > { %v7895_v26 = vmul.f32 0.35355338, %v5670_v15  ;;  %v4076_v35 = vpop.f32.mrb[47].mxu0 }
 0x4d1   : > { %v7897_v49 = vmul.f32 0.35355338, %v4076_v35 }
 0x4d2   : > { %v4098_v2 = vsel %vm1003_vm0, %v7895_v26, -inf }
 0x4d3   : > { %4099 = vmax.xlane.f32.xlu0 %v4098_v2  ;;  %v5687_v46 = vpop.f32.mrb[48].mxu0  ;;  %v4095_v27 = vsel %vm1003_vm0, %v7897_v49, -inf }
 0x4d4   : > { %v7903_v29 = vmul.f32 0.35355338, %v5687_v46  ;;  %4096 = vmax.xlane.f32.xlu1 %v4095_v27  ;;  %v4367_v13 = vpop.f32.mrb[49].mxu0 }
 0x4d5   : > { %v7905_v24 = vmul.f32 0.35355338, %v4367_v13 }
 0x4d6   : > { %v4393_v1 = vsel %vm1003_vm0, %v7903_v29, -inf }
 0x4d7   : > { %4394 = vmax.xlane.f32.xlu0 %v4393_v1  ;;  %v5690_v9 = vpop.f32.mrb[50].mxu0  ;;  %v4390_v42 = vsel %vm1003_vm0, %v7905_v24, -inf }
 0x4d8   : > { %v7911_v12 = vmul.f32 0.35355338, %v5690_v9  ;;  %4391 = vmax.xlane.f32.xlu1 %v4390_v42  ;;  %v4377_v3 = vpop.f32.mrb[51].mxu0 }
 0x4d9   : > { %v7913_v7 = vmul.f32 0.35355338, %v4377_v3 }
 0x4da   : > { %v4399_v32 = vsel %vm1003_vm0, %v7911_v12, -inf }
 0x4db   : > { %4400 = vmax.xlane.f32.xlu0 %v4399_v32  ;;  %v5707_v59 = vpop.f32.mrb[52].mxu0  ;;  %v4396_v37 = vsel %vm1003_vm0, %v7913_v7, -inf }
 0x4dc   : > { %v7919_v51 = vmul.f32 0.35355338, %v5707_v59  ;;  %v4668_v52 = vpop.f32.mrb[53].mxu0  ;;  %4397 = vmax.xlane.f32.xlu1 %v4396_v37 }
 0x4dd   : > { %v7921_v4 = vmul.f32 0.35355338, %v4668_v52 }
 0x4de   : > { %v4694_v5 = vsel %vm1003_vm0, %v7919_v51, -inf }
 0x4df   : > { %4695 = vmax.xlane.f32.xlu0 %v4694_v5  ;;  %v5710_v45 = vpop.f32.mrb[54].mxu0  ;;  %v4691_v55 = vsel %vm1003_vm0, %v7921_v4, -inf }
 0x4e0   : > { %v7927_v14 = vmul.f32 0.35355338, %v5710_v45  ;;  %v4678_v0 = vpop.f32.mrb[55].mxu0  ;;  %4692 = vmax.xlane.f32.xlu1 %v4691_v55 }
 0x4e1   : > { %v7929_v30 = vmul.f32 0.35355338, %v4678_v0 }
 0x4e2   : > { %v4700_v40 = vsel %vm1003_vm0, %v7927_v14, -inf }
 0x4e3   : > { %4701 = vmax.xlane.f32.xlu0 %v4700_v40  ;;  %v4697_v34 = vsel %vm1003_vm0, %v7929_v30, -inf }
 0x4e4   : > { %4698 = vmax.xlane.f32.xlu1 %v4697_v34 }
 0x528   : > { %v2890_v61 = vpop.xlane.xlu1 %2889 }
 0x529   : > { %v2898_v10 = vsub.f32 %v7823_v43, %v2890_v61  ;;  %v2887_v56 = vpop.xlane.xlu0 %2886 }
 0x52a   : > { %v2897_v38 = vsub.f32 %v7827_v20, %v2887_v56 }
 0x52b   : > { %v2903_v41 = vmul.f32 1.442695, %v2898_v10 }
 0x52c   : > { %v2901_v28 = vmul.f32 1.442695, %v2897_v38  ;;  %v3188_v57 = vpop.xlane.xlu1 %3187 }
 0x52d   : > { %5858 = vpow2.f32 %v2903_v41  ;;  %v3198_v21 = vsub.f32 %v7825_v48, %v3188_v57 }
 0x52e   : > { %5860 = vpow2.f32 %v2901_v28 }
 0x52f   : > { %v3202_v2 = vmul.f32 1.442695, %v3198_v21 }
 0x530   : > { %v3194_v18 = vpop.xlane.xlu1 %3193 }
 0x531   : > { %v2893_v15 = vpop.xlane.xlu0 %2892  ;;  %v3200_v46 = vsub.f32 %v7835_v33, %v3194_v18 }
 0x532   : > { %v2899_v35 = vsub.f32 %v7839_v6, %v2893_v15 }
 0x533   : > { %v3206_v9 = vmul.f32 1.442695, %v3200_v46 }
 0x534   : > { %v2905_v27 = vmul.f32 1.442695, %v2899_v35 }
 0x535   : > { %v2896_v13 = vpop.xlane.xlu0 %2895 }
 0x536   : > { %5862 = vpow2.f32 %v2905_v27  ;;  %v2900_v43 = vsub.f32 %v7841_v22, %v2896_v13 }
 0x537   : > { %v7941_v20 = vpop.eup %5858  ;;  %5864 = vpow2.f32 %v3202_v2 }
 0x538   : > { %v7943_v1 = vpop.eup %5860  ;;  %v2907_v42 = vmul.f32 1.442695, %v2900_v43  ;;  %v2912_v48 = vsel %vm1003_vm0, %v7941_v20, 0.0 }
 0x539   : > { %v3489_v3 = vpop.xlane.xlu1 %3488  ;;  %2913 = vadd.xlane.f32.xlu0 %v2912_v48  ;;  %v3191_v6 = vpop.xlane.xlu0 %3190  ;;  %v2909_v33 = vsel %vm1003_vm0, %v7943_v1, 0.0 }
 0x53a   : > { %5866 = vpow2.f32 %v2907_v42  ;;  %v3499_v32 = vsub.f32 %v7851_v8, %v3489_v3  ;;  %v3199_v22 = vsub.f32 %v7845_v63, %v3191_v6  ;;  %2910 = vadd.xlane.f32.xlu1 %v2909_v33 }
 0x53b   : > { %5868 = vpow2.f32 %v3206_v9 }
 0x53c   : > { %v3503_v59 = vmul.f32 1.442695, %v3499_v32  ;;  %v3204_v37 = vmul.f32 1.442695, %v3199_v22 }
 0x53d   : > { %v3197_v52 = vpop.xlane.xlu0 %3196 }
 0x53e   : > { %v3201_v5 = vsub.f32 %v7849_v54, %v3197_v52  ;;  %5870 = vpow2.f32 %v3204_v37 }
 0x53f   : > { %5872 = vpow2.f32 %v3503_v59 }
 0x540   : > { %v7952_v45 = vpop.eup %5862  ;;  %v3208_v55 = vmul.f32 1.442695, %v3201_v5 }
 0x541   : > { %v3495_v0 = vpop.xlane.xlu1 %3494  ;;  %v3492_v40 = vpop.xlane.xlu0 %3491  ;;  %v2915_v34 = vsel %vm1003_vm0, %v7952_v45, 0.0 }
 0x542   : > { %v7956_v8 = vpop.eup %5864  ;;  %5874 = vpow2.f32 %v3208_v55  ;;  %v3501_v63 = vsub.f32 %v7861_v36, %v3495_v0  ;;  %v3500_v61 = vsub.f32 %v7859_v50, %v3492_v40  ;;  %2916 = vadd.xlane.f32.xlu1 %v2915_v34 }
 0x543   : > { %v3210_v41 = vsel %vm1003_vm0, %v7956_v8, 0.0 }
 0x544   : > { %v7960_v10 = vpop.eup %5866  ;;  %v3507_v54 = vmul.f32 1.442695, %v3501_v63  ;;  %v3505_v56 = vmul.f32 1.442695, %v3500_v61 }
 0x545   : > { %v3498_v38 = vpop.xlane.xlu0 %3497  ;;  %v2918_v28 = vsel %vm1003_vm0, %v7960_v10, 0.0  ;;  %v7966_v57 = vpop.eup %5868 }
 0x546   : > { %5876 = vpow2.f32 %v3507_v54  ;;  %v3502_v21 = vsub.f32 %v7863_v19, %v3498_v38  ;;  %3211 = vadd.xlane.f32.xlu1 %v3210_v41  ;;  %2919 = vadd.xlane.f32.xlu0 %v2918_v28  ;;  %v3216_v35 = vsel %vm1003_vm0, %v7966_v57, 0.0 }
 0x547   : > { %5878 = vpow2.f32 %v3505_v56 }
 0x548   : > { %v3509_v50 = vmul.f32 1.442695, %v3502_v21  ;;  %v7969_v36 = vpop.eup %5870 }
 0x549   : > { %v3790_v18 = vpop.xlane.xlu1 %3789  ;;  %v3793_v15 = vpop.xlane.xlu0 %3792  ;;  %v3213_v19 = vsel %vm1003_vm0, %v7969_v36, 0.0 }
 0x54a   : > { %v7973_v2 = vpop.eup %5872  ;;  %5880 = vpow2.f32 %v3509_v50  ;;  %v3800_v46 = vsub.f32 %v7873_v16, %v3790_v18  ;;  %v3801_v27 = vsub.f32 %v7871_v47, %v3793_v15  ;;  %3217 = vadd.xlane.f32.xlu1 %v3216_v35  ;;  %3214 = vadd.xlane.f32.xlu0 %v3213_v19 }
 0x54b   : > { %v3511_v42 = vsel %vm1003_vm0, %v7973_v2, 0.0 }
 0x54c   : > { %v7979_v13 = vpop.eup %5874  ;;  %v3804_v43 = vmul.f32 1.442695, %v3800_v46  ;;  %v3806_v9 = vmul.f32 1.442695, %v3801_v27 }
 0x54d   : > { %v3219_v48 = vsel %vm1003_vm0, %v7979_v13, 0.0 }
 0x54e   : > { %5882 = vpow2.f32 %v3804_v43  ;;  %3512 = vadd.xlane.f32.xlu1 %v3511_v42  ;;  %3220 = vadd.xlane.f32.xlu0 %v3219_v48 }
 0x54f   : > { %5884 = vpow2.f32 %v3806_v9 }
 0x550   : > { %v7985_v47 = vpop.eup %5876  ;;  %v3799_v16 = vpop.xlane.xlu0 %3798 }
 0x551   : > { %v7987_v3 = vpop.eup %5878  ;;  %v3803_v6 = vsub.f32 %v7879_v53, %v3799_v16  ;;  %v3796_v33 = vpop.xlane.xlu1 %3795  ;;  %v3517_v32 = vsel %vm1003_vm0, %v7985_v47, 0.0 }
 0x552   : > { %v3802_v22 = vsub.f32 %v7881_v11, %v3796_v33  ;;  %3518 = vadd.xlane.f32.xlu1 %v3517_v32  ;;  %v3514_v59 = vsel %vm1003_vm0, %v7987_v3, 0.0 }
 0x553   : > { %v3810_v37 = vmul.f32 1.442695, %v3803_v6  ;;  %3515 = vadd.xlane.f32.xlu0 %v3514_v59 }
 0x554   : > { %v7995_v52 = vpop.eup %5880  ;;  %v3808_v5 = vmul.f32 1.442695, %v3802_v22 }
 0x555   : > { %5886 = vpow2.f32 %v3810_v37  ;;  %v3520_v55 = vsel %vm1003_vm0, %v7995_v52, 0.0 }
 0x556   : > { %5888 = vpow2.f32 %v3808_v5 }
 0x557   : > { %3521 = vadd.xlane.f32.xlu0 %v3520_v55 }
 0x558   : > { %v7999_v53 = vpop.eup %5882  ;;  %v4094_v0 = vpop.xlane.xlu0 %4093 }
 0x559   : > { %v8001_v40 = vpop.eup %5884  ;;  %v4102_v11 = vsub.f32 %v7887_v60, %v4094_v0  ;;  %v4091_v34 = vpop.xlane.xlu1 %4090  ;;  %v3812_v63 = vsel %vm1003_vm0, %v7999_v53, 0.0 }
 0x55a   : > { %v4101_v61 = vsub.f32 %v7889_v39, %v4091_v34  ;;  %3813 = vadd.xlane.f32.xlu1 %v3812_v63  ;;  %v3815_v54 = vsel %vm1003_vm0, %v8001_v40, 0.0 }
 0x55b   : > { %v4107_v56 = vmul.f32 1.442695, %v4102_v11  ;;  %3816 = vadd.xlane.f32.xlu0 %v3815_v54 }
 0x55c   : > { %v4105_v38 = vmul.f32 1.442695, %v4101_v61 }
 0x55d   : > { %5890 = vpow2.f32 %v4107_v56 }
 0x55e   : > { %5892 = vpow2.f32 %v4105_v38 }
 0x55f   : > { %v8009_v41 = vpop.eup %5886 }
 0x560   : > { %v8011_v28 = vpop.eup %5888  ;;  %v4100_v60 = vpop.xlane.xlu0 %4099  ;;  %v3821_v21 = vsel %vm1003_vm0, %v8009_v41, 0.0 }
 0x561   : > { %v4104_v50 = vsub.f32 %v7895_v26, %v4100_v60  ;;  %v4097_v39 = vpop.xlane.xlu1 %4096  ;;  %3822 = vadd.xlane.f32.xlu0 %v3821_v21  ;;  %v3818_v18 = vsel %vm1003_vm0, %v8011_v28, 0.0 }
 0x562   : > { %v4103_v15 = vsub.f32 %v7897_v49, %v4097_v39  ;;  %3819 = vadd.xlane.f32.xlu1 %v3818_v18 }
 0x563   : > { %v4111_v35 = vmul.f32 1.442695, %v4104_v50 }
 0x564   : > { %v4109_v46 = vmul.f32 1.442695, %v4103_v15  ;;  %v4395_v27 = vpop.xlane.xlu0 %4394 }
 0x565   : > { %5894 = vpow2.f32 %v4111_v35  ;;  %v4403_v19 = vsub.f32 %v7903_v29, %v4395_v27  ;;  %v4392_v43 = vpop.xlane.xlu1 %4391 }
 0x566   : > { %5896 = vpow2.f32 %v4109_v46  ;;  %v4402_v9 = vsub.f32 %v7905_v24, %v4392_v43 }
 0x567   : > { %v8021_v42 = vpop.eup %5890  ;;  %v4408_v26 = vmul.f32 1.442695, %v4403_v19 }
 0x568   : > { %v8023_v48 = vpop.eup %5892  ;;  %v4406_v16 = vmul.f32 1.442695, %v4402_v9  ;;  %v4401_v6 = vpop.xlane.xlu0 %4400  ;;  %v4116_v49 = vsel %vm1003_vm0, %v8021_v42, 0.0 }
 0x569   : > { %5898 = vpow2.f32 %v4408_v26  ;;  %v4405_v33 = vsub.f32 %v7911_v12, %v4401_v6  ;;  %v4398_v32 = vpop.xlane.xlu1 %4397  ;;  %4117 = vadd.xlane.f32.xlu0 %v4116_v49  ;;  %v4113_v29 = vsel %vm1003_vm0, %v8023_v48, 0.0 }
 0x56a   : > { %5900 = vpow2.f32 %v4406_v16  ;;  %v4404_v24 = vsub.f32 %v7913_v7, %v4398_v32  ;;  %4114 = vadd.xlane.f32.xlu1 %v4113_v29 }
 0x56b   : > { %v4412_v22 = vmul.f32 1.442695, %v4405_v33 }
 0x56c   : > { %v4410_v59 = vmul.f32 1.442695, %v4404_v24  ;;  %v4696_v37 = vpop.xlane.xlu0 %4695 }
 0x56d   : > { %5902 = vpow2.f32 %v4412_v22  ;;  %v4704_v5 = vsub.f32 %v7919_v51, %v4696_v37  ;;  %v4693_v55 = vpop.xlane.xlu1 %4692 }
 0x56e   : > { %5904 = vpow2.f32 %v4410_v59  ;;  %v4703_v0 = vsub.f32 %v7921_v4, %v4693_v55 }
 0x56f   : > { %v8033_v12 = vpop.eup %5894  ;;  %v4709_v11 = vmul.f32 1.442695, %v4704_v5 }
 0x570   : > { %v8035_v34 = vpop.eup %5896  ;;  %v4707_v63 = vmul.f32 1.442695, %v4703_v0  ;;  %v4702_v61 = vpop.xlane.xlu0 %4701  ;;  %v4122_v7 = vsel %vm1003_vm0, %v8033_v12, 0.0 }
 0x571   : > { %5906 = vpow2.f32 %v4709_v11  ;;  %v4706_v54 = vsub.f32 %v7927_v14, %v4702_v61  ;;  %v4699_v56 = vpop.xlane.xlu1 %4698  ;;  %4123 = vadd.xlane.f32.xlu0 %v4122_v7  ;;  %v4119_v51 = vsel %vm1003_vm0, %v8035_v34, 0.0 }
 0x572   : > { %5908 = vpow2.f32 %v4707_v63  ;;  %v4705_v4 = vsub.f32 %v7929_v30, %v4699_v56  ;;  %4120 = vadd.xlane.f32.xlu1 %v4119_v51 }
 0x573   : > { %v8043_v38 = vpop.eup %5898  ;;  %v4713_v60 = vmul.f32 1.442695, %v4706_v54 }
 0x574   : > { %v8045_v21 = vpop.eup %5900  ;;  %v4711_v50 = vmul.f32 1.442695, %v4705_v4  ;;  %v4417_v39 = vsel %vm1003_vm0, %v8043_v38, 0.0 }
 0x575   : > { %5910 = vpow2.f32 %v4713_v60  ;;  %4418 = vadd.xlane.f32.xlu0 %v4417_v39  ;;  %v4414_v14 = vsel %vm1003_vm0, %v8045_v21, 0.0 }
 0x576   : > { %5912 = vpow2.f32 %v4711_v50  ;;  %4415 = vadd.xlane.f32.xlu1 %v4414_v14 }
 0x577   : > { %v8051_v18 = vpop.eup %5902 }
 0x578   : > { %v8053_v30 = vpop.eup %5904  ;;  %v4423_v15 = vsel %vm1003_vm0, %v8051_v18, 0.0 }
 0x579   : > { %4424 = vadd.xlane.f32.xlu0 %v4423_v15  ;;  %v4420_v35 = vsel %vm1003_vm0, %v8053_v30, 0.0 }
 0x57a   : > { %4421 = vadd.xlane.f32.xlu1 %v4420_v35 }
 0x57b   : > { %v8059_v46 = vpop.eup %5906 }
 0x57c   : > { %v8061_v27 = vpop.eup %5908  ;;  %v4718_v19 = vsel %vm1003_vm0, %v8059_v46, 0.0 }
 0x57d   : > { %4719 = vadd.xlane.f32.xlu0 %v4718_v19  ;;  %v4715_v43 = vsel %vm1003_vm0, %v8061_v27, 0.0 }
 0x57e   : > { %4716 = vadd.xlane.f32.xlu1 %v4715_v43 }
 0x57f   : > { %v8067_v9 = vpop.eup %5910 }
 0x580   : > { %v8069_v26 = vpop.eup %5912  ;;  %v4724_v16 = vsel %vm1003_vm0, %v8067_v9, 0.0 }
 0x581   : > { %4725 = vadd.xlane.f32.xlu0 %v4724_v16  ;;  %v4721_v6 = vsel %vm1003_vm0, %v8069_v26, 0.0 }
 0x582   : > { %4722 = vadd.xlane.f32.xlu1 %v4721_v6 }
 0x5c6   : > { %v2914_v49 = vpop.xlane.xlu0 %2913 }
 0x5c7   : > { %5914 = vrcp.f32 %v2914_v49  ;;  %v2911_v33 = vpop.xlane.xlu1 %2910 }
 0x5c8   : > { %5916 = vrcp.f32 %v2911_v33 }
 0x5cf   : > { %v2917_v32 = vpop.xlane.xlu1 %2916 }
 0x5d0   : > { %5918 = vrcp.f32 %v2917_v32 }
 0x5d1   : > { %v5915_v29 = vpop.eup %5914 }
 0x5d2   : > { %v5917_v24 = vpop.eup %5916  ;;  %v2926_v5 = vmul.f32 %v5915_v29, %v7941_v20 }
 0x5d3   : > { %v3212_v22 = vpop.xlane.xlu1 %3211  ;;  %v2920_v59 = vpop.xlane.xlu0 %2919  ;;  %v2925_v37 = vmul.f32 %v5917_v24, %v7943_v1 }
 0x5d4   : > { %5920 = vrcp.f32 %v3212_v22 }
 0x5d5   : > { %5922 = vrcp.f32 %v2920_v59  ;;  %5595 = vmatprep.mubr.msk.f32.mxu1 %vm1003_vm0, %v2925_v37 }
 0x5d6   : > { %5596 = vmatmul.mubr.msk.f32.vlgmr.msra.gmra.mrb[28].mxu1 %vm1003_vm0, %v2926_v5 }
 0x5d7   : > { %5774 = vmatpush3.bf16.xpose.msk.msra.mxu1 %vm7307_vm2, %v7776_v25  ;;  %v3218_v55 = vpop.xlane.xlu1 %3217  ;;  %v3215_v0 = vpop.xlane.xlu0 %3214 }
 0x5d8   : > { %5924 = vrcp.f32 %v3218_v55  ;;  %5781 = vmatprep.subr.msk.bf16.mxu1 %vm7307_vm2, %v7786_v23 }
 0x5d9   : > { %5926 = vrcp.f32 %v3215_v0 }
 0x5da   : > { %v5919_v1 = vpop.eup %5918 }
 0x5db   : > { %v3513_v20 = vpop.xlane.xlu1 %3512  ;;  %v2927_v11 = vmul.f32 %v5919_v1, %v7952_v45  ;;  %v3221_v63 = vpop.xlane.xlu0 %3220 }
 0x5dc   : > { %5928 = vrcp.f32 %v3513_v20 }
 0x5dd   : > { %5930 = vrcp.f32 %v3221_v63  ;;  %5598 = vmatprep.mubr.msk.f32.mxu1 %vm1003_vm0, %v2927_v11 }
 0x5de   : > { %v5921_v61 = vpop.eup %5920 }
 0x5df   : > { %v5923_v7 = vpop.eup %5922  ;;  %v3519_v25 = vpop.xlane.xlu1 %3518  ;;  %v3226_v54 = vmul.f32 %v5921_v61, %v7956_v8 }
 0x5e0   : > { %5932 = vrcp.f32 %v3519_v25  ;;  %v3516_v56 = vpop.xlane.xlu0 %3515  ;;  %v2928_v51 = vmul.f32 %v5923_v7, %v7960_v10 }
 0x5e1   : > { %5934 = vrcp.f32 %v3516_v56 }
 0x5e2   : > { %v5925_v4 = vpop.eup %5924  ;;  %5599 = vmatmul.mubr.msk.f32.gmra.mrb[30].mxu1 %vm1003_vm0, %v2928_v51 }
 0x5e3   : > { %v5927_v60 = vpop.eup %5926  ;;  %5615 = vmatprep.mubr.msk.f32.mxu1 %vm1003_vm0, %v3226_v54  ;;  %v3228_v45 = vmul.f32 %v5925_v4, %v7966_v57 }
 0x5e4   : > { %v3227_v50 = vmul.f32 %v5927_v60, %v7969_v36  ;;  %v3522_v39 = vpop.xlane.xlu0 %3521 }
 0x5e5   : > { %5936 = vrcp.f32 %v3522_v39 }
 0x5e6   : > { %v5929_v14 = vpop.eup %5928  ;;  %5616 = vmatmul.mubr.msk.f32.vlgmr.msra.gmra.mrb[32].mxu1 %vm1003_vm0, %v3227_v50 }
 0x5e7   : > { %v5931_v8 = vpop.eup %5930  ;;  %5784 = vmatpush3.bf16.xpose.msk.msra.mxu1 %vm7307_vm2, %v7786_v23  ;;  %5618 = vmatprep.mubr.msk.f32.mxu1 %vm1003_vm0, %v3228_v45  ;;  %v3814_v10 = vpop.xlane.xlu1 %3813  ;;  %v3527_v15 = vmul.f32 %v5929_v14, %v7973_v2 }
 0x5e8   : > { %5791 = vmatprep.subr.msk.bf16.mxu1 %vm7307_vm2, %v7793_v62  ;;  %5938 = vrcp.f32 %v3814_v10  ;;  %v3817_v57 = vpop.xlane.xlu0 %3816  ;;  %v3229_v36 = vmul.f32 %v5931_v8, %v7979_v13 }
 0x5e9   : > { %5940 = vrcp.f32 %v3817_v57 }
 0x5ea   : > { %v5933_v35 = vpop.eup %5932  ;;  %5619 = vmatmul.mubr.msk.f32.gmra.mrb[34].mxu1 %vm1003_vm0, %v3229_v36 }
 0x5eb   : > { %v5935_v19 = vpop.eup %5934  ;;  %5635 = vmatprep.mubr.msk.f32.mxu1 %vm1003_vm0, %v3527_v15  ;;  %v3529_v23 = vmul.f32 %v5933_v35, %v7985_v47 }
 0x5ec   : > { %v3528_v43 = vmul.f32 %v5935_v19, %v7987_v3 }
 0x5ee   : > { %5636 = vmatmul.mubr.msk.f32.vlgmr.msra.gmra.mrb[36].mxu1 %vm1003_vm0, %v3528_v43  ;;  %v3823_v2 = vpop.xlane.xlu0 %3822 }
 0x5ef   : > { %v5937_v16 = vpop.eup %5936  ;;  %5794 = vmatpush3.bf16.xpose.msk.msra.mxu1 %vm7307_vm2, %v7793_v62  ;;  %5638 = vmatprep.mubr.msk.f32.mxu1 %vm1003_vm0, %v3529_v23  ;;  %5942 = vrcp.f32 %v3823_v2  ;;  %v3820_v13 = vpop.xlane.xlu1 %3819 }
 0x5f0   : > { %5801 = vmatprep.subr.msk.bf16.mxu1 %vm7307_vm2, %v7799_v44  ;;  %5944 = vrcp.f32 %v3820_v13  ;;  %v3530_v47 = vmul.f32 %v5937_v16, %v7995_v52 }
 0x5f2   : > { %v5939_v3 = vpop.eup %5938  ;;  %5639 = vmatmul.mubr.msk.f32.gmra.mrb[38].mxu1 %vm1003_vm0, %v3530_v47 }
 0x5f3   : > { %v5941_v6 = vpop.eup %5940  ;;  %v3828_v49 = vmul.f32 %v5939_v3, %v7999_v53 }
 0x5f4   : > { %v3829_v33 = vmul.f32 %v5941_v6, %v8001_v40 }
 0x5f5   : > { %5655 = vmatprep.mubr.msk.f32.mxu1 %vm1003_vm0, %v3828_v49 }
 0x5f6   : > { %5656 = vmatmul.mubr.msk.f32.vlgmr.msra.gmra.mrb[40].mxu1 %vm1003_vm0, %v3829_v33  ;;  %v4118_v62 = vpop.xlane.xlu0 %4117 }
 0x5f7   : > { %5804 = vmatpush3.bf16.xpose.msk.msra.mxu1 %vm7307_vm2, %v7799_v44  ;;  %5946 = vrcp.f32 %v4118_v62  ;;  %v4115_v32 = vpop.xlane.xlu1 %4114 }
 0x5f8   : > { %5948 = vrcp.f32 %v4115_v32  ;;  %5811 = vmatprep.subr.msk.bf16.mxu1 %vm7307_vm2, %v7802_v58 }
 0x5f9   : > { %v5943_v52 = vpop.eup %5942 }
 0x5fa   : > { %v5945_v53 = vpop.eup %5944  ;;  %v3831_v29 = vmul.f32 %v5943_v52, %v8009_v41 }
 0x5fb   : > { %v3830_v40 = vmul.f32 %v5945_v53, %v8011_v28 }
 0x5fd   : > { %5658 = vmatprep.mubr.msk.f32.mxu1 %vm1003_vm0, %v3830_v40 }
 0x5fe   : > { %5659 = vmatmul.mubr.msk.f32.gmra.mrb[42].mxu1 %vm1003_vm0, %v3831_v29  ;;  %v4124_v24 = vpop.xlane.xlu0 %4123 }
 0x5ff   : > { %5950 = vrcp.f32 %v4124_v24  ;;  %v4121_v44 = vpop.xlane.xlu1 %4120 }
 0x600   : > { %5952 = vrcp.f32 %v4121_v44 }
 0x601   : > { %v5947_v22 = vpop.eup %5946 }
 0x602   : > { %v5949_v59 = vpop.eup %5948  ;;  %v4419_v37 = vpop.xlane.xlu0 %4418  ;;  %v4130_v0 = vmul.f32 %v5947_v22, %v8021_v42 }
 0x603   : > { %5954 = vrcp.f32 %v4419_v37  ;;  %v4416_v5 = vpop.xlane.xlu1 %4415  ;;  %v4129_v55 = vmul.f32 %v5949_v59, %v8023_v48 }
 0x604   : > { %5956 = vrcp.f32 %v4416_v5 }
 0x605   : > { %5675 = vmatprep.mubr.msk.f32.mxu1 %vm1003_vm0, %v4129_v55 }
 0x606   : > { %5676 = vmatmul.mubr.msk.f32.vlgmr.msra.gmra.mrb[44].mxu1 %vm1003_vm0, %v4130_v0  ;;  %v4425_v41 = vpop.xlane.xlu0 %4424 }
 0x607   : > { %5814 = vmatpush3.bf16.xpose.msk.msra.mxu1 %vm7307_vm2, %v7802_v58  ;;  %5958 = vrcp.f32 %v4425_v41  ;;  %v4422_v28 = vpop.xlane.xlu1 %4421 }
 0x608   : > { %5960 = vrcp.f32 %v4422_v28  ;;  %5821 = vmatprep.subr.msk.bf16.mxu1 %vm7307_vm2, %v7807_v17 }
 0x609   : > { %v5951_v48 = vpop.eup %5950 }
 0x60a   : > { %v5953_v1 = vpop.eup %5952  ;;  %v4720_v42 = vpop.xlane.xlu0 %4719  ;;  %v4132_v63 = vmul.f32 %v5951_v48, %v8033_v12 }
 0x60b   : > { %5962 = vrcp.f32 %v4720_v42  ;;  %v4717_v20 = vpop.xlane.xlu1 %4716  ;;  %v4131_v11 = vmul.f32 %v5953_v1, %v8035_v34 }
 0x60c   : > { %5964 = vrcp.f32 %v4717_v20 }
 0x60d   : > { %v5955_v61 = vpop.eup %5954  ;;  %5678 = vmatprep.mubr.msk.f32.mxu1 %vm1003_vm0, %v4131_v11 }
 0x60e   : > { %v5957_v58 = vpop.eup %5956  ;;  %5679 = vmatmul.mubr.msk.f32.gmra.mrb[46].mxu1 %vm1003_vm0, %v4132_v63  ;;  %v4726_v7 = vpop.xlane.xlu0 %4725  ;;  %v4431_v56 = vmul.f32 %v5955_v61, %v8043_v38 }
 0x60f   : > { %5966 = vrcp.f32 %v4726_v7  ;;  %v4723_v25 = vpop.xlane.xlu1 %4722  ;;  %v4430_v54 = vmul.f32 %v5957_v58, %v8045_v21 }
 0x610   : > { %5968 = vrcp.f32 %v4723_v25 }
 0x611   : > { %v5959_v51 = vpop.eup %5958  ;;  %5695 = vmatprep.mubr.msk.f32.mxu1 %vm1003_vm0, %v4430_v54 }
 0x612   : > { %v5961_v34 = vpop.eup %5960  ;;  %5696 = vmatmul.mubr.msk.f32.vlgmr.msra.gmra.mrb[48].mxu1 %vm1003_vm0, %v4431_v56  ;;  %v4433_v4 = vmul.f32 %v5959_v51, %v8051_v18 }
 0x613   : > { %5824 = vmatpush3.bf16.xpose.msk.msra.mxu1 %vm7307_vm2, %v7807_v17  ;;  %v4432_v12 = vmul.f32 %v5961_v34, %v8053_v30 }
 0x615   : > { %v5963_v60 = vpop.eup %5962  ;;  %5698 = vmatprep.mubr.msk.f32.mxu1 %vm1003_vm0, %v4432_v12 }
 0x616   : > { %v5965_v21 = vpop.eup %5964  ;;  %5699 = vmatmul.mubr.msk.f32.gmra.mrb[50].mxu1 %vm1003_vm0, %v4433_v4  ;;  %v4732_v45 = vmul.f32 %v5963_v60, %v8059_v46 }
 0x617   : > { %v4731_v38 = vmul.f32 %v5965_v21, %v8061_v27 }
 0x619   : > { %v5967_v50 = vpop.eup %5966  ;;  %5715 = vmatprep.mubr.msk.f32.mxu1 %vm1003_vm0, %v4731_v38 }
 0x61a   : > { %v5969_v39 = vpop.eup %5968  ;;  %5716 = vmatmul.mubr.msk.f32.vlgmr.msra.gmra.mrb[52].mxu1 %vm1003_vm0, %v4732_v45  ;;  %v4734_v17 = vmul.f32 %v5967_v50, %v8067_v9 }
 0x61b   : > { %v4733_v31 = vmul.f32 %v5969_v39, %v8069_v26 }
 0x61d   : > { %5718 = vmatprep.mubr.msk.f32.mxu1 %vm1003_vm0, %v4733_v31 }
 0x61e   : > { %5719 = vmatmul.mubr.msk.f32.gmra.mrb[54].mxu1 %vm1003_vm0, %v4734_v17 }
 0x6a9   : > { %v5597_v18 = vpop.f32.mrb[28].mxu1 }
 0x6aa   : > { %3038 = vrot.lane.b32.xlu0 %v5597_v18, %s6005_s30  ;;  %v3013_v30 = vpop.f32.mrb[29].mxu1 }
 0x6ab   : > { %3036 = vrot.lane.b32.xlu1 %v3013_v30, %s6005_s30 }
 0x6b5   : > { %v5600_v46 = vpop.f32.mrb[30].mxu1 }
 0x6b6   : > { %3042 = vrot.lane.b32.xlu1 %v5600_v46, %s6005_s30  ;;  %v3023_v27 = vpop.f32.mrb[31].mxu1 }
 0x6b9   : > { %v5617_v14 = vpop.f32.mrb[32].mxu1 }
 0x6ba   : > { %3040 = vrot.lane.b32.xlu1 %v3023_v27, %s6005_s30  ;;  %v3314_v8 = vpop.f32.mrb[33].mxu1 }
 0x6bb   : > { %3337 = vrot.lane.b32.xlu0 %v3314_v8, %s6006_s16 }
 0x6bd   : > { %v5620_v26 = vpop.f32.mrb[34].mxu1 }
 0x6be   : > { %3339 = vrot.lane.b32.xlu1 %v5617_v14, %s6006_s16  ;;  %v3324_v9 = vpop.f32.mrb[35].mxu1 }
 0x6bf   : > { %3341 = vrot.lane.b32.xlu0 %v3324_v9, %s6006_s16 }
 0x6c1   : > { %v5637_v10 = vpop.f32.mrb[36].mxu1 }
 0x6c2   : > { %3343 = vrot.lane.b32.xlu1 %v5620_v26, %s6006_s16  ;;  %v3615_v15 = vpop.f32.mrb[37].mxu1 }
 0x6c3   : > { %3638 = vrot.lane.b32.xlu0 %v3615_v15, %s6007_s27 }
 0x6c5   : > { %v5640_v57 = vpop.f32.mrb[38].mxu1 }
 0x6c6   : > { %3640 = vrot.lane.b32.xlu1 %v5637_v10, %s6007_s27  ;;  %v3625_v36 = vpop.f32.mrb[39].mxu1 }
 0x6c7   : > { %3642 = vrot.lane.b32.xlu0 %v3625_v36, %s6007_s27 }
 0x6c9   : > { %v5657_v35 = vpop.f32.mrb[40].mxu1 }
 0x6ca   : > { %3644 = vrot.lane.b32.xlu1 %v5640_v57, %s6007_s27  ;;  %v3916_v19 = vpop.f32.mrb[41].mxu1 }
 0x6cb   : > { %3939 = vrot.lane.b32.xlu0 %v3916_v19, %s6008_s25 }
 0x6ce   : > { %3941 = vrot.lane.b32.xlu1 %v5657_v35, %s6008_s25 }
 0x6d1   : > { %v5660_v23 = vpop.f32.mrb[42].mxu1 }
 0x6d2   : > { %3945 = vrot.lane.b32.xlu1 %v5660_v23, %s6008_s25  ;;  %v3926_v43 = vpop.f32.mrb[43].mxu1 }
 0x6d3   : > { %3943 = vrot.lane.b32.xlu0 %v3926_v43, %s6008_s25 }
 0x6d9   : > { %v5677_v2 = vpop.f32.mrb[44].mxu1 }
 0x6da   : > { %4242 = vrot.lane.b32.xlu1 %v5677_v2, %s6009_s17  ;;  %v4217_v16 = vpop.f32.mrb[45].mxu1 }
 0x6db   : > { %4240 = vrot.lane.b32.xlu0 %v4217_v16, %s6009_s17 }
 0x6e1   : > { %v5680_v13 = vpop.f32.mrb[46].mxu1 }
 0x6e2   : > { %4246 = vrot.lane.b32.xlu1 %v5680_v13, %s6009_s17  ;;  %v4227_v47 = vpop.f32.mrb[47].mxu1 }
 0x6e3   : > { %4244 = vrot.lane.b32.xlu0 %v4227_v47, %s6009_s17 }
 0x6e5   : > { %v5697_v3 = vpop.f32.mrb[48].mxu1 }
 0x6e6   : > { %4543 = vrot.lane.b32.xlu1 %v5697_v3, %s6010_s24  ;;  %v4518_v6 = vpop.f32.mrb[49].mxu1 }
 0x6e7   : > { %4541 = vrot.lane.b32.xlu0 %v4518_v6, %s6010_s24 }
 0x6e9   : > { %v5700_v49 = vpop.f32.mrb[50].mxu1 }
 0x6ea   : > { %4547 = vrot.lane.b32.xlu1 %v5700_v49, %s6010_s24  ;;  %v4528_v33 = vpop.f32.mrb[51].mxu1 }
 0x6eb   : > { %4545 = vrot.lane.b32.xlu0 %v4528_v33, %s6010_s24 }
 0x6ed   : > { %v5717_v62 = vpop.f32.mrb[52].mxu1 }
 0x6ee   : > { %4844 = vrot.lane.b32.xlu1 %v5717_v62, %s6011_s18  ;;  %v4819_v32 = vpop.f32.mrb[53].mxu1 }
 0x6ef   : > { %4842 = vrot.lane.b32.xlu0 %v4819_v32, %s6011_s18 }
 0x6f1   : > { %v5720_v52 = vpop.f32.mrb[54].mxu1 }
 0x6f2   : > { %4848 = vrot.lane.b32.xlu1 %v5720_v52, %s6011_s18  ;;  %v4829_v53 = vpop.f32.mrb[55].mxu1 }
 0x6f3   : > { %4846 = vrot.lane.b32.xlu0 %v4829_v53, %s6011_s18 }
 0x71c   : > { %v3039_v40 = vpop.permute.xlu0 %3038 }
 0x71d   : > { %3050 = vst.msk [vmem:[%s7813_s15 + $0x8] sm:$0xff] %vm3048_vm3, %v3039_v40  ;;  %v3037_v29 = vpop.permute.xlu1 %3036 }
 0x71e   : > { %3049 = vst.msk [vmem:[%s7813_s15] sm:$0xff] %vm3048_vm3, %v3037_v29 }
 0x728   : > { %v3043_v24 = vpop.permute.xlu1 %3042 }
 0x729   : > { %3052 = vst.msk [vmem:[%s7813_s15 + $0x18] sm:$0xff] %vm3048_vm3, %v3043_v24 }
 0x72c   : > { %v3041_v44 = vpop.permute.xlu1 %3040 }
 0x72d   : > { %3051 = vst.msk [vmem:[%s7813_s15 + $0x10] sm:$0xff] %vm3048_vm3, %v3041_v44  ;;  %v3338_v22 = vpop.permute.xlu0 %3337 }
 0x72e   : > { %3350 = vst.msk [vmem:[%s7813_s15] sm:$0xff] %vm3349_vm4, %v3338_v22 }
 0x730   : > { %v3340_v59 = vpop.permute.xlu1 %3339 }
 0x731   : > { %3351 = vst.msk [vmem:[%s7813_s15 + $0x8] sm:$0xff] %vm3349_vm4, %v3340_v59  ;;  %v3342_v37 = vpop.permute.xlu0 %3341 }
 0x732   : > { %3352 = vst.msk [vmem:[%s7813_s15 + $0x10] sm:$0xff] %vm3349_vm4, %v3342_v37 }
 0x734   : > { %v3344_v5 = vpop.permute.xlu1 %3343 }
 0x735   : > { %3353 = vst.msk [vmem:[%s7813_s15 + $0x18] sm:$0xff] %vm3349_vm4, %v3344_v5  ;;  %v3639_v55 = vpop.permute.xlu0 %3638 }
 0x736   : > { %3651 = vst.msk [vmem:[%s7813_s15] sm:$0xff] %vm3650_vm5, %v3639_v55 }
 0x738   : > { %v3641_v0 = vpop.permute.xlu1 %3640 }
 0x739   : > { %3652 = vst.msk [vmem:[%s7813_s15 + $0x8] sm:$0xff] %vm3650_vm5, %v3641_v0  ;;  %v3643_v41 = vpop.permute.xlu0 %3642 }
 0x73a   : > { %3653 = vst.msk [vmem:[%s7813_s15 + $0x10] sm:$0xff] %vm3650_vm5, %v3643_v41 }
 0x73c   : > { %v3645_v28 = vpop.permute.xlu1 %3644 }
 0x73d   : > { %3654 = vst.msk [vmem:[%s7813_s15 + $0x18] sm:$0xff] %vm3650_vm5, %v3645_v28  ;;  %v3940_v48 = vpop.permute.xlu0 %3939 }
 0x73e   : > { %3952 = vst.msk [vmem:[%s7813_s15] sm:$0xff] %vm3951_vm6, %v3940_v48 }
 0x740   : > { %v3942_v1 = vpop.permute.xlu1 %3941 }
 0x741   : > { %3953 = vst.msk [vmem:[%s7813_s15 + $0x8] sm:$0xff] %vm3951_vm6, %v3942_v1 }
 0x744   : > { %v3946_v42 = vpop.permute.xlu1 %3945 }
 0x745   : > { %3955 = vst.msk [vmem:[%s7813_s15 + $0x18] sm:$0xff] %vm3951_vm6, %v3946_v42  ;;  %v3944_v20 = vpop.permute.xlu0 %3943 }
 0x746   : > { %3954 = vst.msk [vmem:[%s7813_s15 + $0x10] sm:$0xff] %vm3951_vm6, %v3944_v20 }
 0x74c   : > { %v4243_v11 = vpop.permute.xlu1 %4242 }
 0x74d   : > { %4254 = vst.msk [vmem:[%s7813_s15 + $0x8] sm:$0xff] %vm4252_vm7, %v4243_v11  ;;  %v4241_v63 = vpop.permute.xlu0 %4240 }
 0x74e   : > { %4253 = vst.msk [vmem:[%s7813_s15] sm:$0xff] %vm4252_vm7, %v4241_v63 }
 0x754   : > { %v4247_v61 = vpop.permute.xlu1 %4246 }
 0x755   : > { %4256 = vst.msk [vmem:[%s7813_s15 + $0x18] sm:$0xff] %vm4252_vm7, %v4247_v61  ;;  %v4245_v58 = vpop.permute.xlu0 %4244 }
 0x756   : > { %4255 = vst.msk [vmem:[%s7813_s15 + $0x10] sm:$0xff] %vm4252_vm7, %v4245_v58 }
 0x758   : > { %v4544_v7 = vpop.permute.xlu1 %4543 }
 0x759   : > { %4555 = vst.msk [vmem:[%s7813_s15 + $0x8] sm:$0xff] %vm4553_vm8, %v4544_v7  ;;  %v4542_v25 = vpop.permute.xlu0 %4541 }
 0x75a   : > { %4554 = vst.msk [vmem:[%s7813_s15] sm:$0xff] %vm4553_vm8, %v4542_v25 }
 0x75c   : > { %v4548_v54 = vpop.permute.xlu1 %4547 }
 0x75d   : > { %4557 = vst.msk [vmem:[%s7813_s15 + $0x18] sm:$0xff] %vm4553_vm8, %v4548_v54  ;;  %v4546_v56 = vpop.permute.xlu0 %4545 }
 0x75e   : > { %4556 = vst.msk [vmem:[%s7813_s15 + $0x10] sm:$0xff] %vm4553_vm8, %v4546_v56 }
 0x760   : > { %v4845_v51 = vpop.permute.xlu1 %4844 }
 0x761   : > { %4856 = vst.msk [vmem:[%s7813_s15 + $0x8] sm:$0xff] %vm4854_vm9, %v4845_v51  ;;  %v4843_v34 = vpop.permute.xlu0 %4842 }
 0x762   : > { %4855 = vst.msk [vmem:[%s7813_s15] sm:$0xff] %vm4854_vm9, %v4843_v34 }
 0x764   : > { %v4849_v12 = vpop.permute.xlu1 %4848 }
 0x765   : > { %4858 = vst.msk [vmem:[%s7813_s15 + $0x18] sm:$0xff] %vm4854_vm9, %v4849_v12  ;;  %v4847_v4 = vpop.permute.xlu0 %4846 }
 0x766   : > { %4857 = vst.msk [vmem:[%s7813_s15 + $0x10] sm:$0xff] %vm4854_vm9, %v4847_v4 }
 0x767 PF: > { %s24_s29 = sadd.s32 1, %s6003_s29  }
 0x768   : > { %p21_p4 = scmp.ge.s32.totalorder %s24_s29, 4  }
 0x76a   :  { %23 = sbr.rel (!%p21_p4) target bundleno = 1 (0x1), region = 119 }

</bundles_post_ra>
